<compile_context>
chip_gen: v7x
topology: tpu7x:2x2x1
jax: 0.10.0
libtpu: 0.0.40
codegen_flags: <defaults>
</compile_context>

<pallas_src>
import jax
import jax.numpy as jnp
from jax.experimental import pallas as pl
from jax.experimental.pallas import tpu as pltpu


_VMEM = pl.BlockSpec(memory_space=pltpu.MemorySpace.VMEM)
_LN_EPS = 1e-5
_STD_EPS = 1e-8
_OUT_LANES = 128   # lane-dense kernel output width (decoder weights padded to this)
_OUT_DIM = 2       # real decoder output size (acceleration components)


# ---------------------------------------------------------------------------
# Fused GMN kernel (single pallas_call for the whole Encoder-Process-Decode)
# ---------------------------------------------------------------------------

def _make_fused_gmn_kernel(num_blocks, n_nodes, n_edges):
    f32, bf16 = jnp.float32, jnp.bfloat16
    inv_n = 1.0 / float(n_nodes)      # folded at trace time

    def layer2_ln(h_pre, w2_ref, b2_ref, g_ref, beta_ref):
        """relu -> dense -> LayerNorm. Matmul in bf16 (f32 accumulate), LN math in f32."""
        h = jnp.maximum(h_pre, 0.0)
        y = jnp.dot(h.astype(bf16), w2_ref[...], preferred_element_type=f32) + b2_ref[...]
        mu = jnp.mean(y, axis=-1, keepdims=True)
        var = jnp.mean((y - mu) * (y - mu), axis=-1, keepdims=True)
        return (y - mu) * jax.lax.rsqrt(var + _LN_EPS) * g_ref[...] + beta_ref[...]

    def kernel(*refs):
        (cell_ref, frames_ref, eattr_ref,
         send_col_ref, recv_col_ref, recv_row_ref) = refs[:6]
        w = refs[6:-1]
        o_ref = refs[-1]

        cursor = [0]
        def take(n):
            c = cursor[0]
            cursor[0] = c + n
            return w[c:c + n]

        # --- node normalizer (first-call batch statistics) fused into encoder input ---
        frames = frames_ref[...]                                         # [N,2] (already noised)
        mu_n = jnp.sum(frames, axis=0, keepdims=True) * inv_n            # [1,2]
        sq_n = jnp.sum(frames * frames, axis=0, keepdims=True) * inv_n
        std_n = jnp.maximum(jnp.sqrt(jnp.maximum(sq_n - mu_n * mu_n, 0.0)), _STD_EPS)
        node_feature = (frames - mu_n) / std_n                           # [N,2]

        # one_hot(cell_type, 4)[:, 1:2]  ==  (cell_type == 1)
        one_hot = jnp.where(cell_ref[...] == 1.0, 1.0, 0.0)              # [N,1] f32

        # --- gather / scatter operators built in-kernel as bf16 one-hot matrices ---
        lane_node = jax.lax.broadcasted_iota(jnp.int32, (n_edges, n_nodes), 1)
        g_send = jnp.where(lane_node == send_col_ref[...], 1.0, 0.0).astype(bf16)   # [E,N]
        g_recv = jnp.where(lane_node == recv_col_ref[...], 1.0, 0.0).astype(bf16)   # [E,N]
        sub_node = jax.lax.broadcasted_iota(jnp.int32, (n_nodes, n_edges), 0)
        s_recv = jnp.where(sub_node == recv_row_ref[...], 1.0, 0.0).astype(bf16)    # [N,E]

        # --- node encoder (first-layer weights pre-split: velocity rows / one-hot row) ---
        w1f, w1o, b1, w2, b2, g, beta = take(7)
        h = (jnp.dot(node_feature.astype(bf16), w1f[...], preferred_element_type=f32)
             + one_hot * w1o[...] + b1[...])
        v = layer2_ln(h, w2, b2, g, beta)                                # [N,L]

        # --- edge encoder ---
        w1, b1, w2, b2, g, beta = take(6)
        h = jnp.dot(eattr_ref[...].astype(bf16), w1[...],
                    preferred_element_type=f32) + b1[...]
        e = layer2_ln(h, w2, b2, g, beta)                                # [E,L]

        # --- message-passing blocks (statically unrolled; v/e never leave VMEM) ---
        for _ in range(num_blocks):
            we, ws, wr, b1, w2, b2, g, beta = take(8)
            v_bf = v.astype(bf16)                                        # cast once per block
            e_bf = e.astype(bf16)
            # Weight-folded gathers: (G @ v) @ W  ==  G @ (v @ W).  Since E >= N this
            # is fewer MXU MACs and avoids the [E,L] f32 gather intermediates.
            vs = jnp.dot(v_bf, ws[...], preferred_element_type=f32).astype(bf16)    # [N,H]
            vr = jnp.dot(v_bf, wr[...], preferred_element_type=f32).astype(bf16)    # [N,H]
            # concat([e, v[senders], v[receivers]]) @ W1  folded as a sum of matmuls
            h = (jnp.dot(e_bf, we[...], preferred_element_type=f32)
                 + jnp.dot(g_send, vs, preferred_element_type=f32)
                 + jnp.dot(g_recv, vr, preferred_element_type=f32)
                 + b1[...])
            e = e + layer2_ln(h, w2, b2, g, beta)                        # residual (in-kernel)

            wv, wa, b1, w2, b2, g, beta = take(7)
            e_bf = e.astype(bf16)
            # Scatter-add of edge features to receiver nodes as a bf16 matmul.
            # Keep agg-first order (N <= E makes S@e then @Wa the cheaper association).
            agg = jnp.dot(s_recv, e_bf, preferred_element_type=f32)      # [N,L]
            h = (jnp.dot(v_bf, wv[...], preferred_element_type=f32)
                 + jnp.dot(agg.astype(bf16), wa[...], preferred_element_type=f32)
                 + b1[...])
            v = v + layer2_ln(h, w2, b2, g, beta)                        # residual (in-kernel)

        # --- decoder: output padded to 128 lanes on the host -> unmasked lane-dense store ---
        w1, b1, w2p, b2p = take(4)
        h = jnp.maximum(
            jnp.dot(v.astype(bf16), w1[...], preferred_element_type=f32) + b1[...], 0.0)
        o_ref[...] = jnp.dot(h.astype(bf16), w2p[...], preferred_element_type=f32) + b2p[...]

    return kernel


# ---------------------------------------------------------------------------
# Parameter construction (deterministic) and host-side packing for the kernel
# ---------------------------------------------------------------------------

def _init_mlp(key, in_dim, hidden, out_dim, layernorm):
    k1, k2 = jax.random.split(key)
    p = {
        "w1": (jax.random.normal(k1, (in_dim, hidden), jnp.float32)
               / jnp.sqrt(jnp.float32(in_dim))),
        "b1": jnp.zeros((1, hidden), jnp.float32),
        "w2": (jax.random.normal(k2, (hidden, out_dim), jnp.float32)
               / jnp.sqrt(jnp.float32(hidden))),
        "b2": jnp.zeros((1, out_dim), jnp.float32),
    }
    if layernorm:
        p["gamma"] = jnp.ones((1, out_dim), jnp.float32)
        p["beta"] = jnp.zeros((1, out_dim), jnp.float32)
    return p


def init_gmn_params(key, message_passing_num, node_attr_size, edge_attr_size,
                    latent_dim_size):
    L = latent_dim_size
    keys = jax.random.split(key, 3 + 2 * message_passing_num)
    params = {
        "node_encoder": _init_mlp(keys[0], node_attr_size, L, L, True),
        "edge_encoder": _init_mlp(keys[1], edge_attr_size, L, L, True),
        "decoder": _init_mlp(keys[2], L, L, _OUT_DIM, False),
        "blocks": [],
    }
    for i in range(message_passing_num):
        params["blocks"].append({
            "edge_mlp": _init_mlp(keys[3 + 2 * i], 3 * L, L, L, True),
            "node_mlp": _init_mlp(keys[4 + 2 * i], 2 * L, L, L, True),
        })
    return params


def pack_gmn_params(params, latent_dim_size):
    """Host-side re-layout for the fused kernel:
       - matmul weights cast to bf16 (MXU operands); biases / LN params stay f32,
       - first-layer weights pre-split per concat-part so the kernel needs no
         in-kernel concatenation or weight slicing,
       - decoder output weights zero-padded to 128 lanes for an unmasked store."""
    L = latent_dim_size
    bf16 = jnp.bfloat16

    ne = params["node_encoder"]
    enc_n = (ne["w1"][:2, :].astype(bf16),      # velocity-feature rows (MXU)
             ne["w1"][2:3, :],                  # one-hot row (rank-1 VPU term, f32)
             ne["b1"], ne["w2"].astype(bf16), ne["b2"], ne["gamma"], ne["beta"])

    ee = params["edge_encoder"]
    enc_e = (ee["w1"].astype(bf16), ee["b1"], ee["w2"].astype(bf16), ee["b2"],
             ee["gamma"], ee["beta"])

    blocks = []
    for blk in params["blocks"]:
        em, nm = blk["edge_mlp"], blk["node_mlp"]
        edge = (em["w1"][0:L].astype(bf16), em["w1"][L:2 * L].astype(bf16),
                em["w1"][2 * L:3 * L].astype(bf16),
                em["b1"], em["w2"].astype(bf16), em["b2"], em["gamma"], em["beta"])
        node = (nm["w1"][0:L].astype(bf16), nm["w1"][L:2 * L].astype(bf16),
                nm["b1"], nm["w2"].astype(bf16), nm["b2"], nm["gamma"], nm["beta"])
        blocks.append((edge, node))

    de = params["decoder"]
    w2p = jnp.zeros((L, _OUT_LANES), jnp.float32).at[:, :_OUT_DIM].set(de["w2"]).astype(bf16)
    b2p = jnp.zeros((1, _OUT_LANES), jnp.float32).at[:, :_OUT_DIM].set(de["b2"])
    dec = (de["w1"].astype(bf16), de["b1"], w2p, b2p)

    return {"enc_n": enc_n, "enc_e": enc_e, "blocks": tuple(blocks), "dec": dec}


def _flatten_packed(packed):
    flat = list(packed["enc_n"]) + list(packed["enc_e"])
    for edge, node in packed["blocks"]:
        flat += list(edge) + list(node)
    flat += list(packed["dec"])
    return flat


# ---------------------------------------------------------------------------
# GMN forward: one fused pallas_call
# ---------------------------------------------------------------------------

def gmn_fused_forward(packed, cell_type, frames_noised, edge_attr, senders, receivers):
    n_nodes = cell_type.shape[0]
    n_edges = edge_attr.shape[0]
    num_blocks = len(packed["blocks"])

    send_col = senders.reshape(n_edges, 1).astype(jnp.int32)
    recv_col = receivers.reshape(n_edges, 1).astype(jnp.int32)
    recv_row = receivers.reshape(1, n_edges).astype(jnp.int32)

    args = [cell_type, frames_noised, edge_attr, send_col, recv_col, recv_row]
    args += _flatten_packed(packed)

    kernel = _make_fused_gmn_kernel(num_blocks, n_nodes, n_edges)
    out = pl.pallas_call(
        kernel,
        out_shape=jax.ShapeDtypeStruct((n_nodes, _OUT_LANES), jnp.float32),
        in_specs=[_VMEM] * len(args),
        out_specs=_VMEM,
    )(*args)
    return out[:, :_OUT_DIM]                                   # predicted [N, 2]


# ---------------------------------------------------------------------------
# Output normalizer (pure elementwise on [N,2]; left to XLA fusion by design)
# ---------------------------------------------------------------------------

def _batch_normalize(x, std_eps=_STD_EPS):
    # Normalizer first-call semantics: accumulate this batch from zero accumulators,
    # then normalize with the resulting (== batch) statistics.
    # TODO(synk): carry running accumulators across steps for multi-step training parity.
    cnt = jnp.maximum(jnp.float32(x.shape[0]), 1.0)
    mean = jnp.sum(x, axis=0, keepdims=True) / cnt
    sq = jnp.sum(x * x, axis=0, keepdims=True) / cnt
    std = jnp.maximum(jnp.sqrt(jnp.maximum(sq - mean * mean, 0.0)), std_eps)
    return (x - mean) / std


# ---------------------------------------------------------------------------
# Simulator forward (training path)
# ---------------------------------------------------------------------------

@jax.jit
def simulator_forward(packed_params, x, y, edge_attr, edge_index,
                      velocity_sequence_noise=None):
    cell_type = x[:, 0:1]
    frames = x[:, 1:3]
    if velocity_sequence_noise is not None:
        frames = frames + velocity_sequence_noise

    predicted = gmn_fused_forward(packed_params, cell_type, frames, edge_attr,
                                  edge_index[0], edge_index[1])

    # velocity_to_accelation + output normalizer (elementwise; fused by XLA)
    target_acceleration = y - frames
    target_acceleration_normalized = _batch_normalize(target_acceleration)

    return predicted, target_acceleration_normalized


# ---------------------------------------------------------------------------
# Main
# ---------------------------------------------------------------------------

if __name__ == "__main__":
    message_passing_num = 2
    node_input_size = 3      # 2 normalized velocity components + 1 one-hot column
    edge_input_size = 3
    latent_dim_size = 16

    n_nodes = 64
    n_edges = 128

    key = jax.random.PRNGKey(0)
    k_ct, k_fr, k_y, k_ea, k_ei, k_noise = jax.random.split(key, 6)

    cell_type = jax.random.randint(k_ct, (n_nodes, 1), 0, 4).astype(jnp.float32)
    frames = jax.random.normal(k_fr, (n_nodes, 2), jnp.float32)
    x = jnp.concatenate([cell_type, frames], axis=1)                 # graph.x  [N, 3]
    y = jax.random.normal(k_y, (n_nodes, 2), jnp.float32)            # graph.y  [N, 2]
    edge_attr = jax.random.normal(k_ea, (n_edges, edge_input_size), jnp.float32)
    edge_index = jax.random.randint(k_ei, (2, n_edges), 0, n_nodes)  # [2, E]
    noise = 0.01 * jax.random.normal(k_noise, (n_nodes, 2), jnp.float32)

    params = init_gmn_params(jax.random.PRNGKey(42), message_passing_num,
                             node_input_size, edge_input_size, latent_dim_size)
    packed = pack_gmn_params(params, latent_dim_size)

    predicted, target_acc_norm = simulator_forward(
        packed, x, y, edge_attr, edge_index, noise)

    jax.block_until_ready((predicted, target_acc_norm))
    assert predicted.shape == (n_nodes, 2)
    assert target_acc_norm.shape == (n_nodes, 2)
    print("KERNEL_OK")
</pallas_src>

<mosaic_0001>
module attributes {stable_mosaic.version = 11 : i64} {
  func.func @kernel(%arg0: memref<64x1xf32, #tpu.memory_space<vmem>>, %arg1: memref<64x2xf32, #tpu.memory_space<vmem>>, %arg2: memref<128x3xf32, #tpu.memory_space<vmem>>, %arg3: memref<128x1xi32, #tpu.memory_space<vmem>>, %arg4: memref<128x1xi32, #tpu.memory_space<vmem>>, %arg5: memref<1x128xi32, #tpu.memory_space<vmem>>, %arg6: memref<2x16xbf16, #tpu.memory_space<vmem>>, %arg7: memref<1x16xf32, #tpu.memory_space<vmem>>, %arg8: memref<1x16xf32, #tpu.memory_space<vmem>>, %arg9: memref<16x16xbf16, #tpu.memory_space<vmem>>, %arg10: memref<1x16xf32, #tpu.memory_space<vmem>>, %arg11: memref<1x16xf32, #tpu.memory_space<vmem>>, %arg12: memref<1x16xf32, #tpu.memory_space<vmem>>, %arg13: memref<3x16xbf16, #tpu.memory_space<vmem>>, %arg14: memref<1x16xf32, #tpu.memory_space<vmem>>, %arg15: memref<16x16xbf16, #tpu.memory_space<vmem>>, %arg16: memref<1x16xf32, #tpu.memory_space<vmem>>, %arg17: memref<1x16xf32, #tpu.memory_space<vmem>>, %arg18: memref<1x16xf32, #tpu.memory_space<vmem>>, %arg19: memref<16x16xbf16, #tpu.memory_space<vmem>>, %arg20: memref<16x16xbf16, #tpu.memory_space<vmem>>, %arg21: memref<16x16xbf16, #tpu.memory_space<vmem>>, %arg22: memref<1x16xf32, #tpu.memory_space<vmem>>, %arg23: memref<16x16xbf16, #tpu.memory_space<vmem>>, %arg24: memref<1x16xf32, #tpu.memory_space<vmem>>, %arg25: memref<1x16xf32, #tpu.memory_space<vmem>>, %arg26: memref<1x16xf32, #tpu.memory_space<vmem>>, %arg27: memref<16x16xbf16, #tpu.memory_space<vmem>>, %arg28: memref<16x16xbf16, #tpu.memory_space<vmem>>, %arg29: memref<1x16xf32, #tpu.memory_space<vmem>>, %arg30: memref<16x16xbf16, #tpu.memory_space<vmem>>, %arg31: memref<1x16xf32, #tpu.memory_space<vmem>>, %arg32: memref<1x16xf32, #tpu.memory_space<vmem>>, %arg33: memref<1x16xf32, #tpu.memory_space<vmem>>, %arg34: memref<16x16xbf16, #tpu.memory_space<vmem>>, %arg35: memref<16x16xbf16, #tpu.memory_space<vmem>>, %arg36: memref<16x16xbf16, #tpu.memory_space<vmem>>, %arg37: memref<1x16xf32, #tpu.memory_space<vmem>>, %arg38: memref<16x16xbf16, #tpu.memory_space<vmem>>, %arg39: memref<1x16xf32, #tpu.memory_space<vmem>>, %arg40: memref<1x16xf32, #tpu.memory_space<vmem>>, %arg41: memref<1x16xf32, #tpu.memory_space<vmem>>, %arg42: memref<16x16xbf16, #tpu.memory_space<vmem>>, %arg43: memref<16x16xbf16, #tpu.memory_space<vmem>>, %arg44: memref<1x16xf32, #tpu.memory_space<vmem>>, %arg45: memref<16x16xbf16, #tpu.memory_space<vmem>>, %arg46: memref<1x16xf32, #tpu.memory_space<vmem>>, %arg47: memref<1x16xf32, #tpu.memory_space<vmem>>, %arg48: memref<1x16xf32, #tpu.memory_space<vmem>>, %arg49: memref<16x16xbf16, #tpu.memory_space<vmem>>, %arg50: memref<1x16xf32, #tpu.memory_space<vmem>>, %arg51: memref<16x128xbf16, #tpu.memory_space<vmem>>, %arg52: memref<1x128xf32, #tpu.memory_space<vmem>>, %arg53: memref<64x128xf32, #tpu.memory_space<vmem>>) attributes {dimension_semantics = [], scalar_prefetch = 0 : i64, scratch_operands = 0 : i64, tpu.core_type = #tpu.core_type<tc>} {
    %c0 = arith.constant 0 : index
    %c0_0 = arith.constant 0 : index
    %0 = vector.load %arg1[%c0, %c0_0] : memref<64x2xf32, #tpu.memory_space<vmem>>, vector<64x2xf32>
    %cst = arith.constant dense<0.000000e+00> : vector<2xf32>
    %1 = vector.multi_reduction <add>, %0, %cst [0] : vector<64x2xf32> to vector<2xf32>
    %2 = vector.shape_cast %1 : vector<2xf32> to vector<1x2xf32>
    %cst_1 = arith.constant 1.562500e-02 : f32
    %3 = vector.broadcast %cst_1 : f32 to vector<1x2xf32>
    %4 = arith.mulf %2, %3 : vector<1x2xf32>
    %5 = arith.mulf %0, %0 : vector<64x2xf32>
    %cst_2 = arith.constant dense<0.000000e+00> : vector<2xf32>
    %6 = vector.multi_reduction <add>, %5, %cst_2 [0] : vector<64x2xf32> to vector<2xf32>
    %7 = vector.shape_cast %6 : vector<2xf32> to vector<1x2xf32>
    %cst_3 = arith.constant 1.562500e-02 : f32
    %8 = vector.broadcast %cst_3 : f32 to vector<1x2xf32>
    %9 = arith.mulf %7, %8 : vector<1x2xf32>
    %10 = arith.mulf %4, %4 : vector<1x2xf32>
    %11 = arith.subf %9, %10 : vector<1x2xf32>
    %cst_4 = arith.constant 0.000000e+00 : f32
    %12 = vector.broadcast %cst_4 : f32 to vector<1x2xf32>
    %13 = arith.maximumf %11, %12 : vector<1x2xf32>
    %14 = math.sqrt %13 : vector<1x2xf32>
    %cst_5 = arith.constant 9.99999993E-9 : f32
    %15 = vector.broadcast %cst_5 : f32 to vector<1x2xf32>
    %16 = arith.maximumf %14, %15 : vector<1x2xf32>
    %17 = vector.broadcast %4 : vector<1x2xf32> to vector<64x2xf32>
    %18 = arith.subf %0, %17 : vector<64x2xf32>
    %19 = vector.broadcast %16 : vector<1x2xf32> to vector<64x2xf32>
    %20 = arith.divf %18, %19 : vector<64x2xf32>
    %c0_6 = arith.constant 0 : index
    %c0_7 = arith.constant 0 : index
    %21 = vector.load %arg0[%c0_6, %c0_7] : memref<64x1xf32, #tpu.memory_space<vmem>>, vector<64x1xf32>
    %cst_8 = arith.constant 1.000000e+00 : f32
    %22 = vector.broadcast %cst_8 : f32 to vector<64x1xf32>
    %23 = arith.cmpf oeq, %21, %22 : vector<64x1xf32>
    %cst_9 = arith.constant 1.000000e+00 : f32
    %cst_10 = arith.constant 0.000000e+00 : f32
    %24 = vector.broadcast %cst_9 : f32 to vector<64x1xf32>
    %25 = vector.broadcast %cst_10 : f32 to vector<64x1xf32>
    %26 = arith.select %23, %24, %25 : vector<64x1xi1>, vector<64x1xf32>
    %27 = tpu.iota {dimensions = array<i32: 1>} : vector<128x64xi32>
    %c0_11 = arith.constant 0 : index
    %c0_12 = arith.constant 0 : index
    %28 = vector.load %arg3[%c0_11, %c0_12] : memref<128x1xi32, #tpu.memory_space<vmem>>, vector<128x1xi32>
    %29 = vector.broadcast %28 : vector<128x1xi32> to vector<128x64xi32>
    %30 = arith.cmpi eq, %27, %29 : vector<128x64xi32>
    %cst_13 = arith.constant 1.000000e+00 : f32
    %cst_14 = arith.constant 0.000000e+00 : f32
    %31 = vector.broadcast %cst_13 : f32 to vector<128x64xf32>
    %32 = vector.broadcast %cst_14 : f32 to vector<128x64xf32>
    %33 = arith.select %30, %31, %32 : vector<128x64xi1>, vector<128x64xf32>
    %34 = arith.truncf %33 : vector<128x64xf32> to vector<128x64xbf16>
    %c0_15 = arith.constant 0 : index
    %c0_16 = arith.constant 0 : index
    %35 = vector.load %arg4[%c0_15, %c0_16] : memref<128x1xi32, #tpu.memory_space<vmem>>, vector<128x1xi32>
    %36 = vector.broadcast %35 : vector<128x1xi32> to vector<128x64xi32>
    %37 = arith.cmpi eq, %27, %36 : vector<128x64xi32>
    %cst_17 = arith.constant 1.000000e+00 : f32
    %cst_18 = arith.constant 0.000000e+00 : f32
    %38 = vector.broadcast %cst_17 : f32 to vector<128x64xf32>
    %39 = vector.broadcast %cst_18 : f32 to vector<128x64xf32>
    %40 = arith.select %37, %38, %39 : vector<128x64xi1>, vector<128x64xf32>
    %41 = arith.truncf %40 : vector<128x64xf32> to vector<128x64xbf16>
    %42 = tpu.iota {dimensions = array<i32: 0>} : vector<64x128xi32>
    %c0_19 = arith.constant 0 : index
    %c0_20 = arith.constant 0 : index
    %43 = vector.load %arg5[%c0_19, %c0_20] : memref<1x128xi32, #tpu.memory_space<vmem>>, vector<1x128xi32>
    %44 = vector.broadcast %43 : vector<1x128xi32> to vector<64x128xi32>
    %45 = arith.cmpi eq, %42, %44 : vector<64x128xi32>
    %cst_21 = arith.constant 1.000000e+00 : f32
    %cst_22 = arith.constant 0.000000e+00 : f32
    %46 = vector.broadcast %cst_21 : f32 to vector<64x128xf32>
    %47 = vector.broadcast %cst_22 : f32 to vector<64x128xf32>
    %48 = arith.select %45, %46, %47 : vector<64x128xi1>, vector<64x128xf32>
    %49 = arith.truncf %48 : vector<64x128xf32> to vector<64x128xbf16>
    %50 = arith.truncf %20 : vector<64x2xf32> to vector<64x2xbf16>
    %c0_23 = arith.constant 0 : index
    %c0_24 = arith.constant 0 : index
    %51 = vector.load %arg6[%c0_23, %c0_24] : memref<2x16xbf16, #tpu.memory_space<vmem>>, vector<2x16xbf16>
    %cst_25 = arith.constant dense<0.000000e+00> : vector<64x16xf32>
    %52 = tpu.matmul %50, %51, %cst_25 {dimension_numbers = #tpu.dot_dimension_numbers<[1], [0], [0], [1], [0, 0, 1, 1], [], []>} : vector<64x2xbf16>, vector<2x16xbf16>, vector<64x16xf32> -> vector<64x16xf32>
    %c0_26 = arith.constant 0 : index
    %c0_27 = arith.constant 0 : index
    %53 = vector.load %arg7[%c0_26, %c0_27] : memref<1x16xf32, #tpu.memory_space<vmem>>, vector<1x16xf32>
    %54 = vector.broadcast %26 : vector<64x1xf32> to vector<64x16xf32>
    %55 = vector.broadcast %53 : vector<1x16xf32> to vector<64x16xf32>
    %56 = arith.mulf %54, %55 : vector<64x16xf32>
    %57 = arith.addf %52, %56 : vector<64x16xf32>
    %c0_28 = arith.constant 0 : index
    %c0_29 = arith.constant 0 : index
    %58 = vector.load %arg8[%c0_28, %c0_29] : memref<1x16xf32, #tpu.memory_space<vmem>>, vector<1x16xf32>
    %59 = vector.broadcast %58 : vector<1x16xf32> to vector<64x16xf32>
    %60 = arith.addf %57, %59 : vector<64x16xf32>
    %cst_30 = arith.constant 0.000000e+00 : f32
    %61 = vector.broadcast %cst_30 : f32 to vector<64x16xf32>
    %62 = arith.maximumf %60, %61 : vector<64x16xf32>
    %63 = arith.truncf %62 : vector<64x16xf32> to vector<64x16xbf16>
    %c0_31 = arith.constant 0 : index
    %c0_32 = arith.constant 0 : index
    %64 = vector.load %arg9[%c0_31, %c0_32] : memref<16x16xbf16, #tpu.memory_space<vmem>>, vector<16x16xbf16>
    %cst_33 = arith.constant dense<0.000000e+00> : vector<64x16xf32>
    %65 = tpu.matmul %63, %64, %cst_33 {dimension_numbers = #tpu.dot_dimension_numbers<[1], [0], [0], [1], [0, 0, 1, 1], [], []>} : vector<64x16xbf16>, vector<16x16xbf16>, vector<64x16xf32> -> vector<64x16xf32>
    %c0_34 = arith.constant 0 : index
    %c0_35 = arith.constant 0 : index
    %66 = vector.load %arg10[%c0_34, %c0_35] : memref<1x16xf32, #tpu.memory_space<vmem>>, vector<1x16xf32>
    %67 = vector.broadcast %66 : vector<1x16xf32> to vector<64x16xf32>
    %68 = arith.addf %65, %67 : vector<64x16xf32>
    %cst_36 = arith.constant dense<0.000000e+00> : vector<64xf32>
    %69 = vector.multi_reduction <add>, %68, %cst_36 [1] : vector<64x16xf32> to vector<64xf32>
    %70 = vector.shape_cast %69 : vector<64xf32> to vector<64x1xf32>
    %cst_37 = arith.constant 1.600000e+01 : f32
    %71 = vector.broadcast %cst_37 : f32 to vector<64x1xf32>
    %72 = arith.divf %70, %71 : vector<64x1xf32>
    %73 = vector.broadcast %72 : vector<64x1xf32> to vector<64x16xf32>
    %74 = arith.subf %68, %73 : vector<64x16xf32>
    %75 = vector.broadcast %72 : vector<64x1xf32> to vector<64x16xf32>
    %76 = arith.subf %68, %75 : vector<64x16xf32>
    %77 = arith.mulf %74, %76 : vector<64x16xf32>
    %cst_38 = arith.constant dense<0.000000e+00> : vector<64xf32>
    %78 = vector.multi_reduction <add>, %77, %cst_38 [1] : vector<64x16xf32> to vector<64xf32>
    %79 = vector.shape_cast %78 : vector<64xf32> to vector<64x1xf32>
    %cst_39 = arith.constant 1.600000e+01 : f32
    %80 = vector.broadcast %cst_39 : f32 to vector<64x1xf32>
    %81 = arith.divf %79, %80 : vector<64x1xf32>
    %82 = vector.broadcast %72 : vector<64x1xf32> to vector<64x16xf32>
    %83 = arith.subf %68, %82 : vector<64x16xf32>
    %cst_40 = arith.constant 9.99999974E-6 : f32
    %84 = vector.broadcast %cst_40 : f32 to vector<64x1xf32>
    %85 = arith.addf %81, %84 : vector<64x1xf32>
    %86 = math.rsqrt %85 : vector<64x1xf32>
    %87 = vector.broadcast %86 : vector<64x1xf32> to vector<64x16xf32>
    %88 = arith.mulf %83, %87 : vector<64x16xf32>
    %c0_41 = arith.constant 0 : index
    %c0_42 = arith.constant 0 : index
    %89 = vector.load %arg11[%c0_41, %c0_42] : memref<1x16xf32, #tpu.memory_space<vmem>>, vector<1x16xf32>
    %90 = vector.broadcast %89 : vector<1x16xf32> to vector<64x16xf32>
    %91 = arith.mulf %88, %90 : vector<64x16xf32>
    %c0_43 = arith.constant 0 : index
    %c0_44 = arith.constant 0 : index
    %92 = vector.load %arg12[%c0_43, %c0_44] : memref<1x16xf32, #tpu.memory_space<vmem>>, vector<1x16xf32>
    %93 = vector.broadcast %92 : vector<1x16xf32> to vector<64x16xf32>
    %94 = arith.addf %91, %93 : vector<64x16xf32>
    %c0_45 = arith.constant 0 : index
    %c0_46 = arith.constant 0 : index
    %95 = vector.load %arg2[%c0_45, %c0_46] : memref<128x3xf32, #tpu.memory_space<vmem>>, vector<128x3xf32>
    %96 = arith.truncf %95 : vector<128x3xf32> to vector<128x3xbf16>
    %c0_47 = arith.constant 0 : index
    %c0_48 = arith.constant 0 : index
    %97 = vector.load %arg13[%c0_47, %c0_48] : memref<3x16xbf16, #tpu.memory_space<vmem>>, vector<3x16xbf16>
    %cst_49 = arith.constant dense<0.000000e+00> : vector<128x16xf32>
    %98 = tpu.matmul %96, %97, %cst_49 {dimension_numbers = #tpu.dot_dimension_numbers<[1], [0], [0], [1], [0, 0, 1, 1], [], []>} : vector<128x3xbf16>, vector<3x16xbf16>, vector<128x16xf32> -> vector<128x16xf32>
    %c0_50 = arith.constant 0 : index
    %c0_51 = arith.constant 0 : index
    %99 = vector.load %arg14[%c0_50, %c0_51] : memref<1x16xf32, #tpu.memory_space<vmem>>, vector<1x16xf32>
    %100 = vector.broadcast %99 : vector<1x16xf32> to vector<128x16xf32>
    %101 = arith.addf %98, %100 : vector<128x16xf32>
    %cst_52 = arith.constant 0.000000e+00 : f32
    %102 = vector.broadcast %cst_52 : f32 to vector<128x16xf32>
    %103 = arith.maximumf %101, %102 : vector<128x16xf32>
    %104 = arith.truncf %103 : vector<128x16xf32> to vector<128x16xbf16>
    %c0_53 = arith.constant 0 : index
    %c0_54 = arith.constant 0 : index
    %105 = vector.load %arg15[%c0_53, %c0_54] : memref<16x16xbf16, #tpu.memory_space<vmem>>, vector<16x16xbf16>
    %cst_55 = arith.constant dense<0.000000e+00> : vector<128x16xf32>
    %106 = tpu.matmul %104, %105, %cst_55 {dimension_numbers = #tpu.dot_dimension_numbers<[1], [0], [0], [1], [0, 0, 1, 1], [], []>} : vector<128x16xbf16>, vector<16x16xbf16>, vector<128x16xf32> -> vector<128x16xf32>
    %c0_56 = arith.constant 0 : index
    %c0_57 = arith.constant 0 : index
    %107 = vector.load %arg16[%c0_56, %c0_57] : memref<1x16xf32, #tpu.memory_space<vmem>>, vector<1x16xf32>
    %108 = vector.broadcast %107 : vector<1x16xf32> to vector<128x16xf32>
    %109 = arith.addf %106, %108 : vector<128x16xf32>
    %cst_58 = arith.constant dense<0.000000e+00> : vector<128xf32>
    %110 = vector.multi_reduction <add>, %109, %cst_58 [1] : vector<128x16xf32> to vector<128xf32>
    %111 = vector.shape_cast %110 : vector<128xf32> to vector<128x1xf32>
    %cst_59 = arith.constant 1.600000e+01 : f32
    %112 = vector.broadcast %cst_59 : f32 to vector<128x1xf32>
    %113 = arith.divf %111, %112 : vector<128x1xf32>
    %114 = vector.broadcast %113 : vector<128x1xf32> to vector<128x16xf32>
    %115 = arith.subf %109, %114 : vector<128x16xf32>
    %116 = vector.broadcast %113 : vector<128x1xf32> to vector<128x16xf32>
    %117 = arith.subf %109, %116 : vector<128x16xf32>
    %118 = arith.mulf %115, %117 : vector<128x16xf32>
    %cst_60 = arith.constant dense<0.000000e+00> : vector<128xf32>
    %119 = vector.multi_reduction <add>, %118, %cst_60 [1] : vector<128x16xf32> to vector<128xf32>
    %120 = vector.shape_cast %119 : vector<128xf32> to vector<128x1xf32>
    %cst_61 = arith.constant 1.600000e+01 : f32
    %121 = vector.broadcast %cst_61 : f32 to vector<128x1xf32>
    %122 = arith.divf %120, %121 : vector<128x1xf32>
    %123 = vector.broadcast %113 : vector<128x1xf32> to vector<128x16xf32>
    %124 = arith.subf %109, %123 : vector<128x16xf32>
    %cst_62 = arith.constant 9.99999974E-6 : f32
    %125 = vector.broadcast %cst_62 : f32 to vector<128x1xf32>
    %126 = arith.addf %122, %125 : vector<128x1xf32>
    %127 = math.rsqrt %126 : vector<128x1xf32>
    %128 = vector.broadcast %127 : vector<128x1xf32> to vector<128x16xf32>
    %129 = arith.mulf %124, %128 : vector<128x16xf32>
    %c0_63 = arith.constant 0 : index
    %c0_64 = arith.constant 0 : index
    %130 = vector.load %arg17[%c0_63, %c0_64] : memref<1x16xf32, #tpu.memory_space<vmem>>, vector<1x16xf32>
    %131 = vector.broadcast %130 : vector<1x16xf32> to vector<128x16xf32>
    %132 = arith.mulf %129, %131 : vector<128x16xf32>
    %c0_65 = arith.constant 0 : index
    %c0_66 = arith.constant 0 : index
    %133 = vector.load %arg18[%c0_65, %c0_66] : memref<1x16xf32, #tpu.memory_space<vmem>>, vector<1x16xf32>
    %134 = vector.broadcast %133 : vector<1x16xf32> to vector<128x16xf32>
    %135 = arith.addf %132, %134 : vector<128x16xf32>
    %136 = arith.truncf %94 : vector<64x16xf32> to vector<64x16xbf16>
    %137 = arith.truncf %135 : vector<128x16xf32> to vector<128x16xbf16>
    %c0_67 = arith.constant 0 : index
    %c0_68 = arith.constant 0 : index
    %138 = vector.load %arg20[%c0_67, %c0_68] : memref<16x16xbf16, #tpu.memory_space<vmem>>, vector<16x16xbf16>
    %cst_69 = arith.constant dense<0.000000e+00> : vector<64x16xf32>
    %139 = tpu.matmul %136, %138, %cst_69 {dimension_numbers = #tpu.dot_dimension_numbers<[1], [0], [0], [1], [0, 0, 1, 1], [], []>} : vector<64x16xbf16>, vector<16x16xbf16>, vector<64x16xf32> -> vector<64x16xf32>
    %140 = arith.truncf %139 : vector<64x16xf32> to vector<64x16xbf16>
    %c0_70 = arith.constant 0 : index
    %c0_71 = arith.constant 0 : index
    %141 = vector.load %arg21[%c0_70, %c0_71] : memref<16x16xbf16, #tpu.memory_space<vmem>>, vector<16x16xbf16>
    %cst_72 = arith.constant dense<0.000000e+00> : vector<64x16xf32>
    %142 = tpu.matmul %136, %141, %cst_72 {dimension_numbers = #tpu.dot_dimension_numbers<[1], [0], [0], [1], [0, 0, 1, 1], [], []>} : vector<64x16xbf16>, vector<16x16xbf16>, vector<64x16xf32> -> vector<64x16xf32>
    %143 = arith.truncf %142 : vector<64x16xf32> to vector<64x16xbf16>
    %c0_73 = arith.constant 0 : index
    %c0_74 = arith.constant 0 : index
    %144 = vector.load %arg19[%c0_73, %c0_74] : memref<16x16xbf16, #tpu.memory_space<vmem>>, vector<16x16xbf16>
    %cst_75 = arith.constant dense<0.000000e+00> : vector<128x16xf32>
    %145 = tpu.matmul %137, %144, %cst_75 {dimension_numbers = #tpu.dot_dimension_numbers<[1], [0], [0], [1], [0, 0, 1, 1], [], []>} : vector<128x16xbf16>, vector<16x16xbf16>, vector<128x16xf32> -> vector<128x16xf32>
    %cst_76 = arith.constant dense<0.000000e+00> : vector<128x16xf32>
    %146 = tpu.matmul %34, %140, %cst_76 {dimension_numbers = #tpu.dot_dimension_numbers<[1], [0], [0], [1], [0, 0, 1, 1], [], []>} : vector<128x64xbf16>, vector<64x16xbf16>, vector<128x16xf32> -> vector<128x16xf32>
    %147 = arith.addf %145, %146 : vector<128x16xf32>
    %cst_77 = arith.constant dense<0.000000e+00> : vector<128x16xf32>
    %148 = tpu.matmul %41, %143, %cst_77 {dimension_numbers = #tpu.dot_dimension_numbers<[1], [0], [0], [1], [0, 0, 1, 1], [], []>} : vector<128x64xbf16>, vector<64x16xbf16>, vector<128x16xf32> -> vector<128x16xf32>
    %149 = arith.addf %147, %148 : vector<128x16xf32>
    %c0_78 = arith.constant 0 : index
    %c0_79 = arith.constant 0 : index
    %150 = vector.load %arg22[%c0_78, %c0_79] : memref<1x16xf32, #tpu.memory_space<vmem>>, vector<1x16xf32>
    %151 = vector.broadcast %150 : vector<1x16xf32> to vector<128x16xf32>
    %152 = arith.addf %149, %151 : vector<128x16xf32>
    %cst_80 = arith.constant 0.000000e+00 : f32
    %153 = vector.broadcast %cst_80 : f32 to vector<128x16xf32>
    %154 = arith.maximumf %152, %153 : vector<128x16xf32>
    %155 = arith.truncf %154 : vector<128x16xf32> to vector<128x16xbf16>
    %c0_81 = arith.constant 0 : index
    %c0_82 = arith.constant 0 : index
    %156 = vector.load %arg23[%c0_81, %c0_82] : memref<16x16xbf16, #tpu.memory_space<vmem>>, vector<16x16xbf16>
    %cst_83 = arith.constant dense<0.000000e+00> : vector<128x16xf32>
    %157 = tpu.matmul %155, %156, %cst_83 {dimension_numbers = #tpu.dot_dimension_numbers<[1], [0], [0], [1], [0, 0, 1, 1], [], []>} : vector<128x16xbf16>, vector<16x16xbf16>, vector<128x16xf32> -> vector<128x16xf32>
    %c0_84 = arith.constant 0 : index
    %c0_85 = arith.constant 0 : index
    %158 = vector.load %arg24[%c0_84, %c0_85] : memref<1x16xf32, #tpu.memory_space<vmem>>, vector<1x16xf32>
    %159 = vector.broadcast %158 : vector<1x16xf32> to vector<128x16xf32>
    %160 = arith.addf %157, %159 : vector<128x16xf32>
    %cst_86 = arith.constant dense<0.000000e+00> : vector<128xf32>
    %161 = vector.multi_reduction <add>, %160, %cst_86 [1] : vector<128x16xf32> to vector<128xf32>
    %162 = vector.shape_cast %161 : vector<128xf32> to vector<128x1xf32>
    %cst_87 = arith.constant 1.600000e+01 : f32
    %163 = vector.broadcast %cst_87 : f32 to vector<128x1xf32>
    %164 = arith.divf %162, %163 : vector<128x1xf32>
    %165 = vector.broadcast %164 : vector<128x1xf32> to vector<128x16xf32>
    %166 = arith.subf %160, %165 : vector<128x16xf32>
    %167 = vector.broadcast %164 : vector<128x1xf32> to vector<128x16xf32>
    %168 = arith.subf %160, %167 : vector<128x16xf32>
    %169 = arith.mulf %166, %168 : vector<128x16xf32>
    %cst_88 = arith.constant dense<0.000000e+00> : vector<128xf32>
    %170 = vector.multi_reduction <add>, %169, %cst_88 [1] : vector<128x16xf32> to vector<128xf32>
    %171 = vector.shape_cast %170 : vector<128xf32> to vector<128x1xf32>
    %cst_89 = arith.constant 1.600000e+01 : f32
    %172 = vector.broadcast %cst_89 : f32 to vector<128x1xf32>
    %173 = arith.divf %171, %172 : vector<128x1xf32>
    %174 = vector.broadcast %164 : vector<128x1xf32> to vector<128x16xf32>
    %175 = arith.subf %160, %174 : vector<128x16xf32>
    %cst_90 = arith.constant 9.99999974E-6 : f32
    %176 = vector.broadcast %cst_90 : f32 to vector<128x1xf32>
    %177 = arith.addf %173, %176 : vector<128x1xf32>
    %178 = math.rsqrt %177 : vector<128x1xf32>
    %179 = vector.broadcast %178 : vector<128x1xf32> to vector<128x16xf32>
    %180 = arith.mulf %175, %179 : vector<128x16xf32>
    %c0_91 = arith.constant 0 : index
    %c0_92 = arith.constant 0 : index
    %181 = vector.load %arg25[%c0_91, %c0_92] : memref<1x16xf32, #tpu.memory_space<vmem>>, vector<1x16xf32>
    %182 = vector.broadcast %181 : vector<1x16xf32> to vector<128x16xf32>
    %183 = arith.mulf %180, %182 : vector<128x16xf32>
    %c0_93 = arith.constant 0 : index
    %c0_94 = arith.constant 0 : index
    %184 = vector.load %arg26[%c0_93, %c0_94] : memref<1x16xf32, #tpu.memory_space<vmem>>, vector<1x16xf32>
    %185 = vector.broadcast %184 : vector<1x16xf32> to vector<128x16xf32>
    %186 = arith.addf %183, %185 : vector<128x16xf32>
    %187 = arith.addf %135, %186 : vector<128x16xf32>
    %188 = arith.truncf %187 : vector<128x16xf32> to vector<128x16xbf16>
    %cst_95 = arith.constant dense<0.000000e+00> : vector<64x16xf32>
    %189 = tpu.matmul %49, %188, %cst_95 {dimension_numbers = #tpu.dot_dimension_numbers<[1], [0], [0], [1], [0, 0, 1, 1], [], []>} : vector<64x128xbf16>, vector<128x16xbf16>, vector<64x16xf32> -> vector<64x16xf32>
    %c0_96 = arith.constant 0 : index
    %c0_97 = arith.constant 0 : index
    %190 = vector.load %arg27[%c0_96, %c0_97] : memref<16x16xbf16, #tpu.memory_space<vmem>>, vector<16x16xbf16>
    %cst_98 = arith.constant dense<0.000000e+00> : vector<64x16xf32>
    %191 = tpu.matmul %136, %190, %cst_98 {dimension_numbers = #tpu.dot_dimension_numbers<[1], [0], [0], [1], [0, 0, 1, 1], [], []>} : vector<64x16xbf16>, vector<16x16xbf16>, vector<64x16xf32> -> vector<64x16xf32>
    %192 = arith.truncf %189 : vector<64x16xf32> to vector<64x16xbf16>
    %c0_99 = arith.constant 0 : index
    %c0_100 = arith.constant 0 : index
    %193 = vector.load %arg28[%c0_99, %c0_100] : memref<16x16xbf16, #tpu.memory_space<vmem>>, vector<16x16xbf16>
    %cst_101 = arith.constant dense<0.000000e+00> : vector<64x16xf32>
    %194 = tpu.matmul %192, %193, %cst_101 {dimension_numbers = #tpu.dot_dimension_numbers<[1], [0], [0], [1], [0, 0, 1, 1], [], []>} : vector<64x16xbf16>, vector<16x16xbf16>, vector<64x16xf32> -> vector<64x16xf32>
    %195 = arith.addf %191, %194 : vector<64x16xf32>
    %c0_102 = arith.constant 0 : index
    %c0_103 = arith.constant 0 : index
    %196 = vector.load %arg29[%c0_102, %c0_103] : memref<1x16xf32, #tpu.memory_space<vmem>>, vector<1x16xf32>
    %197 = vector.broadcast %196 : vector<1x16xf32> to vector<64x16xf32>
    %198 = arith.addf %195, %197 : vector<64x16xf32>
    %cst_104 = arith.constant 0.000000e+00 : f32
    %199 = vector.broadcast %cst_104 : f32 to vector<64x16xf32>
    %200 = arith.maximumf %198, %199 : vector<64x16xf32>
    %201 = arith.truncf %200 : vector<64x16xf32> to vector<64x16xbf16>
    %c0_105 = arith.constant 0 : index
    %c0_106 = arith.constant 0 : index
    %202 = vector.load %arg30[%c0_105, %c0_106] : memref<16x16xbf16, #tpu.memory_space<vmem>>, vector<16x16xbf16>
    %cst_107 = arith.constant dense<0.000000e+00> : vector<64x16xf32>
    %203 = tpu.matmul %201, %202, %cst_107 {dimension_numbers = #tpu.dot_dimension_numbers<[1], [0], [0], [1], [0, 0, 1, 1], [], []>} : vector<64x16xbf16>, vector<16x16xbf16>, vector<64x16xf32> -> vector<64x16xf32>
    %c0_108 = arith.constant 0 : index
    %c0_109 = arith.constant 0 : index
    %204 = vector.load %arg31[%c0_108, %c0_109] : memref<1x16xf32, #tpu.memory_space<vmem>>, vector<1x16xf32>
    %205 = vector.broadcast %204 : vector<1x16xf32> to vector<64x16xf32>
    %206 = arith.addf %203, %205 : vector<64x16xf32>
    %cst_110 = arith.constant dense<0.000000e+00> : vector<64xf32>
    %207 = vector.multi_reduction <add>, %206, %cst_110 [1] : vector<64x16xf32> to vector<64xf32>
    %208 = vector.shape_cast %207 : vector<64xf32> to vector<64x1xf32>
    %cst_111 = arith.constant 1.600000e+01 : f32
    %209 = vector.broadcast %cst_111 : f32 to vector<64x1xf32>
    %210 = arith.divf %208, %209 : vector<64x1xf32>
    %211 = vector.broadcast %210 : vector<64x1xf32> to vector<64x16xf32>
    %212 = arith.subf %206, %211 : vector<64x16xf32>
    %213 = vector.broadcast %210 : vector<64x1xf32> to vector<64x16xf32>
    %214 = arith.subf %206, %213 : vector<64x16xf32>
    %215 = arith.mulf %212, %214 : vector<64x16xf32>
    %cst_112 = arith.constant dense<0.000000e+00> : vector<64xf32>
    %216 = vector.multi_reduction <add>, %215, %cst_112 [1] : vector<64x16xf32> to vector<64xf32>
    %217 = vector.shape_cast %216 : vector<64xf32> to vector<64x1xf32>
    %cst_113 = arith.constant 1.600000e+01 : f32
    %218 = vector.broadcast %cst_113 : f32 to vector<64x1xf32>
    %219 = arith.divf %217, %218 : vector<64x1xf32>
    %220 = vector.broadcast %210 : vector<64x1xf32> to vector<64x16xf32>
    %221 = arith.subf %206, %220 : vector<64x16xf32>
    %cst_114 = arith.constant 9.99999974E-6 : f32
    %222 = vector.broadcast %cst_114 : f32 to vector<64x1xf32>
    %223 = arith.addf %219, %222 : vector<64x1xf32>
    %224 = math.rsqrt %223 : vector<64x1xf32>
    %225 = vector.broadcast %224 : vector<64x1xf32> to vector<64x16xf32>
    %226 = arith.mulf %221, %225 : vector<64x16xf32>
    %c0_115 = arith.constant 0 : index
    %c0_116 = arith.constant 0 : index
    %227 = vector.load %arg32[%c0_115, %c0_116] : memref<1x16xf32, #tpu.memory_space<vmem>>, vector<1x16xf32>
    %228 = vector.broadcast %227 : vector<1x16xf32> to vector<64x16xf32>
    %229 = arith.mulf %226, %228 : vector<64x16xf32>
    %c0_117 = arith.constant 0 : index
    %c0_118 = arith.constant 0 : index
    %230 = vector.load %arg33[%c0_117, %c0_118] : memref<1x16xf32, #tpu.memory_space<vmem>>, vector<1x16xf32>
    %231 = vector.broadcast %230 : vector<1x16xf32> to vector<64x16xf32>
    %232 = arith.addf %229, %231 : vector<64x16xf32>
    %233 = arith.addf %94, %232 : vector<64x16xf32>
    %234 = arith.truncf %233 : vector<64x16xf32> to vector<64x16xbf16>
    %235 = arith.truncf %187 : vector<128x16xf32> to vector<128x16xbf16>
    %c0_119 = arith.constant 0 : index
    %c0_120 = arith.constant 0 : index
    %236 = vector.load %arg35[%c0_119, %c0_120] : memref<16x16xbf16, #tpu.memory_space<vmem>>, vector<16x16xbf16>
    %cst_121 = arith.constant dense<0.000000e+00> : vector<64x16xf32>
    %237 = tpu.matmul %234, %236, %cst_121 {dimension_numbers = #tpu.dot_dimension_numbers<[1], [0], [0], [1], [0, 0, 1, 1], [], []>} : vector<64x16xbf16>, vector<16x16xbf16>, vector<64x16xf32> -> vector<64x16xf32>
    %238 = arith.truncf %237 : vector<64x16xf32> to vector<64x16xbf16>
    %c0_122 = arith.constant 0 : index
    %c0_123 = arith.constant 0 : index
    %239 = vector.load %arg36[%c0_122, %c0_123] : memref<16x16xbf16, #tpu.memory_space<vmem>>, vector<16x16xbf16>
    %cst_124 = arith.constant dense<0.000000e+00> : vector<64x16xf32>
    %240 = tpu.matmul %234, %239, %cst_124 {dimension_numbers = #tpu.dot_dimension_numbers<[1], [0], [0], [1], [0, 0, 1, 1], [], []>} : vector<64x16xbf16>, vector<16x16xbf16>, vector<64x16xf32> -> vector<64x16xf32>
    %241 = arith.truncf %240 : vector<64x16xf32> to vector<64x16xbf16>
    %c0_125 = arith.constant 0 : index
    %c0_126 = arith.constant 0 : index
    %242 = vector.load %arg34[%c0_125, %c0_126] : memref<16x16xbf16, #tpu.memory_space<vmem>>, vector<16x16xbf16>
    %cst_127 = arith.constant dense<0.000000e+00> : vector<128x16xf32>
    %243 = tpu.matmul %235, %242, %cst_127 {dimension_numbers = #tpu.dot_dimension_numbers<[1], [0], [0], [1], [0, 0, 1, 1], [], []>} : vector<128x16xbf16>, vector<16x16xbf16>, vector<128x16xf32> -> vector<128x16xf32>
    %cst_128 = arith.constant dense<0.000000e+00> : vector<128x16xf32>
    %244 = tpu.matmul %34, %238, %cst_128 {dimension_numbers = #tpu.dot_dimension_numbers<[1], [0], [0], [1], [0, 0, 1, 1], [], []>} : vector<128x64xbf16>, vector<64x16xbf16>, vector<128x16xf32> -> vector<128x16xf32>
    %245 = arith.addf %243, %244 : vector<128x16xf32>
    %cst_129 = arith.constant dense<0.000000e+00> : vector<128x16xf32>
    %246 = tpu.matmul %41, %241, %cst_129 {dimension_numbers = #tpu.dot_dimension_numbers<[1], [0], [0], [1], [0, 0, 1, 1], [], []>} : vector<128x64xbf16>, vector<64x16xbf16>, vector<128x16xf32> -> vector<128x16xf32>
    %247 = arith.addf %245, %246 : vector<128x16xf32>
    %c0_130 = arith.constant 0 : index
    %c0_131 = arith.constant 0 : index
    %248 = vector.load %arg37[%c0_130, %c0_131] : memref<1x16xf32, #tpu.memory_space<vmem>>, vector<1x16xf32>
    %249 = vector.broadcast %248 : vector<1x16xf32> to vector<128x16xf32>
    %250 = arith.addf %247, %249 : vector<128x16xf32>
    %cst_132 = arith.constant 0.000000e+00 : f32
    %251 = vector.broadcast %cst_132 : f32 to vector<128x16xf32>
    %252 = arith.maximumf %250, %251 : vector<128x16xf32>
    %253 = arith.truncf %252 : vector<128x16xf32> to vector<128x16xbf16>
    %c0_133 = arith.constant 0 : index
    %c0_134 = arith.constant 0 : index
    %254 = vector.load %arg38[%c0_133, %c0_134] : memref<16x16xbf16, #tpu.memory_space<vmem>>, vector<16x16xbf16>
    %cst_135 = arith.constant dense<0.000000e+00> : vector<128x16xf32>
    %255 = tpu.matmul %253, %254, %cst_135 {dimension_numbers = #tpu.dot_dimension_numbers<[1], [0], [0], [1], [0, 0, 1, 1], [], []>} : vector<128x16xbf16>, vector<16x16xbf16>, vector<128x16xf32> -> vector<128x16xf32>
    %c0_136 = arith.constant 0 : index
    %c0_137 = arith.constant 0 : index
    %256 = vector.load %arg39[%c0_136, %c0_137] : memref<1x16xf32, #tpu.memory_space<vmem>>, vector<1x16xf32>
    %257 = vector.broadcast %256 : vector<1x16xf32> to vector<128x16xf32>
    %258 = arith.addf %255, %257 : vector<128x16xf32>
    %cst_138 = arith.constant dense<0.000000e+00> : vector<128xf32>
    %259 = vector.multi_reduction <add>, %258, %cst_138 [1] : vector<128x16xf32> to vector<128xf32>
    %260 = vector.shape_cast %259 : vector<128xf32> to vector<128x1xf32>
    %cst_139 = arith.constant 1.600000e+01 : f32
    %261 = vector.broadcast %cst_139 : f32 to vector<128x1xf32>
    %262 = arith.divf %260, %261 : vector<128x1xf32>
    %263 = vector.broadcast %262 : vector<128x1xf32> to vector<128x16xf32>
    %264 = arith.subf %258, %263 : vector<128x16xf32>
    %265 = vector.broadcast %262 : vector<128x1xf32> to vector<128x16xf32>
    %266 = arith.subf %258, %265 : vector<128x16xf32>
    %267 = arith.mulf %264, %266 : vector<128x16xf32>
    %cst_140 = arith.constant dense<0.000000e+00> : vector<128xf32>
    %268 = vector.multi_reduction <add>, %267, %cst_140 [1] : vector<128x16xf32> to vector<128xf32>
    %269 = vector.shape_cast %268 : vector<128xf32> to vector<128x1xf32>
    %cst_141 = arith.constant 1.600000e+01 : f32
    %270 = vector.broadcast %cst_141 : f32 to vector<128x1xf32>
    %271 = arith.divf %269, %270 : vector<128x1xf32>
    %272 = vector.broadcast %262 : vector<128x1xf32> to vector<128x16xf32>
    %273 = arith.subf %258, %272 : vector<128x16xf32>
    %cst_142 = arith.constant 9.99999974E-6 : f32
    %274 = vector.broadcast %cst_142 : f32 to vector<128x1xf32>
    %275 = arith.addf %271, %274 : vector<128x1xf32>
    %276 = math.rsqrt %275 : vector<128x1xf32>
    %277 = vector.broadcast %276 : vector<128x1xf32> to vector<128x16xf32>
    %278 = arith.mulf %273, %277 : vector<128x16xf32>
    %c0_143 = arith.constant 0 : index
    %c0_144 = arith.constant 0 : index
    %279 = vector.load %arg40[%c0_143, %c0_144] : memref<1x16xf32, #tpu.memory_space<vmem>>, vector<1x16xf32>
    %280 = vector.broadcast %279 : vector<1x16xf32> to vector<128x16xf32>
    %281 = arith.mulf %278, %280 : vector<128x16xf32>
    %c0_145 = arith.constant 0 : index
    %c0_146 = arith.constant 0 : index
    %282 = vector.load %arg41[%c0_145, %c0_146] : memref<1x16xf32, #tpu.memory_space<vmem>>, vector<1x16xf32>
    %283 = vector.broadcast %282 : vector<1x16xf32> to vector<128x16xf32>
    %284 = arith.addf %281, %283 : vector<128x16xf32>
    %285 = arith.addf %187, %284 : vector<128x16xf32>
    %286 = arith.truncf %285 : vector<128x16xf32> to vector<128x16xbf16>
    %cst_147 = arith.constant dense<0.000000e+00> : vector<64x16xf32>
    %287 = tpu.matmul %49, %286, %cst_147 {dimension_numbers = #tpu.dot_dimension_numbers<[1], [0], [0], [1], [0, 0, 1, 1], [], []>} : vector<64x128xbf16>, vector<128x16xbf16>, vector<64x16xf32> -> vector<64x16xf32>
    %c0_148 = arith.constant 0 : index
    %c0_149 = arith.constant 0 : index
    %288 = vector.load %arg42[%c0_148, %c0_149] : memref<16x16xbf16, #tpu.memory_space<vmem>>, vector<16x16xbf16>
    %cst_150 = arith.constant dense<0.000000e+00> : vector<64x16xf32>
    %289 = tpu.matmul %234, %288, %cst_150 {dimension_numbers = #tpu.dot_dimension_numbers<[1], [0], [0], [1], [0, 0, 1, 1], [], []>} : vector<64x16xbf16>, vector<16x16xbf16>, vector<64x16xf32> -> vector<64x16xf32>
    %290 = arith.truncf %287 : vector<64x16xf32> to vector<64x16xbf16>
    %c0_151 = arith.constant 0 : index
    %c0_152 = arith.constant 0 : index
    %291 = vector.load %arg43[%c0_151, %c0_152] : memref<16x16xbf16, #tpu.memory_space<vmem>>, vector<16x16xbf16>
    %cst_153 = arith.constant dense<0.000000e+00> : vector<64x16xf32>
    %292 = tpu.matmul %290, %291, %cst_153 {dimension_numbers = #tpu.dot_dimension_numbers<[1], [0], [0], [1], [0, 0, 1, 1], [], []>} : vector<64x16xbf16>, vector<16x16xbf16>, vector<64x16xf32> -> vector<64x16xf32>
    %293 = arith.addf %289, %292 : vector<64x16xf32>
    %c0_154 = arith.constant 0 : index
    %c0_155 = arith.constant 0 : index
    %294 = vector.load %arg44[%c0_154, %c0_155] : memref<1x16xf32, #tpu.memory_space<vmem>>, vector<1x16xf32>
    %295 = vector.broadcast %294 : vector<1x16xf32> to vector<64x16xf32>
    %296 = arith.addf %293, %295 : vector<64x16xf32>
    %cst_156 = arith.constant 0.000000e+00 : f32
    %297 = vector.broadcast %cst_156 : f32 to vector<64x16xf32>
    %298 = arith.maximumf %296, %297 : vector<64x16xf32>
    %299 = arith.truncf %298 : vector<64x16xf32> to vector<64x16xbf16>
    %c0_157 = arith.constant 0 : index
    %c0_158 = arith.constant 0 : index
    %300 = vector.load %arg45[%c0_157, %c0_158] : memref<16x16xbf16, #tpu.memory_space<vmem>>, vector<16x16xbf16>
    %cst_159 = arith.constant dense<0.000000e+00> : vector<64x16xf32>
    %301 = tpu.matmul %299, %300, %cst_159 {dimension_numbers = #tpu.dot_dimension_numbers<[1], [0], [0], [1], [0, 0, 1, 1], [], []>} : vector<64x16xbf16>, vector<16x16xbf16>, vector<64x16xf32> -> vector<64x16xf32>
    %c0_160 = arith.constant 0 : index
    %c0_161 = arith.constant 0 : index
    %302 = vector.load %arg46[%c0_160, %c0_161] : memref<1x16xf32, #tpu.memory_space<vmem>>, vector<1x16xf32>
    %303 = vector.broadcast %302 : vector<1x16xf32> to vector<64x16xf32>
    %304 = arith.addf %301, %303 : vector<64x16xf32>
    %cst_162 = arith.constant dense<0.000000e+00> : vector<64xf32>
    %305 = vector.multi_reduction <add>, %304, %cst_162 [1] : vector<64x16xf32> to vector<64xf32>
    %306 = vector.shape_cast %305 : vector<64xf32> to vector<64x1xf32>
    %cst_163 = arith.constant 1.600000e+01 : f32
    %307 = vector.broadcast %cst_163 : f32 to vector<64x1xf32>
    %308 = arith.divf %306, %307 : vector<64x1xf32>
    %309 = vector.broadcast %308 : vector<64x1xf32> to vector<64x16xf32>
    %310 = arith.subf %304, %309 : vector<64x16xf32>
    %311 = vector.broadcast %308 : vector<64x1xf32> to vector<64x16xf32>
    %312 = arith.subf %304, %311 : vector<64x16xf32>
    %313 = arith.mulf %310, %312 : vector<64x16xf32>
    %cst_164 = arith.constant dense<0.000000e+00> : vector<64xf32>
    %314 = vector.multi_reduction <add>, %313, %cst_164 [1] : vector<64x16xf32> to vector<64xf32>
    %315 = vector.shape_cast %314 : vector<64xf32> to vector<64x1xf32>
    %cst_165 = arith.constant 1.600000e+01 : f32
    %316 = vector.broadcast %cst_165 : f32 to vector<64x1xf32>
    %317 = arith.divf %315, %316 : vector<64x1xf32>
    %318 = vector.broadcast %308 : vector<64x1xf32> to vector<64x16xf32>
    %319 = arith.subf %304, %318 : vector<64x16xf32>
    %cst_166 = arith.constant 9.99999974E-6 : f32
    %320 = vector.broadcast %cst_166 : f32 to vector<64x1xf32>
    %321 = arith.addf %317, %320 : vector<64x1xf32>
    %322 = math.rsqrt %321 : vector<64x1xf32>
    %323 = vector.broadcast %322 : vector<64x1xf32> to vector<64x16xf32>
    %324 = arith.mulf %319, %323 : vector<64x16xf32>
    %c0_167 = arith.constant 0 : index
    %c0_168 = arith.constant 0 : index
    %325 = vector.load %arg47[%c0_167, %c0_168] : memref<1x16xf32, #tpu.memory_space<vmem>>, vector<1x16xf32>
    %326 = vector.broadcast %325 : vector<1x16xf32> to vector<64x16xf32>
    %327 = arith.mulf %324, %326 : vector<64x16xf32>
    %c0_169 = arith.constant 0 : index
    %c0_170 = arith.constant 0 : index
    %328 = vector.load %arg48[%c0_169, %c0_170] : memref<1x16xf32, #tpu.memory_space<vmem>>, vector<1x16xf32>
    %329 = vector.broadcast %328 : vector<1x16xf32> to vector<64x16xf32>
    %330 = arith.addf %327, %329 : vector<64x16xf32>
    %331 = arith.addf %233, %330 : vector<64x16xf32>
    %332 = arith.truncf %331 : vector<64x16xf32> to vector<64x16xbf16>
    %c0_171 = arith.constant 0 : index
    %c0_172 = arith.constant 0 : index
    %333 = vector.load %arg49[%c0_171, %c0_172] : memref<16x16xbf16, #tpu.memory_space<vmem>>, vector<16x16xbf16>
    %cst_173 = arith.constant dense<0.000000e+00> : vector<64x16xf32>
    %334 = tpu.matmul %332, %333, %cst_173 {dimension_numbers = #tpu.dot_dimension_numbers<[1], [0], [0], [1], [0, 0, 1, 1], [], []>} : vector<64x16xbf16>, vector<16x16xbf16>, vector<64x16xf32> -> vector<64x16xf32>
    %c0_174 = arith.constant 0 : index
    %c0_175 = arith.constant 0 : index
    %335 = vector.load %arg50[%c0_174, %c0_175] : memref<1x16xf32, #tpu.memory_space<vmem>>, vector<1x16xf32>
    %336 = vector.broadcast %335 : vector<1x16xf32> to vector<64x16xf32>
    %337 = arith.addf %334, %336 : vector<64x16xf32>
    %cst_176 = arith.constant 0.000000e+00 : f32
    %338 = vector.broadcast %cst_176 : f32 to vector<64x16xf32>
    %339 = arith.maximumf %337, %338 : vector<64x16xf32>
    %340 = arith.truncf %339 : vector<64x16xf32> to vector<64x16xbf16>
    %c0_177 = arith.constant 0 : index
    %c0_178 = arith.constant 0 : index
    %341 = vector.load %arg51[%c0_177, %c0_178] : memref<16x128xbf16, #tpu.memory_space<vmem>>, vector<16x128xbf16>
    %cst_179 = arith.constant dense<0.000000e+00> : vector<64x128xf32>
    %342 = tpu.matmul %340, %341, %cst_179 {dimension_numbers = #tpu.dot_dimension_numbers<[1], [0], [0], [1], [0, 0, 1, 1], [], []>} : vector<64x16xbf16>, vector<16x128xbf16>, vector<64x128xf32> -> vector<64x128xf32>
    %c0_180 = arith.constant 0 : index
    %c0_181 = arith.constant 0 : index
    %343 = vector.load %arg52[%c0_180, %c0_181] : memref<1x128xf32, #tpu.memory_space<vmem>>, vector<1x128xf32>
    %344 = vector.broadcast %343 : vector<1x128xf32> to vector<64x128xf32>
    %345 = arith.addf %342, %344 : vector<64x128xf32>
    %c0_182 = arith.constant 0 : index
    %c0_183 = arith.constant 0 : index
    %346 = vector.load %arg53[%c0_182, %c0_183] : memref<64x128xf32, #tpu.memory_space<vmem>>, vector<64x128xf32>
    tpu.vector_store %arg53[%c0_182, %c0_183], %345 {strides = array<i32>} : memref<64x128xf32, #tpu.memory_space<vmem>>, vector<64x128xf32>,
    return
  }
}

</mosaic_0001>

<bundles_post_ra>
// kernel: simulator_forward.1
= control target key start
LH: loop header
LB: loop body
LE: loop exit
PB: predicated region body
PF: predicated region fallthrough
CT: control target
= control target key end

     0   :  { %s6188_s6 = smov 1   ;;  %s6189_s10 = smov 2   ;;  %s8303_s0 = inlined_call_operand.smem [shape: u32[54], index: -1, kind: input, shape index: {}] }
   0x1   :  { %s6261_s5 = sld [smem:[%s8303_s0]]   ;;  %s6190_s14 = smov 3  }
   0x2   :  { %s6266_s9 = sld [smem:[%s8303_s0 + %s6188_s6]]   ;;  %s6191_s18 = smov 4  }
   0x3   :  { %s6271_s13 = sld [smem:[%s8303_s0 + %s6189_s10]]   ;;  %s6192_s22 = smov 5  }
   0x4   :  { %s6276_s17 = sld [smem:[%s8303_s0 + %s6190_s14]]   ;;  %s6193_s26 = smov 6  }
   0x5   :  { %s6281_s21 = sld [smem:[%s8303_s0 + %s6191_s18]]   ;;  %s6194_s30 = smov 7  }
   0x6   :  { %s6286_s25 = sld [smem:[%s8303_s0 + %s6192_s22]]   ;;  %s6195_s4 = smov 8  }
   0x7   :  { %s6291_s29 = sld [smem:[%s8303_s0 + %s6193_s26]]   ;;  %s6196_s10 = smov 9  }
   0x8   :  { %s6296_s3 = sld [smem:[%s8303_s0 + %s6194_s30]]   ;;  %s6197_s15 = smov 10  }
   0x9   :  { %s6301_s8 = sld [smem:[%s8303_s0 + %s6195_s4]]   ;;  %s6198_s20 = smov 11  }
   0xa   :  { %8334 = sst [smem:[#allocation20_spill]] %s6276_s17  ;;  %s6199_s26 = smov 12  }
   0xb   :  { %8335 = sst [smem:[#allocation21_spill]] %s6281_s21  ;;  %s6200_s1 = smov 13  }
   0xc   :  { %8336 = sst [smem:[#allocation22_spill]] %s6286_s25  ;;  %s6201_s7 = smov 14  }
   0xd   :  { %s6306_s14 = sld [smem:[%s8303_s0 + %s6196_s10]]   ;;  %s6203_s22 = smov 16  }
   0xe   :  { %s6311_s19 = sld [smem:[%s8303_s0 + %s6197_s15]]   ;;  %s6202_s15 = smov 15  }
   0xf   :  { %8337 = sst [smem:[#allocation23_spill]] %s6301_s8  ;;  %s6204_s28 = smov 17  }
  0x10   :  { %s6316_s24 = sld [smem:[%s8303_s0 + %s6198_s20]]  }
  0x11   :  { %s6321_s30 = sld [smem:[%s8303_s0 + %s6199_s26]]  }
  0x12   :  { %s6326_s6 = sld [smem:[%s8303_s0 + %s6200_s1]]  }
  0x13   :  { %s6331_s12 = sld [smem:[%s8303_s0 + %s6201_s7]]   ;;  %s6205_s7 = smov 18  }
  0x14   :  { %8338 = sst [smem:[#allocation24_spill]] %s6311_s19 }
  0x15   :  { %s6336_s20 = sld [smem:[%s8303_s0 + %s6202_s15]]   ;;  %s6206_s15 = smov 19  }
  0x16   :  { %8339 = sst [smem:[#allocation25_spill]] %s6316_s24 }
  0x17   :  { %8340 = sst [smem:[#allocation26_spill]] %s6321_s30 }
  0x18   :  { %s6341_s27 = sld [smem:[%s8303_s0 + %s6203_s22]]   ;;  %s6207_s22 = smov 20  }
  0x19   :  { %8341 = sst [smem:[#allocation27_spill]] %s6331_s12 }
  0x1a   :  { %s6346_s4 = sld [smem:[%s8303_s0 + %s6204_s28]]   ;;  %s6208_s28 = smov 21  }
  0x1b   :  { %s6351_s25 = sld [smem:[%s8303_s0 + %s6205_s7]]   ;;  %s6209_s7 = smov 22  }
  0x1c   :  { %s6356_s21 = sld [smem:[%s8303_s0 + %s6206_s15]]   ;;  %s6210_s15 = smov 23  }
  0x1d   :  { %s6361_s30 = sld [smem:[%s8303_s0 + %s6207_s22]]   ;;  %s6211_s22 = smov 24  }
  0x1e   :  { %8342 = sst [smem:[#allocation28_spill]] %s6341_s27 }
  0x1f   :  { %s6381_s24 = sld [smem:[%s8303_s0 + %s6211_s22]]   ;;  %s6215_s22 = smov 28  }
  0x20   :  { %8343 = sst [smem:[#allocation29_spill]] %s6346_s4 }
  0x21   :  { %8344 = sst [smem:[#allocation30_spill]] %s6351_s25 }
  0x22   :  { %8345 = sst [smem:[#allocation31_spill]] %s6356_s21 }
  0x23   :  { %8346 = sst [smem:[#allocation32_spill]] %s6361_s30 }
  0x24   :  { %s6366_s4 = sld [smem:[%s8303_s0 + %s6208_s28]]   ;;  %s6212_s28 = smov 25  }
  0x25   :  { %s6371_s25 = sld [smem:[%s8303_s0 + %s6209_s7]]   ;;  %s6213_s7 = smov 26  }
  0x26   :  { %s6376_s21 = sld [smem:[%s8303_s0 + %s6210_s15]]   ;;  %s6214_s15 = smov 27  }
  0x27   :  { %8350 = sst [smem:[#allocation36_spill]] %s6381_s24 }
  0x28   :  { %s6386_s17 = sld [smem:[%s8303_s0 + %s6212_s28]]   ;;  %s6216_s28 = smov 29  }
  0x29   :  { %s6401_s24 = sld [smem:[%s8303_s0 + %s6215_s22]]   ;;  %s6219_s22 = smov 32  }
  0x2a   :  { %8347 = sst [smem:[#allocation33_spill]] %s6366_s4 }
  0x2b   :  { %8348 = sst [smem:[#allocation34_spill]] %s6371_s25 }
  0x2c   :  { %8349 = sst [smem:[#allocation35_spill]] %s6376_s21 }
  0x2d   :  { %s6391_s25 = sld [smem:[%s8303_s0 + %s6213_s7]]   ;;  %s6217_s7 = smov 30  }
  0x2e   :  { %8351 = sst [smem:[#allocation37_spill]] %s6386_s17 }
  0x2f   :  { %s6396_s21 = sld [smem:[%s8303_s0 + %s6214_s15]]   ;;  %s6218_s15 = smov 31  }
  0x30   :  { %8354 = sst [smem:[#allocation40_spill]] %s6401_s24 }
  0x31   :  { %s6406_s17 = sld [smem:[%s8303_s0 + %s6216_s28]]   ;;  %s6220_s28 = smov 33  }
  0x32   :  { %s6421_s24 = sld [smem:[%s8303_s0 + %s6219_s22]]   ;;  %s6223_s22 = smov 36  }
  0x33   :  { %8352 = sst [smem:[#allocation38_spill]] %s6391_s25 }
  0x34   :  { %s6411_s25 = sld [smem:[%s8303_s0 + %s6217_s7]]   ;;  %s6221_s7 = smov 34  }
  0x35   :  { %8353 = sst [smem:[#allocation39_spill]] %s6396_s21 }
  0x36   :  { %s6416_s21 = sld [smem:[%s8303_s0 + %s6218_s15]]   ;;  %s6222_s15 = smov 35  }
  0x37   :  { %8355 = sst [smem:[#allocation41_spill]] %s6406_s17 }
  0x38   :  { %8358 = sst [smem:[#allocation44_spill]] %s6421_s24 }
  0x39   :  { %s6426_s17 = sld [smem:[%s8303_s0 + %s6220_s28]]   ;;  %s6224_s28 = smov 37  }
  0x3a   :  { %8356 = sst [smem:[#allocation42_spill]] %s6411_s25 }
  0x3b   :  { %s6431_s25 = sld [smem:[%s8303_s0 + %s6221_s7]]   ;;  %s6225_s7 = smov 38  }
  0x3c   :  { %8357 = sst [smem:[#allocation43_spill]] %s6416_s21 }
  0x3d   :  { %s6436_s21 = sld [smem:[%s8303_s0 + %s6222_s15]]   ;;  %s6226_s15 = smov 39  }
  0x3e   :  { %s6441_s24 = sld [smem:[%s8303_s0 + %s6223_s22]]   ;;  %s6227_s22 = smov 40  }
  0x3f   :  { %8359 = sst [smem:[#allocation45_spill]] %s6426_s17 }
  0x40   :  { %s6446_s17 = sld [smem:[%s8303_s0 + %s6224_s28]]   ;;  %s6228_s28 = smov 41  }
  0x41   :  { %8360 = sst [smem:[#allocation46_spill]] %s6431_s25 }
  0x42   :  { %s6451_s25 = sld [smem:[%s8303_s0 + %s6225_s7]]   ;;  %s6229_s7 = smov 42  }
  0x43   :  { %8361 = sst [smem:[#allocation47_spill]] %s6436_s21 }
  0x44   :  { %8362 = sst [smem:[#allocation48_spill]] %s6441_s24 }
  0x45   :  { %s6456_s21 = sld [smem:[%s8303_s0 + %s6226_s15]]   ;;  %s6230_s15 = smov 43  }
  0x46   :  { %8363 = sst [smem:[#allocation49_spill]] %s6446_s17 }
  0x47   :  { %s6461_s24 = sld [smem:[%s8303_s0 + %s6227_s22]]   ;;  %s6231_s22 = smov 44  }
  0x48   :  { %8364 = sst [smem:[#allocation50_spill]] %s6451_s25 }
  0x49   :  { %s6466_s17 = sld [smem:[%s8303_s0 + %s6228_s28]]   ;;  %s6232_s28 = smov 45  }
  0x4a   :  { %s6471_s25 = sld [smem:[%s8303_s0 + %s6229_s7]]   ;;  %s6233_s7 = smov 46  }
  0x4b   :  { %8365 = sst [smem:[#allocation51_spill]] %s6456_s21 }
  0x4c   :  { %s6476_s21 = sld [smem:[%s8303_s0 + %s6230_s15]]   ;;  %s6234_s15 = smov 47  }
  0x4d   :  { %s6481_s4 = sld [smem:[%s8303_s0 + %s6231_s22]]   ;;  %s6235_s22 = smov 48  }
  0x4e   :  { %s6486_s27 = sld [smem:[%s8303_s0 + %s6232_s28]]   ;;  %s6236_s28 = smov 49  }
  0x4f   :  { %s6501_s30 = sld [smem:[%s8303_s0 + %s6235_s22]]   ;;  %s6239_s22 = smov 52  }
  0x50   :  { %8366 = sst [smem:[#allocation52_spill]] %s6471_s25 }
  0x51   :  { %s6491_s25 = sld [smem:[%s8303_s0 + %s6233_s7]]   ;;  %s6237_s7 = smov 50  }
  0x52   :  { %8367 = sst [smem:[#allocation53_spill]] %s6476_s21 }
  0x53   :  { %s6496_s21 = sld [smem:[%s8303_s0 + %s6234_s15]]   ;;  %s6238_s15 = smov 51  }
  0x54   :  { %8368 = sst [smem:[#allocation54_spill]] %s6486_s27 }
  0x55   :  { %s6506_s27 = sld [smem:[%s8303_s0 + %s6236_s28]]   ;;  %s6240_s28 = smov 53  }
  0x56   :  { %s6511_s19 = sld [smem:[%s8303_s0 + %s6237_s7]]  }
  0x57   :  { %s6516_s12 = sld [smem:[%s8303_s0 + %s6238_s15]]  }
  0x58   :  { %s6521_s8 = sld [smem:[%s8303_s0 + %s6239_s22]]  }
  0x5b   :  { %8369 = sst [smem:[#allocation55_spill]] %s6506_s27 }
  0x5c   :  { %s6526_s27 = sld [smem:[%s8303_s0 + %s6240_s28]]  }
  0x5d   :  { %112 = vsyncpa [#allocation3], 0 }
  0x5e   :  { %113 = vsyncpa [#allocation5], 0 }
  0x5f   :  { %114 = vsyncpa [#allocation8], 0 }
  0x60   :  { %115 = vsyncpa [#allocation11], 0 }
  0x61   :  { %116 = vsyncpa [#allocation14], 0  ;;  %s6241_s7 = smov [#allocation4]   ;;  %s6242_s11 = smov [#allocation7]  }
  0x62   :  { %s213_s10 = sshll.u32 %s6241_s7, 4  ;;  %s239_s15 = sshll.u32 %s6242_s11, 4  ;;  %s214_s10 = int_to_ptr.vmem [resolvable:$true] %s213_s10  ;;  %s240_s15 = int_to_ptr.vmem [resolvable:$true] %s239_s15 }
  0x63   :  { %s6002_s16 = scalar_lea.hbm %s6466_s17, 16 }
  0x64   :  { %p6003_p0 = scmp.ne.s32.totalorder %s6466_s17, %s6002_s16  ;;  %p6006_p1 = scmp.lt.u32.totalorder %s6002_s16, %s6466_s17 }
  0x66   :  { %p6008_p2 = pnand %p6006_p1, %p6003_p0 }
  0x68   :  { %6011 = shalt.err (!%p6008_p2)
}
  0x69   :  { %s6012_s0 = scalar_lea.vmem %s214_s10, 16  ;;  %s6016_s18 = scalar_lea.vmem %s214_s10, 32 }
  0x6a   :  { %p6013_p3 = scmp.ne.s32.totalorder %s214_s10, %s6012_s0  ;;  %p6017_p4 = scmp.lt.s32.totalorder %s214_s10, %s214_s10 }
  0x6b   :  { %p6018_p5 = scmp.lt.s32.totalorder %s6016_s18, %s6012_s0 }
  0x6d   :  { %p6019_p6 = por %p6018_p5, %p6017_p4 }
  0x6f   :  { %p6020_p7 = pnand %p6019_p6, %p6013_p3 }
  0x71   :  { %6023 = shalt.err (!%p6020_p7)
}
  0x72   :  { %216 = dma.hbm_to_vmem [thread:$0]  %s6466_s17, 16, %s214_s10, [#allocation5]  }
  0x73   :  { %s6024_s22 = scalar_lea.hbm %s6491_s25, 16 }
  0x74   :  { %p6025_p8 = scmp.ne.s32.totalorder %s6491_s25, %s6024_s22  ;;  %p6028_p9 = scmp.lt.u32.totalorder %s6024_s22, %s6491_s25 }
  0x76   :  { %p6030_p10 = pnand %p6028_p9, %p6025_p8 }
  0x78   :  { %6033 = shalt.err (!%p6030_p10)
}
  0x79   :  { %s6034_s23 = scalar_lea.vmem %s240_s15, 16  ;;  %s6038_s26 = scalar_lea.vmem %s240_s15, 32 }
  0x7a   :  { %p6035_p11 = scmp.ne.s32.totalorder %s240_s15, %s6034_s23  ;;  %p6039_p12 = scmp.lt.s32.totalorder %s240_s15, %s240_s15 }
  0x7b   :  { %p6040_p13 = scmp.lt.s32.totalorder %s6038_s26, %s6034_s23 }
  0x7d   :  { %p6041_p0 = por %p6040_p13, %p6039_p12 }
  0x7f   :  { %p6042_p1 = pnand %p6041_p0, %p6035_p11 }
  0x81   :  { %6045 = shalt.err (!%p6042_p1)
}
  0x82   :  { %242 = dma.hbm_to_vmem [thread:$0]  %s6491_s25, 16, %s240_s15, [#allocation8]  }
  0x83   :  { %s6243_s28 = smov [#allocation10]   ;;  %s6244_s1 = smov [#allocation2]  }
  0x84   :  { %s259_s17 = sshll.u32 %s6243_s28, 4  ;;  %s203_s2 = sshll.u32 %s6244_s1, 4  ;;  %s260_s17 = int_to_ptr.vmem [resolvable:$true] %s259_s17  ;;  %s204_s2 = int_to_ptr.vmem [resolvable:$true] %s203_s2 }
  0x85   :  { %s6046_s7 = scalar_lea.hbm %s6501_s30, 16 }
  0x86   :  { %p6047_p2 = scmp.ne.s32.totalorder %s6501_s30, %s6046_s7  ;;  %p6050_p3 = scmp.lt.u32.totalorder %s6046_s7, %s6501_s30 }
  0x88   :  { %p6052_p4 = pnand %p6050_p3, %p6047_p2 }
  0x8a   :  { %6055 = shalt.err (!%p6052_p4)
}
  0x8b   :  { %s6056_s10 = scalar_lea.vmem %s260_s17, 16  ;;  %s6060_s11 = scalar_lea.vmem %s260_s17, 32 }
  0x8c   :  { %p6057_p5 = scmp.ne.s32.totalorder %s260_s17, %s6056_s10  ;;  %p6061_p6 = scmp.lt.s32.totalorder %s260_s17, %s260_s17 }
  0x8d   :  { %p6062_p7 = scmp.lt.s32.totalorder %s6060_s11, %s6056_s10 }
  0x8f   :  { %p6063_p8 = por %p6062_p7, %p6061_p6 }
  0x91   :  { %p6064_p9 = pnand %p6063_p8, %p6057_p5 }
  0x93   :  { %6067 = shalt.err (!%p6064_p9)
}
  0x94   :  { %262 = dma.hbm_to_vmem [thread:$0]  %s6501_s30, 16, %s260_s17, [#allocation11]  }
  0x95   :  { %s6068_s25 = scalar_lea.hbm %s6461_s24, 16 }
  0x96   :  { %p6069_p10 = scmp.ne.s32.totalorder %s6461_s24, %s6068_s25  ;;  %p6072_p11 = scmp.lt.u32.totalorder %s6068_s25, %s6461_s24 }
  0x98   :  { %p6074_p12 = pnand %p6072_p11, %p6069_p10 }
  0x9a   :  { %6077 = shalt.err (!%p6074_p12)
}
  0x9b   :  { %s6078_s15 = scalar_lea.vmem %s204_s2, 16  ;;  %s6082_s16 = scalar_lea.vmem %s204_s2, 32 }
  0x9c   :  { %p6079_p13 = scmp.ne.s32.totalorder %s204_s2, %s6078_s15  ;;  %p6083_p0 = scmp.lt.s32.totalorder %s204_s2, %s204_s2 }
  0x9d   :  { %p6084_p1 = scmp.lt.s32.totalorder %s6082_s16, %s6078_s15 }
  0x9f   :  { %p6085_p2 = por %p6084_p1, %p6083_p0 }
  0xa1   :  { %p6086_p3 = pnand %p6085_p2, %p6079_p13 }
  0xa3   :  { %6089 = shalt.err (!%p6086_p3)
}
  0xa4   :  { %206 = dma.hbm_to_vmem [thread:$0]  %s6461_s24, 16, %s204_s2, [#allocation3]  }
  0xa5   :  { %s6245_s0 = smov [#allocation6]   ;;  %s6246_s18 = smov [#allocation9]  }
  0xa6   :  { %s227_s30 = sshll.u32 %s6245_s0, 4  ;;  %s249_s22 = sshll.u32 %s6246_s18, 4  ;;  %s228_s30 = int_to_ptr.vmem [resolvable:$true] %s227_s30  ;;  %s250_s22 = int_to_ptr.vmem [resolvable:$true] %s249_s22 }
  0xa7   :  { %s6090_s23 = scalar_lea.hbm %s6481_s4, 16 }
  0xa8   :  { %p6091_p4 = scmp.ne.s32.totalorder %s6481_s4, %s6090_s23  ;;  %p6094_p5 = scmp.lt.u32.totalorder %s6090_s23, %s6481_s4 }
  0xaa   :  { %p6096_p6 = pnand %p6094_p5, %p6091_p4 }
  0xac   :  { %6099 = shalt.err (!%p6096_p6)
}
  0xad   :  { %s6100_s26 = scalar_lea.vmem %s228_s30, 16  ;;  %s6104_s28 = scalar_lea.vmem %s228_s30, 32 }
  0xae   :  { %p6101_p7 = scmp.ne.s32.totalorder %s228_s30, %s6100_s26  ;;  %p6105_p8 = scmp.lt.s32.totalorder %s228_s30, %s228_s30 }
  0xaf   :  { %p6106_p9 = scmp.lt.s32.totalorder %s6104_s28, %s6100_s26 }
  0xb1   :  { %p6107_p10 = por %p6106_p9, %p6105_p8 }
  0xb3   :  { %p6108_p11 = pnand %p6107_p10, %p6101_p7 }
  0xb5   :  { %6111 = shalt.err (!%p6108_p11)
}
  0xb6   :  { %230 = dma.hbm_to_vmem [thread:$0]  %s6481_s4, 16, %s228_s30, [#allocation5]  }
  0xb7   :  { %s6112_s24 = scalar_lea.hbm %s6496_s21, 16 }
  0xb8   :  { %p6113_p12 = scmp.ne.s32.totalorder %s6496_s21, %s6112_s24  ;;  %p6116_p13 = scmp.lt.u32.totalorder %s6112_s24, %s6496_s21 }
  0xba   :  { %p6118_p0 = pnand %p6116_p13, %p6113_p12 }
  0xbc   :  { %6121 = shalt.err (!%p6118_p0)
}
  0xbd   :  { %s6122_s17 = scalar_lea.vmem %s250_s22, 16  ;;  %s6126_s1 = scalar_lea.vmem %s250_s22, 32 }
  0xbe   :  { %p6123_p1 = scmp.ne.s32.totalorder %s250_s22, %s6122_s17  ;;  %p6127_p2 = scmp.lt.s32.totalorder %s250_s22, %s250_s22 }
  0xbf   :  { %p6128_p3 = scmp.lt.s32.totalorder %s6126_s1, %s6122_s17 }
  0xc1   :  { %p6129_p4 = por %p6128_p3, %p6127_p2 }
  0xc3   :  { %p6130_p5 = pnand %p6129_p4, %p6123_p1 }
  0xc5   :  { %6133 = shalt.err (!%p6130_p5)
}
  0xc6   :  { %252 = dma.hbm_to_vmem [thread:$0]  %s6496_s21, 16, %s250_s22, [#allocation8]  }
  0xc7   :  { %s6247_s2 = smov [#allocation12]   ;;  %s6248_s7 = smov [#allocation13]  }
  0xc8   :  { %s271_s4 = sshll.u32 %s6247_s2, 4  ;;  %s283_s10 = sshll.u32 %s6248_s7, 4  ;;  %s272_s4 = int_to_ptr.vmem [resolvable:$true] %s271_s4  ;;  %s284_s10 = int_to_ptr.vmem [resolvable:$true] %s283_s10 }
  0xc9   :  { %s6134_s11 = scalar_lea.hbm %s6511_s19, 16 }
  0xca   :  { %p6135_p6 = scmp.ne.s32.totalorder %s6511_s19, %s6134_s11  ;;  %p6138_p7 = scmp.lt.u32.totalorder %s6134_s11, %s6511_s19 }
  0xcc   :  { %p6140_p8 = pnand %p6138_p7, %p6135_p6 }
  0xce   :  { %6143 = shalt.err (!%p6140_p8)
}
  0xcf   :  { %s6144_s25 = scalar_lea.vmem %s272_s4, 16  ;;  %s6148_s15 = scalar_lea.vmem %s272_s4, 32 }
  0xd0   :  { %p6145_p9 = scmp.ne.s32.totalorder %s272_s4, %s6144_s25  ;;  %p6149_p10 = scmp.lt.s32.totalorder %s272_s4, %s272_s4 }
  0xd1   :  { %p6150_p11 = scmp.lt.s32.totalorder %s6148_s15, %s6144_s25 }
  0xd3   :  { %p6151_p12 = por %p6150_p11, %p6149_p10 }
  0xd5   :  { %p6152_p13 = pnand %p6151_p12, %p6145_p9 }
  0xd7   :  { %6155 = shalt.err (!%p6152_p13)
}
  0xd8   :  { %274 = dma.hbm_to_vmem [thread:$0]  %s6511_s19, 16, %s272_s4, [#allocation11]  }
  0xd9   :  { %s6156_s21 = scalar_lea.hbm %s6521_s8, 16 }
  0xda   :  { %p6157_p0 = scmp.ne.s32.totalorder %s6521_s8, %s6156_s21  ;;  %p6160_p1 = scmp.lt.u32.totalorder %s6156_s21, %s6521_s8 }
  0xdc   :  { %p6162_p2 = pnand %p6160_p1, %p6157_p0 }
  0xde   :  { %6165 = shalt.err (!%p6162_p2)
}
  0xdf   :  { %s6166_s16 = scalar_lea.vmem %s284_s10, 16  ;;  %s6170_s0 = scalar_lea.vmem %s284_s10, 32 }
  0xe0   :  { %p6167_p3 = scmp.ne.s32.totalorder %s284_s10, %s6166_s16  ;;  %p6171_p4 = scmp.lt.s32.totalorder %s284_s10, %s284_s10 }
  0xe1   :  { %p6172_p5 = scmp.lt.s32.totalorder %s6170_s0, %s6166_s16 }
  0xe3   :  { %p6173_p6 = por %p6172_p5, %p6171_p4 }
  0xe5   :  { %p6174_p7 = pnand %p6173_p6, %p6167_p3 }
  0xe7   :  { %6177 = shalt.err (!%p6174_p7)
}
  0xe8   :  { %286 = dma.hbm_to_vmem [thread:$0]  %s6521_s8, 16, %s284_s10, [#allocation14]  }
  0xe9   :  { %6178 = dma.done.wait [#allocation3], 16  }
  0xea   :  { %6179 = vsyncadd [#allocation3], 4294967280 }
  0xeb   :  { %6180 = dma.done.wait [#allocation5], 32  }
  0xec   :  { %6181 = vsyncadd [#allocation5], 4294967264 }
  0xed   :  { %6182 = dma.done.wait [#allocation8], 32  }
  0xee   :  { %6183 = vsyncadd [#allocation8], 4294967264 }
  0xef   :  { %6184 = dma.done.wait [#allocation11], 32  }
  0xf0   :  { %6185 = vsyncadd [#allocation11], 4294967264 }
  0xf1   :  { %6186 = dma.done.wait [#allocation14], 16  }
  0xf2   :  { %6187 = vsyncadd [#allocation14], 4294967280  ;;  %v6249_v0 = vmov 0   ;;  %vm741_vm0 = vcmask 1040384   ;;  %vm320_vm1 = vcmask 15360   ;;  %v6250_v1 = vmov 65535  }
  0xf3   :  { %5814 = vset.pattern.permute.xlu0 %v6249_v0  ;;  %5825 = vset.pattern.permute.xlu1 %v6249_v0  ;;  %v1123_v2 = vsel %vm741_vm0, 4294967295, %v6250_v1  ;;  %vm1122_vm2 = vcmask 1041408   ;;  %v673_v3 = vld [vmem:[%s6291_s29] sm:$0x1]  ;;  %v6565_v5 = vld [vmem:[%s6266_s9 + $0x8] sm:$0xff]  ;;  %v6568_v7 = vld [vmem:[%s6266_s9 + $0x10] sm:$0xff] }
  0xf4   :  { %v6562_v4 = vld [vmem:[%s6266_s9] sm:$0xff]  ;;  %5748 = vmatprep.subr.msk.bf16.mxu0 %vm741_vm0, %v673_v3  ;;  %v743_v6 = vsel %vm741_vm0, %v673_v3, 0  ;;  %v6571_v8 = vld [vmem:[%s6266_s9 + $0x18] sm:$0xff]  ;;  %v322_v11 = vsel %vm320_vm1, %v6565_v5, 0.0  ;;  %v6583_v13 = vld [vmem:[%s6266_s9 + $0x28] sm:$0xff]  ;;  %v324_v17 = vsel %vm320_vm1, %v6568_v7, 0.0  ;;  %v344_v23 = vmul.f32 %v6565_v5, %v6565_v5 }
  0xf5   :  { %v6574_v9 = vld [vmem:[%s6266_s9 + $0x20] sm:$0xff]  ;;  %v321_v10 = vsel %vm320_vm1, %v6562_v4, 0.0  ;;  %v343_v12 = vmul.f32 %v6562_v4, %v6562_v4  ;;  %5277 = vmatpush3.bf16.msra.mxu0 %v743_v6  ;;  %v6586_v14 = vld [vmem:[%s6266_s9 + $0x30] sm:$0xff]  ;;  %v6589_v15 = vld [vmem:[%s6266_s9 + $0x38] sm:$0xff]  ;;  %v326_v18 = vsel %vm320_vm1, %v6571_v8, 0.0  ;;  %v1124_v19 = vsel %vm1122_vm2, %v1123_v2, 0 }
  0xf6   :  { %v323_v16 = vadd.f32 %v322_v11, %v321_v10  ;;  %v328_v20 = vsel %vm320_vm1, %v6574_v9, 0.0  ;;  %v330_v21 = vsel %vm320_vm1, %v6583_v13, 0.0  ;;  %v332_v22 = vsel %vm320_vm1, %v6586_v14, 0.0  ;;  %v401_v32 = vld [vmem:[%s6261_s5] sm:$0xff]  ;;  %v402_v33 = vld [vmem:[%s6261_s5 + $0x8] sm:$0xff]  ;;  %v403_v38 = vld [vmem:[%s6261_s5 + $0x10] sm:$0xff] }
  0xf7   :  { %v345_v25 = vmul.f32 %v6568_v7, %v6568_v7  ;;  %v346_v26 = vmul.f32 %v6571_v8, %v6571_v8  ;;  %v347_v27 = vmul.f32 %v6574_v9, %v6574_v9  ;;  %v334_v28 = vsel %vm320_vm1, %v6589_v15, 0.0  ;;  %v404_v43 = vld [vmem:[%s6261_s5 + $0x18] sm:$0xff]  ;;  %v405_v46 = vld [vmem:[%s6261_s5 + $0x20] sm:$0xff]  ;;  %v406_v47 = vld [vmem:[%s6261_s5 + $0x28] sm:$0xff]  ;;  %s8371_s9 = sld [smem:[#allocation27_spill]]  ;;  %s8373_s29 = sld [smem:[#allocation32_spill]] }
  0xf8   :  { %v325_v24 = vadd.f32 %v324_v17, %v323_v16  ;;  %v348_v29 = vmul.f32 %v6583_v13, %v6583_v13  ;;  %v349_v30 = vmul.f32 %v6586_v14, %v6586_v14  ;;  %v351_v31 = vsel %vm320_vm1, %v343_v12, 0.0  ;;  %v407_v55 = vld [vmem:[%s6261_s5 + $0x30] sm:$0xff]  ;;  %v408_v56 = vld [vmem:[%s6261_s5 + $0x38] sm:$0xff]  ;;  %v1089_v57 = vld [vmem:[%s6326_s6] sm:$0x3]  ;;  %s8370_s5 = sld [smem:[#allocation23_spill]] }
  0xf9   :  { %v350_v35 = vmul.f32 %v6589_v15, %v6589_v15  ;;  %v352_v36 = vsel %vm320_vm1, %v344_v23, 0.0  ;;  %v354_v37 = vsel %vm320_vm1, %v345_v25, 0.0  ;;  %v356_v40 = vsel %vm320_vm1, %v346_v26, 0.0  ;;  %s8375_s8 = sld [smem:[#allocation33_spill]]  ;;  %s8378_s6 = sld [smem:[#allocation26_spill]] }
  0xfa   :  { %v327_v34 = vadd.f32 %v326_v18, %v325_v24  ;;  %v353_v39 = vadd.f32 %v352_v36, %v351_v31  ;;  %v358_v41 = vsel %vm320_vm1, %v347_v27, 0.0  ;;  %v360_v42 = vsel %vm320_vm1, %v348_v29, 0.0  ;;  %s8377_s19 = sld [smem:[#allocation25_spill]]  ;;  %s8386_s30 = sld [smem:[#allocation35_spill]] }
  0xfb   :  { %v362_v45 = vsel %vm320_vm1, %v349_v30, 0.0  ;;  %vm409_vm3 = vcmp.eq.f32.partialorder %v401_v32, 1.0  ;;  %vm410_vm4 = vcmp.eq.f32.partialorder %v402_v33, 1.0  ;;  %v8307_v49 = vmov 0.0   ;;  %s8387_s18 = sld [smem:[#allocation31_spill]]  ;;  %s8391_s22 = sld [smem:[#allocation29_spill]] }
  0xfc   :  { %v329_v44 = vadd.f32 %v328_v20, %v327_v34  ;;  %v355_v48 = vadd.f32 %v354_v37, %v353_v39  ;;  %v417_v50 = vsel %vm409_vm3, 1.0, %v8307_v49  ;;  %v418_v51 = vsel %vm410_vm4, 1.0, %v8307_v49  ;;  %s8393_s23 = sld [smem:[#allocation30_spill]]  ;;  %s8401_s26 = sld [smem:[#allocation34_spill]] }
  0xfd   :  { %vm411_vm5 = vcmp.eq.f32.partialorder %v403_v38, 1.0  ;;  %v5815_v53 = vpack.i.bf16 %v418_v51, %v417_v50  ;;  %vm412_vm6 = vcmp.eq.f32.partialorder %v404_v43, 1.0  ;;  %vm413_vm7 = vcmp.eq.f32.partialorder %v405_v46, 1.0  ;;  %s8405_s28 = sld [smem:[#allocation36_spill]]  ;;  %s8406_s24 = sld [smem:[#allocation22_spill]] }
  0xfe   :  { %v331_v52 = vadd.f32 %v330_v21, %v329_v44  ;;  %v419_v54 = vsel %vm411_vm5, 1.0, %v8307_v49  ;;  %v357_v58 = vadd.f32 %v356_v40, %v355_v48  ;;  %v420_v59 = vsel %vm412_vm6, 1.0, %v8307_v49  ;;  %s8417_s17 = sld [smem:[#allocation37_spill]]  ;;  %s8418_s1 = sld [smem:[#allocation38_spill]] }
  0xff   :  { %vm414_vm8 = vcmp.eq.f32.partialorder %v406_v47, 1.0  ;;  %5816 = vperm.xlu0 %5814, %v5815_v53   ;;  %v5820_v61 = vpack.i.bf16 %v420_v59, %v419_v54  ;;  %v421_v62 = vsel %vm413_vm7, 1.0, %v8307_v49  ;;  %vm415_vm9 = vcmp.eq.f32.partialorder %v407_v55, 1.0  ;;  %v1067_v59 = vld [vmem:[%s6271_s13 + $0x10] sm:$0xff]  ;;  %s8419_s2 = sld [smem:[#allocation40_spill]]  ;;  %s8420_s4 = sld [smem:[#allocation39_spill]] }
 0x100   :  { %v333_v60 = vadd.f32 %v332_v22, %v331_v52  ;;  %v422_v63 = vsel %vm414_vm8, 1.0, %v8307_v49  ;;  %v359_v0 = vadd.f32 %v358_v41, %v357_v58  ;;  %vm416_vm10 = vcmp.eq.f32.partialorder %v408_v56, 1.0  ;;  %s8421_s7 = sld [smem:[#allocation42_spill]]  ;;  %s8423_s10 = sld [smem:[#allocation41_spill]] }
 0x101   :  { %v5826_v1 = vpack.i.bf16 %v422_v63, %v421_v62  ;;  %v423_v3 = vsel %vm415_vm9, 1.0, %v8307_v49  ;;  %v424_v6 = vsel %vm416_vm10, 1.0, %v8307_v49  ;;  %v1126_v10 = vand.u32 %v1124_v19, %v1089_v57  ;;  %v1070_v62 = vld [vmem:[%s6271_s13 + $0x28] sm:$0xff]  ;;  %s8424_s11 = sld [smem:[#allocation43_spill]]  ;;  %s8425_s25 = sld [smem:[#allocation47_spill]] }
 0x102   :  { %v335_v2 = vadd.f32 %v334_v28, %v333_v60  ;;  %v361_v11 = vadd.f32 %v360_v42, %v359_v0  ;;  %v5831_v12 = vpack.i.bf16 %v424_v6, %v423_v3  ;;  %v364_v17 = vsel %vm320_vm1, %v350_v35, 0.0  ;;  %v1068_v60 = vld [vmem:[%s6271_s13 + $0x18] sm:$0xff]  ;;  %v1073_v3 = vld [vmem:[%s6271_s13 + $0x40] sm:$0xff]  ;;  %v1074_v6 = vld [vmem:[%s6271_s13 + $0x48] sm:$0xff]  ;;  %s8426_s15 = sld [smem:[#allocation48_spill]]  ;;  %s8427_s21 = sld [smem:[#allocation44_spill]] }
 0x103   :  { %5827 = vperm.xlu1 %5825, %v5826_v1   ;;  %5821 = vperm.xlu0 %5814, %v5820_v61   ;;  %vm1097_vm13 = vcmask 23552   ;;  %v1069_v61 = vld [vmem:[%s6271_s13 + $0x20] sm:$0xff]  ;;  %v1082_v63 = vpack.c.bf16 %v1068_v60, %v1067_v59  ;;  %v1071_v1 = vld [vmem:[%s6271_s13 + $0x30] sm:$0xff]  ;;  %vm852_vm14 = vcmask 130048   ;;  %s8428_s16 = sld [smem:[#allocation45_spill]]  ;;  %s8431_s0 = sld [smem:[#allocation50_spill]] }
 0x104   :  { %v336_v16 = vrot.slane %v335_v2, 4  ;;  %5296 = vmatprep.subr.bf16.mxu0 %v1126_v10  ;;  %v363_v18 = vadd.f32 %v362_v45, %v361_v11  ;;  %v1083_v0 = vpack.c.bf16 %v1070_v62, %v1069_v61  ;;  %v1085_v11 = vpack.c.bf16 %v1074_v6, %v1073_v3 }
 0x106   :  { %v337_v20 = vadd.f32 %v336_v16, %v335_v2  ;;  %v365_v21 = vadd.f32 %v364_v17, %v363_v18  ;;  %v1072_v2 = vld [vmem:[%s6271_s13 + $0x38] sm:$0xff]  ;;  %v1077_v17 = vld [vmem:[%s6271_s13 + $0x60] sm:$0xff]  ;;  %v1078_v18 = vld [vmem:[%s6271_s13 + $0x68] sm:$0xff] }
 0x107   :  { %5832 = vperm.xlu1 %5825, %v5831_v12   ;;  %v1075_v12 = vld [vmem:[%s6271_s13 + $0x50] sm:$0xff]  ;;  %v1076_v16 = vld [vmem:[%s6271_s13 + $0x58] sm:$0xff] }
 0x108   :  { %v338_v22 = vrot.slane %v337_v20, 2  ;;  %v366_v23 = vrot.slane %v365_v21, 4 }
 0x10a   :  { %v339_v24 = vadd.f32 %v338_v22, %v337_v20  ;;  %v367_v25 = vadd.f32 %v366_v23, %v365_v21  ;;  %v1086_v20 = vpack.c.bf16 %v1076_v16, %v1075_v12  ;;  %v1087_v21 = vpack.c.bf16 %v1078_v18, %v1077_v17  ;;  %v1079_v22 = vld [vmem:[%s6271_s13 + $0x70] sm:$0xff]  ;;  %v1080_v23 = vld [vmem:[%s6271_s13 + $0x78] sm:$0xff]  ;;  %v6686_v17 = vld [vmem:[%s8371_s9] ss:$0 sm:$0xff]  ;;  %s8445_s9 = sld [smem:[#allocation49_spill]] }
 0x10c   :  { %v340_v26 = vrot.slane %v339_v24, 1  ;;  %v368_v27 = vrot.slane %v367_v25, 2 }
 0x10e   :  { %v341_v28 = vadd.f32 %v340_v26, %v339_v24  ;;  %v369_v19 = vadd.f32 %v368_v27, %v367_v25  ;;  %v1088_v24 = vpack.c.bf16 %v1080_v23, %v1079_v22  ;;  %v5836_v25 = vld [vmem:[%s6306_s14] sm:$0xff]   ;;  %s8376_s14 = sld [smem:[#allocation20_spill]] }
 0x10f   :  { %5286 = vmatprep.subr.bf16.mxu1 %v5836_v25  ;;  %v5837_v26 = vld [vmem:[%s6336_s20] sm:$0xff]   ;;  %s8384_s20 = sld [smem:[#allocation21_spill]] }
 0x110   :  { %v342_v29 = vmul.f32 0.015625, %v341_v28  ;;  %v370_v30 = vrot.slane %v369_v19, 1  ;;  %5287 = vmatpush3.bf16.msra.mxu1 %v5836_v25 }
 0x111   :  { %5314 = vmatprep.subr.bf16.mxu1 %v5837_v26 }
 0x112   :  { %v371_v31 = vadd.f32 %v370_v30, %v369_v19  ;;  %v373_v32 = vmul.f32 %v342_v29, %v342_v29  ;;  %v384_v42 = vsub.f32 %v6562_v4, %v342_v29  ;;  %v385_v43 = vsub.f32 %v6565_v5, %v342_v29 }
 0x113   :  { %v386_v44 = vsub.f32 %v6568_v7, %v342_v29  ;;  %v387_v45 = vsub.f32 %v6571_v8, %v342_v29  ;;  %v388_v46 = vsub.f32 %v6574_v9, %v342_v29  ;;  %v389_v47 = vsub.f32 %v6583_v13, %v342_v29 }
 0x114   :  { %v372_v33 = vmul.f32 0.015625, %v371_v31  ;;  %v390_v4 = vsub.f32 %v6586_v14, %v342_v29  ;;  %v391_v5 = vsub.f32 %v6589_v15, %v342_v29  ;;  %v1065_v14 = vld [vmem:[%s6271_s13] sm:$0xff]  ;;  %v1066_v15 = vld [vmem:[%s6271_s13 + $0x8] sm:$0xff]  ;;  %s8372_s13 = sld [smem:[#allocation24_spill]] }
 0x115   :  { %v1081_v58 = vpack.c.bf16 %v1066_v15, %v1065_v14  ;;  %v4883_v31 = vld [vmem:[%s6296_s3] ss:$0 sm:$0xff]  ;;  %s8374_s3 = sld [smem:[#allocation28_spill]] }
 0x116   :  { %v374_v34 = vsub.f32 %v372_v33, %v373_v32 }
 0x118   :  { %v375_v35 = vmax.f32 %v374_v34, 0.0 }
 0x11a   :  { %5854 = vrsqrt.f32 %v375_v35  ;;  %vm378_vm11 = vcmp.eq.f32.partialorder %v375_v35, inf  ;;  %v381_v37 = vand.u32 2147483648, %v375_v35  ;;  %vm380_vm12 = vcmp.eq.f32.partialorder %v375_v35, 0.0 }
 0x124   :  { %v5855_v36 = vpop.eup %5854 }
 0x125   :  { %v377_v38 = vmul.f32 %v5855_v36, %v375_v35 }
 0x127   :  { %v379_v39 = vsel %vm378_vm11, %v375_v35, %v377_v38  ;;  %v4888_v38 = vld [vmem:[%s8370_s5] ss:$0 sm:$0xff]  ;;  %s8439_s5 = sld [smem:[#allocation46_spill]] }
 0x128   :  { %v382_v40 = vsel %vm380_vm12, %v381_v37, %v379_v39 }
 0x129   :  { %v383_v41 = vmax.f32 %v382_v40, 1e-08 }
 0x12b   :  { %5856 = vrcp.f32 %v383_v41 }
 0x135   :  { %v5857_v48 = vpop.eup %5856 }
 0x136   :  { %v393_v50 = vmul.f32 %v5857_v48, %v384_v42  ;;  %v394_v51 = vmul.f32 %v5857_v48, %v385_v43  ;;  %v395_v52 = vmul.f32 %v5857_v48, %v386_v44  ;;  %v396_v53 = vmul.f32 %v5857_v48, %v387_v45 }
 0x137   :  { %v397_v54 = vmul.f32 %v5857_v48, %v388_v46  ;;  %v398_v55 = vmul.f32 %v5857_v48, %v389_v47  ;;  %v399_v13 = vmul.f32 %v5857_v48, %v390_v4  ;;  %v400_v56 = vmul.f32 %v5857_v48, %v391_v5 }
 0x138   :  { %v669_v7 = vpack.c.bf16 %v394_v51, %v393_v50  ;;  %v670_v8 = vpack.c.bf16 %v396_v53, %v395_v52 }
 0x139   :  { %v671_v9 = vpack.c.bf16 %v398_v55, %v397_v54  ;;  %v672_v57 = vpack.c.bf16 %v400_v56, %v399_v13 }
 0x13a   :  { %5278 = vmatprep.mubr.msk.bf16.mxu0 %vm320_vm1, %v669_v7 }
 0x13b   :  { %5279 = vmatmul.mubr.msk.bf16.vlgmr.msra.gmra.mrb[0].mxu0 %vm320_vm1, %v670_v8 }
 0x13c   :  { %5282 = vmatprep.mubr.msk.bf16.mxu0 %vm320_vm1, %v671_v9  ;;  %5297 = vmatpush3.bf16.msra.mxu0 %v1126_v10  ;;  %v1084_v10 = vpack.c.bf16 %v1072_v2, %v1071_v1 }
 0x143   :  { %5283 = vmatmul.mubr.msk.bf16.gmra.mrb[4].mxu0 %vm320_vm1, %v672_v57  ;;  %vm1819_vm1 = vcmask 523264  }
 0x144   :  { %5298 = vmatprep.mubr.msk.bf16.mxu0 %vm1097_vm13, %v1081_v58 }
 0x14b   :  { %5299 = vmatmul.mubr.msk.bf16.vlgmr.msra.gmra.mrb[8].mxu0 %vm1097_vm13, %v1082_v63 }
 0x14c   :  { %5302 = vmatprep.mubr.msk.bf16.mxu0 %vm1097_vm13, %v1083_v0 }
 0x153   :  { %5303 = vmatmul.mubr.msk.bf16.gmra.mrb[12].mxu0 %vm1097_vm13, %v1084_v10 }
 0x154   :  { %5306 = vmatprep.mubr.msk.bf16.mxu0 %vm1097_vm13, %v1085_v11 }
 0x15b   :  { %5307 = vmatmul.mubr.msk.bf16.gmra.mrb[16].mxu0 %vm1097_vm13, %v1086_v20 }
 0x15c   :  { %5310 = vmatprep.mubr.msk.bf16.mxu0 %vm1097_vm13, %v1087_v21 }
 0x163   :  { %5311 = vmatmul.mubr.msk.bf16.gmra.mrb[20].mxu0 %vm1097_vm13, %v1088_v24 }
 0x17e   :  { %v5817_v27 = vpop.permute.xlu0 %5816 }
 0x17f   :  { %v5818_v30 = vunpack.i.l.bf16 %v5817_v27  ;;  %v5819_v34 = vunpack.i.h.bf16 %v5817_v27 }
 0x181   :  { %v721_v35 = vmul.f32 %v5818_v30, %v4883_v31  ;;  %v722_v46 = vmul.f32 %v5819_v34, %v4883_v31 }
 0x182   :  { %v5822_v28 = vpop.permute.xlu0 %5821  ;;  %v5828_v19 = vpop.permute.xlu1 %5827 }
 0x183   :  { %v5823_v29 = vunpack.i.l.bf16 %v5822_v28  ;;  %v5824_v32 = vunpack.i.h.bf16 %v5822_v28  ;;  %v5829_v44 = vunpack.i.l.bf16 %v5828_v19  ;;  %v5830_v53 = vunpack.i.h.bf16 %v5828_v19 }
 0x185   :  { %v723_v33 = vmul.f32 %v5823_v29, %v4883_v31  ;;  %v724_v41 = vmul.f32 %v5824_v32, %v4883_v31  ;;  %v725_v7 = vmul.f32 %v5829_v44, %v4883_v31  ;;  %v726_v57 = vmul.f32 %v5830_v53, %v4883_v31 }
 0x186   :  { %v5833_v36 = vpop.permute.xlu1 %5832 }
 0x187   :  { %v5834_v42 = vunpack.i.l.bf16 %v5833_v36  ;;  %v5835_v51 = vunpack.i.h.bf16 %v5833_v36 }
 0x189   :  { %v727_v4 = vmul.f32 %v5834_v42, %v4883_v31  ;;  %v728_v13 = vmul.f32 %v5835_v51, %v4883_v31 }
 0x20e   :  { %v5280_v37 = vpop.f32.mrb[0].mxu0 }
 0x20f   :  { %v788_v39 = vadd.f32 %v5280_v37, %v723_v33  ;;  %v779_v40 = vpop.f32.mrb[1].mxu0 }
 0x210   :  { %v780_v43 = vadd.f32 %v779_v40, %v721_v35  ;;  %v5281_v45 = vpop.f32.mrb[2].mxu0 }
 0x211   :  { %v819_v47 = vadd.f32 %v4888_v38, %v788_v39  ;;  %v791_v48 = vadd.f32 %v5281_v45, %v724_v41  ;;  %v782_v50 = vpop.f32.mrb[3].mxu0 }
 0x212   :  { %v817_v52 = vadd.f32 %v4888_v38, %v780_v43  ;;  %v783_v54 = vadd.f32 %v782_v50, %v722_v46 }
 0x213   :  { %v820_v55 = vadd.f32 %v4888_v38, %v791_v48  ;;  %v827_v8 = vmax.f32 %v819_v47, 0.0 }
 0x214   :  { %v818_v5 = vadd.f32 %v4888_v38, %v783_v54  ;;  %v825_v56 = vmax.f32 %v817_v52, 0.0 }
 0x215   :  { %v828_v9 = vmax.f32 %v820_v55, 0.0 }
 0x216   :  { %v826_v14 = vmax.f32 %v818_v5, 0.0  ;;  %v5284_v15 = vpop.f32.mrb[4].mxu0 }
 0x217   :  { %v834_v58 = vpack.c.bf16 %v828_v9, %v827_v8  ;;  %v804_v59 = vadd.f32 %v5284_v15, %v727_v4  ;;  %v795_v60 = vpop.f32.mrb[5].mxu0 }
 0x218   :  { %v796_v61 = vadd.f32 %v795_v60, %v725_v7  ;;  %v5285_v62 = vpop.f32.mrb[6].mxu0  ;;  %v833_v63 = vpack.c.bf16 %v826_v14, %v825_v56 }
 0x219   :  { %v823_v0 = vadd.f32 %v4888_v38, %v804_v59  ;;  %v807_v1 = vadd.f32 %v5285_v62, %v728_v13  ;;  %v798_v2 = vpop.f32.mrb[7].mxu0 }
 0x21a   :  { %v821_v3 = vadd.f32 %v4888_v38, %v796_v61  ;;  %v799_v6 = vadd.f32 %v798_v2, %v726_v57  ;;  %5288 = vmatprep.mubr.msk.bf16.mxu1 %vm852_vm14, %v833_v63 }
 0x21b   :  { %v831_v10 = vmax.f32 %v823_v0, 0.0  ;;  %v824_v11 = vadd.f32 %v4888_v38, %v807_v1  ;;  %5289 = vmatmul.mubr.msk.bf16.vlgmr.msra.gmra.mrb[0].mxu1 %vm852_vm14, %v834_v58 }
 0x21c   :  { %v829_v12 = vmax.f32 %v821_v3, 0.0  ;;  %v822_v16 = vadd.f32 %v4888_v38, %v799_v6  ;;  %5315 = vmatpush3.bf16.msra.mxu1 %v5837_v26 }
 0x21d   :  { %v832_v18 = vmax.f32 %v824_v11, 0.0 }
 0x21e   :  { %v830_v20 = vmax.f32 %v822_v16, 0.0  ;;  %v5300_v21 = vpop.f32.mrb[8].mxu0 }
 0x21f   :  { %v836_v22 = vpack.c.bf16 %v832_v18, %v831_v10  ;;  %v1171_v23 = vadd.f32 %v5300_v21, %v6686_v17  ;;  %v1162_v24 = vpop.f32.mrb[9].mxu0 }
 0x220   :  { %v835_v25 = vpack.c.bf16 %v830_v20, %v829_v12  ;;  %v1163_v27 = vadd.f32 %v6686_v17, %v1162_v24  ;;  %v5301_v28 = vpop.f32.mrb[10].mxu0  ;;  %v4889_v12 = vld [vmem:[%s8372_s13] ss:$0 sm:$0xff]  ;;  %s8454_s13 = sld [smem:[#allocation51_spill]] }
 0x221   :  { %v1227_v19 = vmax.f32 %v1171_v23, 0.0  ;;  %v1174_v29 = vadd.f32 %v5301_v28, %v6686_v17  ;;  %v1165_v30 = vpop.f32.mrb[11].mxu0 }
 0x222   :  { %5292 = vmatprep.mubr.msk.bf16.mxu1 %vm852_vm14, %v835_v25  ;;  %v1225_v31 = vmax.f32 %v1163_v27, 0.0  ;;  %v1166_v26 = vadd.f32 %v6686_v17, %v1165_v30 }
 0x223   :  { %5293 = vmatmul.mubr.msk.bf16.gmra.mrb[4].mxu1 %vm852_vm14, %v836_v22  ;;  %v1228_v32 = vmax.f32 %v1174_v29, 0.0 }
 0x224   :  { %v1226_v33 = vmax.f32 %v1166_v26, 0.0 }
 0x225   :  { %v1242_v34 = vpack.c.bf16 %v1228_v32, %v1227_v19 }
 0x226   :  { %v1241_v35 = vpack.c.bf16 %v1226_v33, %v1225_v31  ;;  %v5304_v36 = vpop.f32.mrb[12].mxu0 }
 0x227   :  { %v1187_v37 = vadd.f32 %v5304_v36, %v6686_v17  ;;  %v1178_v38 = vpop.f32.mrb[13].mxu0 }
 0x228   :  { %v1179_v39 = vadd.f32 %v6686_v17, %v1178_v38  ;;  %v5305_v40 = vpop.f32.mrb[14].mxu0  ;;  %5316 = vmatprep.mubr.msk.bf16.mxu1 %vm852_vm14, %v1241_v35 }
 0x229   :  { %v1231_v41 = vmax.f32 %v1187_v37, 0.0  ;;  %v1190_v42 = vadd.f32 %v5305_v40, %v6686_v17  ;;  %v1181_v43 = vpop.f32.mrb[15].mxu0 }
 0x22a   :  { %v1229_v44 = vmax.f32 %v1179_v39, 0.0  ;;  %v1182_v45 = vadd.f32 %v6686_v17, %v1181_v43 }
 0x22b   :  { %v1232_v46 = vmax.f32 %v1190_v42, 0.0  ;;  %5317 = vmatmul.mubr.msk.bf16.vlgmr.msra.gmra.mrb[8].mxu1 %vm852_vm14, %v1242_v34 }
 0x22c   :  { %v1230_v47 = vmax.f32 %v1182_v45, 0.0 }
 0x22d   :  { %v1244_v48 = vpack.c.bf16 %v1232_v46, %v1231_v41 }
 0x22e   :  { %v1243_v50 = vpack.c.bf16 %v1230_v47, %v1229_v44  ;;  %v5308_v51 = vpop.f32.mrb[16].mxu0 }
 0x22f   :  { %v1203_v52 = vadd.f32 %v5308_v51, %v6686_v17  ;;  %v1194_v53 = vpop.f32.mrb[17].mxu0 }
 0x230   :  { %v1195_v54 = vadd.f32 %v6686_v17, %v1194_v53  ;;  %v5309_v55 = vpop.f32.mrb[18].mxu0  ;;  %5320 = vmatprep.mubr.msk.bf16.mxu1 %vm852_vm14, %v1243_v50 }
 0x231   :  { %v1235_v4 = vmax.f32 %v1203_v52, 0.0  ;;  %v1206_v5 = vadd.f32 %v5309_v55, %v6686_v17  ;;  %v1197_v7 = vpop.f32.mrb[19].mxu0 }
 0x232   :  { %v1233_v8 = vmax.f32 %v1195_v54, 0.0  ;;  %v1198_v9 = vadd.f32 %v6686_v17, %v1197_v7 }
 0x233   :  { %v1236_v13 = vmax.f32 %v1206_v5, 0.0  ;;  %5321 = vmatmul.mubr.msk.bf16.gmra.mrb[12].mxu1 %vm852_vm14, %v1244_v48  ;;  %v5838_v5 = vld [vmem:[%s8373_s29] sm:$0xff]   ;;  %s8456_s29 = sld [smem:[#allocation53_spill]] }
 0x234   :  { %v1234_v56 = vmax.f32 %v1198_v9, 0.0  ;;  %5332 = vmatprep.subr.bf16.mxu0 %v5838_v5 }
 0x235   :  { %v1246_v14 = vpack.c.bf16 %v1236_v13, %v1235_v4  ;;  %5333 = vmatpush3.bf16.msra.mxu0 %v5838_v5 }
 0x236   :  { %v1245_v15 = vpack.c.bf16 %v1234_v56, %v1233_v8  ;;  %v5312_v57 = vpop.f32.mrb[20].mxu0 }
 0x237   :  { %v1219_v58 = vadd.f32 %v5312_v57, %v6686_v17  ;;  %v1210_v59 = vpop.f32.mrb[21].mxu0 }
 0x238   :  { %v1211_v60 = vadd.f32 %v6686_v17, %v1210_v59  ;;  %v5313_v61 = vpop.f32.mrb[22].mxu0  ;;  %5324 = vmatprep.mubr.msk.bf16.mxu1 %vm852_vm14, %v1245_v15 }
 0x239   :  { %v1239_v62 = vmax.f32 %v1219_v58, 0.0  ;;  %v1222_v63 = vadd.f32 %v5313_v61, %v6686_v17  ;;  %v1213_v0 = vpop.f32.mrb[23].mxu0 }
 0x23a   :  { %v1237_v1 = vmax.f32 %v1211_v60, 0.0  ;;  %v1214_v2 = vadd.f32 %v6686_v17, %v1213_v0 }
 0x23b   :  { %v1240_v3 = vmax.f32 %v1222_v63, 0.0  ;;  %5325 = vmatmul.mubr.msk.bf16.gmra.mrb[16].mxu1 %vm852_vm14, %v1246_v14 }
 0x23c   :  { %v1238_v6 = vmax.f32 %v1214_v2, 0.0 }
 0x23d   :  { %v1248_v10 = vpack.c.bf16 %v1240_v3, %v1239_v62 }
 0x23e   :  { %v1247_v11 = vpack.c.bf16 %v1238_v6, %v1237_v1 }
 0x240   :  { %5328 = vmatprep.mubr.msk.bf16.mxu1 %vm852_vm14, %v1247_v11 }
 0x243   :  { %5329 = vmatmul.mubr.msk.bf16.gmra.mrb[20].mxu1 %vm852_vm14, %v1248_v10 }
 0x2ee   :  { %v5290_v16 = vpop.f32.mrb[0].mxu1 }
 0x2ef   :  { %v899_v18 = vpop.f32.mrb[1].mxu1  ;;  %v908_v23 = vadd.f32 %v5290_v16, %v4889_v12 }
 0x2f0   :  { %v900_v20 = vadd.f32 %v4889_v12, %v899_v18  ;;  %v5291_v21 = vpop.f32.mrb[2].mxu1 }
 0x2f1   :  { %v902_v22 = vpop.f32.mrb[3].mxu1  ;;  %v911_v27 = vadd.f32 %v5291_v21, %v4889_v12  ;;  %v936_v19 = vsel %vm852_vm14, %v908_v23, 0.0 }
 0x2f2   :  { %v903_v24 = vadd.f32 %v4889_v12, %v902_v22  ;;  %v930_v17 = vsel %vm852_vm14, %v900_v20, 0.0 }
 0x2f3   :  { %931 = vadd.xlane.f32.xlu0 %v930_v17  ;;  %v939_v35 = vsel %vm852_vm14, %v911_v27, 0.0 }
 0x2f4   :  { %v933_v25 = vsel %vm852_vm14, %v903_v24, 0.0 }
 0x2f5   :  { %934 = vadd.xlane.f32.xlu1 %v933_v25 }
 0x2f6   :  { %v5294_v28 = vpop.f32.mrb[4].mxu1 }
 0x2f7   :  { %v915_v29 = vpop.f32.mrb[5].mxu1  ;;  %937 = vadd.xlane.f32.xlu0 %v936_v19  ;;  %v6718_v32 = vadd.f32 %v5294_v28, %v4889_v12 }
 0x2f8   :  { %v916_v30 = vadd.f32 %v4889_v12, %v915_v29  ;;  %v5295_v31 = vpop.f32.mrb[6].mxu1 }
 0x2f9   :  { %v918_v26 = vpop.f32.mrb[7].mxu1  ;;  %v6724_v36 = vadd.f32 %v5295_v31, %v4889_v12  ;;  %v948_v37 = vsel %vm852_vm14, %v6718_v32, 0.0 }
 0x2fa   :  { %v6720_v33 = vadd.f32 %v4889_v12, %v918_v26  ;;  %v942_v34 = vsel %vm852_vm14, %v916_v30, 0.0 }
 0x2fb   :  { %943 = vadd.xlane.f32.xlu1 %v942_v34  ;;  %940 = vadd.xlane.f32.xlu0 %v939_v35  ;;  %v951_v39 = vsel %vm852_vm14, %v6724_v36, 0.0 }
 0x2fc   :  { %v945_v38 = vsel %vm852_vm14, %v6720_v33, 0.0 }
 0x2fe   :  { %v6732_v40 = vpop.f32.mrb[8].mxu1 }
 0x2ff   :  { %949 = vadd.xlane.f32.xlu1 %v948_v37  ;;  %946 = vadd.xlane.f32.xlu0 %v945_v38  ;;  %v1322_v41 = vpop.f32.mrb[9].mxu1 }
 0x300   :  { %v6734_v42 = vpop.f32.mrb[10].mxu1 }
 0x301   :  { %v6736_v43 = vpop.f32.mrb[11].mxu1 }
 0x303   :  { %952 = vadd.xlane.f32.xlu0 %v951_v39 }
 0x306   :  { %v6738_v44 = vpop.f32.mrb[12].mxu1 }
 0x307   :  { %v6740_v45 = vpop.f32.mrb[13].mxu1 }
 0x308   :  { %v6742_v46 = vpop.f32.mrb[14].mxu1 }
 0x309   :  { %v6744_v47 = vpop.f32.mrb[15].mxu1 }
 0x30e   :  { %v6746_v48 = vpop.f32.mrb[16].mxu1 }
 0x30f   :  { %v6748_v50 = vpop.f32.mrb[17].mxu1 }
 0x310   :  { %v6750_v51 = vpop.f32.mrb[18].mxu1 }
 0x311   :  { %v6752_v52 = vpop.f32.mrb[19].mxu1 }
 0x316   :  { %v6754_v53 = vpop.f32.mrb[20].mxu1 }
 0x317   :  { %v6756_v54 = vpop.f32.mrb[21].mxu1 }
 0x318   :  { %v6758_v55 = vpop.f32.mrb[22].mxu1 }
 0x319   :  { %v6760_v4 = vpop.f32.mrb[23].mxu1 }
 0x380   :  { %v932_v7 = vpop.xlane.xlu0 %931 }
 0x381   :  { %v955_v8 = vmul.f32 0.0625, %v932_v7 }
 0x382   :  { %v935_v9 = vpop.xlane.xlu1 %934 }
 0x383   :  { %v6763_v13 = vsub.f32 %v900_v20, %v955_v8  ;;  %v956_v56 = vmul.f32 0.0625, %v935_v9 }
 0x384   :  { %v938_v14 = vpop.xlane.xlu0 %937 }
 0x385   :  { %v6765_v15 = vsub.f32 %v903_v24, %v956_v56  ;;  %v957_v57 = vmul.f32 0.0625, %v938_v14  ;;  %v971_v58 = vmul.f32 %v6763_v13, %v6763_v13 }
 0x387   :  { %v6769_v59 = vsub.f32 %v908_v23, %v957_v57  ;;  %v979_v60 = vsel %vm852_vm14, %v971_v58, 0.0  ;;  %v972_v61 = vmul.f32 %v6765_v15, %v6765_v15  ;;  %v4906_v23 = vld [vmem:[%s8374_s3] ss:$0 sm:$0xff]  ;;  %s8457_s3 = sld [smem:[#allocation52_spill]] }
 0x388   :  { %v944_v62 = vpop.xlane.xlu1 %943  ;;  %980 = vadd.xlane.f32.xlu1 %v979_v60  ;;  %v941_v63 = vpop.xlane.xlu0 %940  ;;  %v6795_v29 = vadd.f32 %v4906_v23, %v1322_v41  ;;  %v6807_v34 = vadd.f32 %v6732_v40, %v4906_v23  ;;  %v6810_v35 = vadd.f32 %v4906_v23, %v6736_v43  ;;  %v6818_v39 = vadd.f32 %v6734_v42, %v4906_v23 }
 0x389   :  { %v959_v0 = vmul.f32 0.0625, %v944_v62  ;;  %v958_v1 = vmul.f32 0.0625, %v941_v63  ;;  %v982_v2 = vsel %vm852_vm14, %v972_v61, 0.0  ;;  %v973_v3 = vmul.f32 %v6769_v59, %v6769_v59  ;;  %v5839_v62 = vld [vmem:[%s8375_s8] sm:$0xff]   ;;  %s8458_s8 = sld [smem:[#allocation54_spill]] }
 0x38a   :  { %983 = vadd.xlane.f32.xlu0 %v982_v2  ;;  %v1385_v37 = vsel %vm852_vm14, %v6795_v29, 0.0  ;;  %v6821_v41 = vadd.f32 %v4906_v23, %v6740_v45  ;;  %v1391_v40 = vsel %vm852_vm14, %v6807_v34, 0.0  ;;  %v1388_v43 = vsel %vm852_vm14, %v6810_v35, 0.0  ;;  %5342 = vmatprep.subr.bf16.mxu1 %v5839_v62  ;;  %v430_v2 = vld [vmem:[%s8376_s14 + $0x18] sm:$0xff] }
 0x38b   :  { %v6777_v6 = vsub.f32 %v916_v30, %v959_v0  ;;  %v6779_v10 = vsub.f32 %v911_v27, %v958_v1  ;;  %v985_v11 = vsel %vm852_vm14, %v973_v3, 0.0  ;;  %v6828_v5 = vadd.f32 %v6738_v44, %v4906_v23  ;;  %5343 = vmatpush3.bf16.msra.mxu1 %v5839_v62  ;;  %v429_v1 = vld [vmem:[%s8376_s14 + $0x10] sm:$0xff]  ;;  %v428_v3 = vld [vmem:[%s8376_s14 + $0x8] sm:$0xff] }
 0x38c   :  { %v950_v12 = vpop.xlane.xlu1 %949  ;;  %986 = vadd.xlane.f32.xlu1 %v985_v11  ;;  %v947_v16 = vpop.xlane.xlu0 %946  ;;  %v6831_v7 = vadd.f32 %v4906_v23, %v6744_v47  ;;  %v1397_v42 = vsel %vm852_vm14, %v6821_v41, 0.0  ;;  %v1394_v45 = vsel %vm852_vm14, %v6818_v39, 0.0  ;;  %v6838_v8 = vadd.f32 %v6742_v46, %v4906_v23  ;;  %v431_v11 = vld [vmem:[%s8376_s14 + $0x20] sm:$0xff] }
 0x38d   :  { %v961_v18 = vmul.f32 0.0625, %v950_v12  ;;  %v960_v20 = vmul.f32 0.0625, %v947_v16  ;;  %v975_v21 = vmul.f32 %v6777_v6, %v6777_v6  ;;  %v974_v22 = vmul.f32 %v6779_v10, %v6779_v10  ;;  %v432_v12 = vld [vmem:[%s8376_s14 + $0x28] sm:$0xff]  ;;  %v433_v16 = vld [vmem:[%s8376_s14 + $0x30] sm:$0xff] }
 0x38e   :  { %v6841_v9 = vadd.f32 %v4906_v23, %v6748_v50  ;;  %v1403_v44 = vsel %vm852_vm14, %v6828_v5, 0.0  ;;  %v1400_v47 = vsel %vm852_vm14, %v6831_v7, 0.0  ;;  %v6848_v56 = vadd.f32 %v6746_v48, %v4906_v23 }
 0x38f   :  { %v6788_v24 = vsub.f32 %v6718_v32, %v961_v18  ;;  %v6791_v17 = vsub.f32 %v6720_v33, %v960_v20  ;;  %v991_v25 = vsel %vm852_vm14, %v975_v21, 0.0  ;;  %v988_v27 = vsel %vm852_vm14, %v974_v22, 0.0  ;;  %v436_v18 = vld [vmem:[%s8376_s14 + $0x48] sm:$0xff]  ;;  %v434_v20 = vld [vmem:[%s8376_s14 + $0x38] sm:$0xff]  ;;  %v435_v22 = vld [vmem:[%s8376_s14 + $0x40] sm:$0xff] }
 0x390   :  { %992 = vadd.xlane.f32.xlu1 %v991_v25  ;;  %989 = vadd.xlane.f32.xlu0 %v988_v27  ;;  %v953_v28 = vpop.xlane.xlu0 %952  ;;  %v6851_v14 = vadd.f32 %v4906_v23, %v6752_v52  ;;  %v1409_v46 = vsel %vm852_vm14, %v6841_v9, 0.0  ;;  %v1406_v50 = vsel %vm852_vm14, %v6838_v8, 0.0  ;;  %v6858_v57 = vadd.f32 %v6750_v51, %v4906_v23  ;;  %v440_v21 = vld [vmem:[%s8376_s14 + $0x68] sm:$0xff]  ;;  %v438_v25 = vld [vmem:[%s8376_s14 + $0x58] sm:$0xff]  ;;  %v439_v27 = vld [vmem:[%s8376_s14 + $0x60] sm:$0xff] }
 0x391   :  { %v962_v19 = vmul.f32 0.0625, %v953_v28  ;;  %v977_v30 = vmul.f32 %v6788_v24, %v6788_v24  ;;  %v976_v31 = vmul.f32 %v6791_v17, %v6791_v17  ;;  %v6861_v58 = vadd.f32 %v4906_v23, %v6756_v54  ;;  %v441_v28 = vld [vmem:[%s8376_s14 + $0x70] sm:$0xff] }
 0x392   :  { %v1415_v48 = vsel %vm852_vm14, %v6848_v56, 0.0  ;;  %v1412_v52 = vsel %vm852_vm14, %v6851_v14, 0.0  ;;  %v6868_v60 = vadd.f32 %v6754_v53, %v4906_v23  ;;  %v6871_v61 = vadd.f32 %v4906_v23, %v6760_v4 }
 0x393   :  { %v6802_v26 = vsub.f32 %v6724_v36, %v962_v19  ;;  %v997_v32 = vsel %vm852_vm14, %v977_v30, 0.0  ;;  %v994_v33 = vsel %vm852_vm14, %v976_v31, 0.0  ;;  %v1421_v51 = vsel %vm852_vm14, %v6861_v58, 0.0  ;;  %v442_v19 = vld [vmem:[%s8376_s14 + $0x78] sm:$0xff] }
 0x394   :  { %998 = vadd.xlane.f32.xlu1 %v997_v32  ;;  %995 = vadd.xlane.f32.xlu0 %v994_v33  ;;  %v1418_v54 = vsel %vm852_vm14, %v6858_v57, 0.0  ;;  %v6879_v63 = vadd.f32 %v6758_v55, %v4906_v23  ;;  %v1427_v53 = vsel %vm852_vm14, %v6868_v60, 0.0  ;;  %v1424_v4 = vsel %vm852_vm14, %v6871_v61, 0.0  ;;  %v427_v55 = vld [vmem:[%s8376_s14] sm:$0xff]  ;;  %v437_v23 = vld [vmem:[%s8376_s14 + $0x50] sm:$0xff]  ;;  %s8459_s14 = sld [smem:[#allocation55_spill]] }
 0x395   :  { %v978_v38 = vmul.f32 %v6802_v26, %v6802_v26 }
 0x396   :  { %v1430_v0 = vsel %vm852_vm14, %v6879_v63, 0.0 }
 0x397   :  { %v1000_v36 = vsel %vm852_vm14, %v978_v38, 0.0 }
 0x398   :  { %1386 = vadd.xlane.f32.xlu1 %v1385_v37  ;;  %1001 = vadd.xlane.f32.xlu0 %v1000_v36 }
 0x39c   :  { %1392 = vadd.xlane.f32.xlu1 %v1391_v40  ;;  %1389 = vadd.xlane.f32.xlu0 %v1388_v43 }
 0x3a0   :  { %1398 = vadd.xlane.f32.xlu1 %v1397_v42  ;;  %1395 = vadd.xlane.f32.xlu0 %v1394_v45 }
 0x3a4   :  { %1404 = vadd.xlane.f32.xlu1 %v1403_v44  ;;  %1401 = vadd.xlane.f32.xlu0 %v1400_v47 }
 0x3a8   :  { %1410 = vadd.xlane.f32.xlu1 %v1409_v46  ;;  %1407 = vadd.xlane.f32.xlu0 %v1406_v50 }
 0x3ac   :  { %1416 = vadd.xlane.f32.xlu1 %v1415_v48  ;;  %1413 = vadd.xlane.f32.xlu0 %v1412_v52 }
 0x3b0   :  { %1422 = vadd.xlane.f32.xlu1 %v1421_v51  ;;  %1419 = vadd.xlane.f32.xlu0 %v1418_v54 }
 0x3b4   :  { %1428 = vadd.xlane.f32.xlu1 %v1427_v53  ;;  %1425 = vadd.xlane.f32.xlu0 %v1424_v4  ;;  %v6904_v53 = vld [vmem:[%s8377_s19] ss:$0 sm:$0xff] }
 0x3b8   :  { %1431 = vadd.xlane.f32.xlu0 %v1430_v0 }
 0x3c5   :  { %444 = vperm.xlu1 %5825, %v427_v55  }
 0x3c9   :  { %450 = vperm.xlu1 %5825, %v429_v1  }
 0x3cd   :  { %453 = vperm.xlu1 %5825, %v430_v2  }
 0x3ce   :  { %447 = vperm.xlu0 %5814, %v428_v3  }
 0x3d1   :  { %456 = vperm.xlu1 %5825, %v431_v11  }
 0x3d2   :  { %459 = vperm.xlu0 %5814, %v432_v12  }
 0x3d5   :  { %462 = vperm.xlu1 %5825, %v433_v16  }
 0x3d6   :  { %471 = vperm.xlu0 %5814, %v436_v18  }
 0x3d9   :  { %465 = vperm.xlu1 %5825, %v434_v20  }
 0x3da   :  { %483 = vperm.xlu0 %5814, %v440_v21   ;;  %v6910_v21 = vld [vmem:[%s8378_s6] ss:$0 sm:$0xff] }
 0x3dd   :  { %468 = vperm.xlu1 %5825, %v435_v22  }
 0x3e1   :  { %474 = vperm.xlu1 %5825, %v437_v23  }
 0x3e5   :  { %477 = vperm.xlu1 %5825, %v438_v25  }
 0x3e9   :  { %480 = vperm.xlu1 %5825, %v439_v27  }
 0x3ed   :  { %486 = vperm.xlu1 %5825, %v441_v28  }
 0x3f1   :  { %489 = vperm.xlu1 %5825, %v442_v19  }
 0x415   :  { %v981_v30 = vpop.xlane.xlu1 %980 }
 0x416   :  { %v1003_v31 = vmul.f32 0.0625, %v981_v30 }
 0x417   :  { %v984_v32 = vpop.xlane.xlu0 %983 }
 0x418   :  { %v1011_v33 = vadd.f32 1e-05, %v1003_v31  ;;  %v1004_v37 = vmul.f32 0.0625, %v984_v32 }
 0x419   :  { %v987_v38 = vpop.xlane.xlu1 %986 }
 0x41a   :  { %5858 = vrsqrt.f32 %v1011_v33  ;;  %v1012_v36 = vadd.f32 1e-05, %v1004_v37  ;;  %v1005_v40 = vmul.f32 0.0625, %v987_v38 }
 0x41c   :  { %5860 = vrsqrt.f32 %v1012_v36  ;;  %v1013_v43 = vadd.f32 1e-05, %v1005_v40 }
 0x41d   :  { %v993_v42 = vpop.xlane.xlu1 %992  ;;  %v990_v45 = vpop.xlane.xlu0 %989 }
 0x41e   :  { %5862 = vrsqrt.f32 %v1013_v43  ;;  %v1007_v44 = vmul.f32 0.0625, %v993_v42  ;;  %v1006_v47 = vmul.f32 0.0625, %v990_v45 }
 0x420   :  { %v1015_v46 = vadd.f32 1e-05, %v1007_v44  ;;  %v1014_v50 = vadd.f32 1e-05, %v1006_v47 }
 0x421   :  { %v999_v48 = vpop.xlane.xlu1 %998  ;;  %v996_v52 = vpop.xlane.xlu0 %995 }
 0x422   :  { %5864 = vrsqrt.f32 %v1015_v46  ;;  %v1009_v51 = vmul.f32 0.0625, %v999_v48  ;;  %v1008_v54 = vmul.f32 0.0625, %v996_v52 }
 0x423   :  { %5866 = vrsqrt.f32 %v1014_v50 }
 0x424   :  { %v5859_v62 = vpop.eup %5858  ;;  %v1017_v4 = vadd.f32 1e-05, %v1009_v51  ;;  %v1016_v0 = vadd.f32 1e-05, %v1008_v54 }
 0x425   :  { %v1387_v55 = vpop.xlane.xlu1 %1386  ;;  %v1002_v1 = vpop.xlane.xlu0 %1001  ;;  %v1027_v2 = vmul.f32 %v5859_v62, %v6763_v13 }
 0x426   :  { %v5861_v3 = vpop.eup %5860  ;;  %5868 = vrsqrt.f32 %v1017_v4  ;;  %v1010_v11 = vmul.f32 0.0625, %v1002_v1  ;;  %v1433_v12 = vmul.f32 0.0625, %v1387_v55 }
 0x427   :  { %5870 = vrsqrt.f32 %v1016_v0  ;;  %v1028_v16 = vmul.f32 %v5861_v3, %v6765_v15  ;;  %v1042_v18 = vmul.f32 %v6904_v53, %v1027_v2 }
 0x428   :  { %v5863_v20 = vpop.eup %5862  ;;  %v1018_v22 = vadd.f32 1e-05, %v1010_v11  ;;  %v6915_v30 = vsub.f32 %v6795_v29, %v1433_v12 }
 0x429   :  { %v1029_v23 = vmul.f32 %v5863_v20, %v6769_v59  ;;  %v1393_v25 = vpop.xlane.xlu1 %1392  ;;  %v1390_v27 = vpop.xlane.xlu0 %1389  ;;  %v1043_v28 = vmul.f32 %v6904_v53, %v1028_v16  ;;  %v6918_v15 = vadd.f32 %v6910_v21, %v1042_v18 }
 0x42a   :  { %5872 = vrsqrt.f32 %v1018_v22  ;;  %v1435_v13 = vmul.f32 0.0625, %v1393_v25  ;;  %v1434_v19 = vmul.f32 0.0625, %v1390_v27  ;;  %v1465_v44 = vmul.f32 %v6915_v30, %v6915_v30 }
 0x42b   :  { %v6921_v31 = vadd.f32 %v6910_v21, %v1043_v28  ;;  %v1044_v38 = vmul.f32 %v6904_v53, %v1029_v23 }
 0x42c   :  { %v5865_v32 = vpop.eup %5864  ;;  %v6924_v33 = vsub.f32 %v6807_v34, %v1435_v13  ;;  %v6927_v59 = vsub.f32 %v6810_v35, %v1434_v19  ;;  %v1481_v3 = vsel %vm852_vm14, %v1465_v44, 0.0 }
 0x42d   :  { %v5867_v37 = vpop.eup %5866  ;;  %v1399_v36 = vpop.xlane.xlu1 %1398  ;;  %v6932_v29 = vpack.c.bf16 %v6921_v31, %v6918_v15  ;;  %v1031_v43 = vmul.f32 %v5865_v32, %v6777_v6  ;;  %v6952_v48 = vadd.f32 %v6910_v21, %v1044_v38 }
 0x42e   :  { %v1396_v40 = vpop.xlane.xlu0 %1395  ;;  %v1030_v42 = vmul.f32 %v5867_v37, %v6779_v10  ;;  %v1467_v34 = vmul.f32 %v6924_v33, %v6924_v33  ;;  %v1466_v35 = vmul.f32 %v6927_v59, %v6927_v59  ;;  %v1437_v2 = vmul.f32 0.0625, %v1399_v36 }
 0x42f   :  { %v1436_v45 = vmul.f32 0.0625, %v1396_v40  ;;  %5334 = vmatprep.mubr.msk.bf16.mxu0 %vm852_vm14, %v6932_v29  ;;  %5344 = vmatprep.mubr.msk.bf16.mxu1 %vm852_vm14, %v6932_v29  ;;  %v1046_v62 = vmul.f32 %v6904_v53, %v1031_v43 }
 0x430   :  { %v5869_v47 = vpop.eup %5868  ;;  %v1045_v6 = vmul.f32 %v6904_v53, %v1030_v42  ;;  %v1487_v46 = vsel %vm852_vm14, %v1467_v34, 0.0  ;;  %v1484_v51 = vsel %vm852_vm14, %v1466_v35, 0.0  ;;  %v6990_v28 = vsub.f32 %v6821_v41, %v1437_v2 }
 0x431   :  { %v6948_v10 = vsub.f32 %v6818_v39, %v1436_v45  ;;  %v5871_v50 = vpop.eup %5870  ;;  %v1405_v52 = vpop.xlane.xlu1 %1404  ;;  %1488 = vadd.xlane.f32.xlu0 %v1487_v46  ;;  %v1033_v4 = vmul.f32 %v5869_v47, %v6788_v24  ;;  %1485 = vadd.xlane.f32.xlu1 %v1484_v51 }
 0x432   :  { %v1402_v54 = vpop.xlane.xlu0 %1401  ;;  %v6958_v0 = vadd.f32 %v6910_v21, %v1045_v6  ;;  %v1439_v39 = vmul.f32 0.0625, %v1405_v52  ;;  %v1032_v1 = vmul.f32 %v5871_v50, %v6791_v17  ;;  %v1469_v45 = vmul.f32 %v6990_v28, %v6990_v28 }
 0x433   :  { %v1438_v55 = vmul.f32 0.0625, %v1402_v54  ;;  %v1468_v11 = vmul.f32 %v6948_v10, %v6948_v10  ;;  %v1048_v25 = vmul.f32 %v6904_v53, %v1033_v4  ;;  %v8306_v4 = vlaneseq }
 0x434   :  { %8379 = vst [vmem:[#allocation56_spill] sm:$0xff] %v6958_v0  ;;  %v5873_v12 = vpop.eup %5872  ;;  %v6965_v16 = vsub.f32 %v6828_v5, %v1439_v39  ;;  %v6972_v18 = vpack.c.bf16 %v6958_v0, %v6952_v48  ;;  %v1047_v20 = vmul.f32 %v6904_v53, %v1032_v1  ;;  %v6982_v5 = vadd.f32 %v6910_v21, %v1046_v62 }
 0x435   :  { %v6968_v24 = vsub.f32 %v6831_v7, %v1438_v55  ;;  %v1411_v17 = vpop.xlane.xlu1 %1410  ;;  %1482 = vadd.xlane.f32.xlu0 %v1481_v3  ;;  %v1034_v23 = vmul.f32 %v5873_v12, %v6802_v26  ;;  %v1490_v26 = vsel %vm852_vm14, %v1468_v11, 0.0  ;;  %v7002_v41 = vadd.f32 %v6910_v21, %v1048_v25 }
 0x436   :  { %v1408_v22 = vpop.xlane.xlu0 %1407  ;;  %5335 = vmatmul.mubr.msk.bf16.vlgmr.msra.gmra.mrb[24].mxu0 %vm852_vm14, %v6972_v18  ;;  %5345 = vmatmul.mubr.msk.bf16.vlgmr.msra.gmra.mrb[24].mxu1 %vm852_vm14, %v6972_v18  ;;  %8380 = vst [vmem:[#allocation57_spill] sm:$0xff] %v6982_v5  ;;  %v6985_v7 = vadd.f32 %v6910_v21, %v1047_v20  ;;  %v1471_v38 = vmul.f32 %v6965_v16, %v6965_v16  ;;  %v1441_v50 = vmul.f32 0.0625, %v1411_v17  ;;  %v7044_v2 = vand.u32 127, %v8306_v4 }
 0x437   :  { %v1470_v27 = vmul.f32 %v6968_v24, %v6968_v24  ;;  %v1049_v13 = vmul.f32 %v6904_v53, %v1034_v23  ;;  %v1440_v19 = vmul.f32 0.0625, %v1408_v22  ;;  %8382 = vst [vmem:[#allocation59_spill] sm:$0xff] %v7002_v41 }
 0x438   :  { %8381 = vst [vmem:[#allocation58_spill] sm:$0xff] %v6985_v7  ;;  %v6996_v32 = vpack.c.bf16 %v6985_v7, %v6982_v5  ;;  %v1499_v44 = vsel %vm852_vm14, %v1471_v38, 0.0  ;;  %v7038_v39 = vsub.f32 %v6841_v9, %v1441_v50  ;;  %v535_v50 = vld [vmem:[%s8384_s20 + $0x20] sm:$0xff] }
 0x439   :  { %v1496_v37 = vsel %vm852_vm14, %v1470_v27, 0.0  ;;  %v1417_v36 = vpop.xlane.xlu1 %1416  ;;  %1491 = vadd.xlane.f32.xlu0 %v1490_v26  ;;  %v7005_v43 = vadd.f32 %v6910_v21, %v1049_v13  ;;  %v7018_v34 = vsub.f32 %v6838_v8, %v1440_v19  ;;  %v1493_v8 = vsel %vm852_vm14, %v1469_v45, 0.0  ;;  %v531_v19 = vld [vmem:[%s8384_s20] sm:$0xff] }
 0x43a   :  { %1497 = vadd.xlane.f32.xlu1 %v1496_v37  ;;  %v1414_v40 = vpop.xlane.xlu0 %1413  ;;  %5338 = vmatprep.mubr.msk.bf16.mxu0 %vm852_vm14, %v6996_v32  ;;  %v1443_v35 = vmul.f32 0.0625, %v1417_v36  ;;  %v1473_v9 = vmul.f32 %v7038_v39, %v7038_v39 }
 0x43b   :  { %8383 = vst [vmem:[#allocation60_spill] sm:$0xff] %v7005_v43  ;;  %5348 = vmatprep.mubr.msk.bf16.mxu1 %vm852_vm14, %v6996_v32  ;;  %v1442_v53 = vmul.f32 0.0625, %v1414_v40  ;;  %v7013_v42 = vpack.c.bf16 %v7005_v43, %v7002_v41  ;;  %v1472_v51 = vmul.f32 %v7018_v34, %v7018_v34 }
 0x43c   :  { %v1505_v25 = vsel %vm852_vm14, %v1473_v9, 0.0  ;;  %v540_v9 = vld [vmem:[%s8384_s20 + $0x48] sm:$0xff] }
 0x43d   :  { %v7021_v21 = vsub.f32 %v6851_v14, %v1442_v53  ;;  %v1423_v47 = vpop.xlane.xlu1 %1422  ;;  %1500 = vadd.xlane.f32.xlu0 %v1499_v44  ;;  %v7032_v14 = vsub.f32 %v6848_v56, %v1443_v35  ;;  %v1502_v1 = vsel %vm852_vm14, %v1472_v51, 0.0  ;;  %v537_v51 = vld [vmem:[%s8384_s20 + $0x30] sm:$0xff] }
 0x43e   :  { %v1420_v6 = vpop.xlane.xlu0 %1419  ;;  %5339 = vmatmul.mubr.msk.bf16.gmra.mrb[28].mxu0 %vm852_vm14, %v7013_v42  ;;  %5349 = vmatmul.mubr.msk.bf16.gmra.mrb[28].mxu1 %vm852_vm14, %v7013_v42  ;;  %v1445_v22 = vmul.f32 0.0625, %v1423_v47 }
 0x43f   :  { %v1474_v46 = vmul.f32 %v7021_v21, %v7021_v21  ;;  %v1444_v55 = vmul.f32 0.0625, %v1420_v6  ;;  %v1475_v56 = vmul.f32 %v7032_v14, %v7032_v14 }
 0x440   :  { %v7061_v26 = vsub.f32 %v6861_v58, %v1445_v22  ;;  %v533_v58 = vld [vmem:[%s8384_s20 + $0x10] sm:$0xff]  ;;  %v546_v22 = vld [vmem:[%s8384_s20 + $0x78] sm:$0xff] }
 0x441   :  { %v1508_v52 = vsel %vm852_vm14, %v1474_v46, 0.0  ;;  %1494 = vadd.xlane.f32.xlu0 %v1493_v8  ;;  %v1429_v54 = vpop.xlane.xlu1 %1428  ;;  %v7047_v3 = vsub.f32 %v6858_v57, %v1444_v55  ;;  %v1511_v12 = vsel %vm852_vm14, %v1475_v56, 0.0  ;;  %v532_v46 = vld [vmem:[%s8384_s20 + $0x8] sm:$0xff]  ;;  %v543_v55 = vld [vmem:[%s8384_s20 + $0x60] sm:$0xff]  ;;  %v545_v56 = vld [vmem:[%s8384_s20 + $0x70] sm:$0xff] }
 0x442   :  { %1509 = vadd.xlane.f32.xlu1 %v1508_v52  ;;  %v1426_v62 = vpop.xlane.xlu0 %1425  ;;  %v1447_v11 = vmul.f32 0.0625, %v1429_v54  ;;  %v1477_v35 = vmul.f32 %v7061_v26, %v7061_v26 }
 0x443   :  { %v1476_v57 = vmul.f32 %v7047_v3, %v7047_v3 }
 0x444   :  { %v7053_v23 = vsub.f32 %v6868_v60, %v1447_v11  ;;  %v1517_v44 = vsel %vm852_vm14, %v1477_v35, 0.0  ;;  %v536_v11 = vld [vmem:[%s8384_s20 + $0x28] sm:$0xff] }
 0x445   :  { %1503 = vadd.xlane.f32.xlu0 %v1502_v1  ;;  %v445_v20 = vpop.permute.xlu1 %444  ;;  %v1514_v36 = vsel %vm852_vm14, %v1476_v57, 0.0  ;;  %v534_v1 = vld [vmem:[%s8384_s20 + $0x18] sm:$0xff] }
 0x446   :  { %v1432_v17 = vpop.xlane.xlu0 %1431  ;;  %vm491_vm15 = vcmp.eq.s32.totalorder %v7044_v2, %v445_v20  ;;  %v1479_v40 = vmul.f32 %v7053_v23, %v7053_v23  ;;  %v542_v20 = vld [vmem:[%s8384_s20 + $0x58] sm:$0xff] }
 0x447   :  { %v507_v13 = vsel %vm491_vm15, 1.0, %v8307_v49  ;;  %v1448_v37 = vmul.f32 0.0625, %v1432_v17  ;;  %v544_v17 = vld [vmem:[%s8384_s20 + $0x68] sm:$0xff] }
 0x448   :  { %v1523_v45 = vsel %vm852_vm14, %v1479_v40, 0.0 }
 0x449   :  { %1512 = vadd.xlane.f32.xlu0 %v1511_v12  ;;  %v7075_v53 = vsub.f32 %v6879_v63, %v1448_v37  ;;  %v1446_v63 = vmul.f32 0.0625, %v1426_v62  ;;  %v539_v62 = vld [vmem:[%s8384_s20 + $0x40] sm:$0xff]  ;;  %v538_v12 = vld [vmem:[%s8384_s20 + $0x38] sm:$0xff] }
 0x44b   :  { %v1480_v47 = vmul.f32 %v7075_v53, %v7075_v53  ;;  %v7086_v8 = vsub.f32 %v6871_v61, %v1446_v63  ;;  %v541_v61 = vld [vmem:[%s8384_s20 + $0x50] sm:$0xff] }
 0x44d   :  { %1506 = vadd.xlane.f32.xlu0 %v1505_v25  ;;  %v448_v27 = vpop.permute.xlu0 %447  ;;  %v1526_v6 = vsel %vm852_vm14, %v1480_v47, 0.0  ;;  %v1478_v52 = vmul.f32 %v7086_v8, %v7086_v8  ;;  %v7104_v25 = vpop.permute.xlu1 %450  ;;  %v5841_v47 = vld [vmem:[%s8386_s30] sm:$0xff]  }
 0x44e   :  { %vm492_vm0 = vcmp.eq.s32.totalorder %v7044_v2, %v448_v27  ;;  %5418 = vmatprep.subr.bf16.mxu1 %v5841_v47  ;;  %vm493_vm5 = vcmp.eq.s32.totalorder %v7044_v2, %v7104_v25 }
 0x44f   :  { %v508_v60 = vsel %vm492_vm0, 1.0, %v8307_v49  ;;  %v1520_v54 = vsel %vm852_vm14, %v1478_v52, 0.0  ;;  %5419 = vmatpush3.bf16.msra.mxu1 %v5841_v47 }
 0x450   :  { %v7066_v38 = vpack.c.bf16 %v508_v60, %v507_v13 }
 0x451   :  { %1515 = vadd.xlane.f32.xlu0 %v1514_v36  ;;  %v7106_v57 = vpop.permute.xlu1 %453  ;;  %v7108_v27 = vpop.permute.xlu0 %459 }
 0x452   :  { %8385 = vst [vmem:[#allocation61_spill] sm:$0xff] %v7066_v38  ;;  %5360 = vmatprep.mubr.msk.bf16.mxu0 %vm1819_vm1, %v7066_v38  ;;  %vm494_vm2 = vcmp.eq.s32.totalorder %v7044_v2, %v7106_v57  ;;  %vm496_vm4 = vcmp.eq.s32.totalorder %v7044_v2, %v7108_v27 }
 0x453   :  { %548 = vperm.xlu1 %5825, %v531_v19  }
 0x455   :  { %1524 = vadd.xlane.f32.xlu0 %v1523_v45  ;;  %v7110_v13 = vpop.permute.xlu1 %456  ;;  %v7112_v60 = vpop.permute.xlu0 %471 }
 0x456   :  { %vm495_vm3 = vcmp.eq.s32.totalorder %v7044_v2, %v7110_v13  ;;  %vm500_vm9 = vcmp.eq.s32.totalorder %v7044_v2, %v7112_v60 }
 0x457   :  { %554 = vperm.xlu1 %5825, %v533_v58  }
 0x459   :  { %1518 = vadd.xlane.f32.xlu0 %v1517_v44  ;;  %v7114_v19 = vpop.permute.xlu1 %462  ;;  %v7116_v37 = vpop.permute.xlu0 %483 }
 0x45a   :  { %vm497_vm8 = vcmp.eq.s32.totalorder %v7044_v2, %v7114_v19  ;;  %vm504_vm13 = vcmp.eq.s32.totalorder %v7044_v2, %v7116_v37  ;;  %v7217_v37 = vld [vmem:[%s8391_s22] ss:$0 sm:$0xff] }
 0x45d   :  { %1527 = vadd.xlane.f32.xlu0 %v1526_v6  ;;  %v7118_v36 = vpop.permute.xlu1 %465 }
 0x45e   :  { %vm498_vm6 = vcmp.eq.s32.totalorder %v7044_v2, %v7118_v36 }
 0x461   :  { %v7122_v58 = vpop.permute.xlu1 %468 }
 0x462   :  { %vm499_vm7 = vcmp.eq.s32.totalorder %v7044_v2, %v7122_v58 }
 0x465   :  { %v7124_v35 = vpop.permute.xlu1 %474 }
 0x466   :  { %vm501_vm12 = vcmp.eq.s32.totalorder %v7044_v2, %v7124_v35 }
 0x469   :  { %v7127_v6 = vpop.permute.xlu1 %477 }
 0x46a   :  { %vm502_vm10 = vcmp.eq.s32.totalorder %v7044_v2, %v7127_v6 }
 0x473   :  { %551 = vperm.xlu0 %5814, %v532_v46   ;;  %v7131_v46 = vpop.permute.xlu1 %480 }
 0x474   :  { %vm503_vm11 = vcmp.eq.s32.totalorder %v7044_v2, %v7131_v46 }
 0x477   :  { %560 = vperm.xlu0 %5814, %v535_v50   ;;  %v7133_v52 = vpop.permute.xlu1 %486 }
 0x478   :  { %vm505_vm0 = vcmp.eq.s32.totalorder %v7044_v2, %v7133_v52 }
 0x47b   :  { %1521 = vadd.xlane.f32.xlu1 %v1520_v54  ;;  %566 = vperm.xlu0 %5814, %v537_v51  }
 0x47f   :  { %572 = vperm.xlu0 %5814, %v539_v62  }
 0x483   :  { %578 = vperm.xlu0 %5814, %v541_v61  }
 0x487   :  { %584 = vperm.xlu0 %5814, %v543_v55  }
 0x48b   :  { %590 = vperm.xlu0 %5814, %v545_v56  }
 0x48c   :  { %557 = vperm.xlu1 %5825, %v534_v1  }
 0x490   :  { %563 = vperm.xlu1 %5825, %v536_v11   ;;  %v7137_v11 = vpop.permute.xlu1 %489 }
 0x491   :  { %vm506_vm15 = vcmp.eq.s32.totalorder %v7044_v2, %v7137_v11 }
 0x494   :  { %569 = vperm.xlu1 %5825, %v538_v12  }
 0x498   :  { %575 = vperm.xlu1 %5825, %v540_v9  }
 0x49c   :  { %581 = vperm.xlu1 %5825, %v542_v20  }
 0x4a0   :  { %587 = vperm.xlu1 %5825, %v544_v17  }
 0x4a4   :  { %593 = vperm.xlu1 %5825, %v546_v22  }
 0x4be   :  { %v7120_v40 = vpop.xlane.xlu0 %1488  ;;  %v1486_v4 = vpop.xlane.xlu1 %1485 }
 0x4c2   :  { %v1483_v45 = vpop.xlane.xlu0 %1482 }
 0x4c6   :  { %v1492_v44 = vpop.xlane.xlu0 %1491 }
 0x4ca   :  { %v7129_v63 = vpop.xlane.xlu0 %1500 }
 0x4ce   :  { %v1495_v50 = vpop.xlane.xlu0 %1494 }
 0x4cf   :  { %v1533_v25 = vmul.f32 0.0625, %v1495_v50 }
 0x4d1   :  { %v1549_v36 = vadd.f32 1e-05, %v1533_v25 }
 0x4d2   :  { %v7135_v51 = vpop.xlane.xlu0 %1503 }
 0x4d6   :  { %v7143_v49 = vpop.xlane.xlu0 %1512 }
 0x509   :  { %v5336_v54 = vpop.f32.mrb[24].mxu0  ;;  %v5346_v62 = vpop.f32.mrb[24].mxu1 }
 0x50a   :  { %v1705_v61 = vpop.f32.mrb[25].mxu0  ;;  %v1782_v55 = vpop.f32.mrb[25].mxu1 }
 0x50b   :  { %v5337_v1 = vpop.f32.mrb[26].mxu0  ;;  %v5347_v56 = vpop.f32.mrb[26].mxu1 }
 0x50c   :  { %v1737_v12 = vpack.c.bf16 %v5337_v1, %v5336_v54  ;;  %v7139_v9 = vpack.c.bf16 %v5347_v56, %v5346_v62  ;;  %v1708_v20 = vpop.f32.mrb[27].mxu0  ;;  %v1785_v22 = vpop.f32.mrb[27].mxu1  ;;  %v1529_v1 = vmul.f32 0.0625, %v1483_v45 }
 0x50d   :  { %v1736_v17 = vpack.c.bf16 %v1708_v20, %v1705_v61  ;;  %v7141_v47 = vpack.c.bf16 %v1785_v22, %v1782_v55  ;;  %v1498_v20 = vpop.xlane.xlu1 %1497  ;;  %v1530_v22 = vmul.f32 0.0625, %v1486_v4 }
 0x50f   :  { %5352 = vmatprep.subr.bf16.mxu0 %v1736_v17 }
 0x510   :  { %5353 = vmatpush3.bf16.msra.mxu0 %v1736_v17 }
 0x511   :  { %v5340_v38 = vpop.f32.mrb[28].mxu0  ;;  %5354 = vmatprep.subr.bf16.mxu0 %v1737_v12  ;;  %v5350_v43 = vpop.f32.mrb[28].mxu1 }
 0x512   :  { %v1721_v41 = vpop.f32.mrb[29].mxu0  ;;  %v1798_v7 = vpop.f32.mrb[29].mxu1 }
 0x513   :  { %v5341_v5 = vpop.f32.mrb[30].mxu0  ;;  %v5351_v54 = vpop.f32.mrb[30].mxu1 }
 0x514   :  { %v1739_v0 = vpack.c.bf16 %v5341_v5, %v5340_v38  ;;  %v1724_v62 = vpop.f32.mrb[31].mxu0  ;;  %5355 = vmatpush3.bf16.msra.mxu0 %v1737_v12  ;;  %v7145_v61 = vpack.c.bf16 %v5351_v54, %v5350_v43  ;;  %v1801_v56 = vpop.f32.mrb[31].mxu1  ;;  %v1545_v5 = vadd.f32 1e-05, %v1529_v1  ;;  %v8388_v43 = vmov 0.0  }
 0x515   :  { %v1738_v55 = vpack.c.bf16 %v1724_v62, %v1721_v41  ;;  %v7147_v17 = vpack.c.bf16 %v1801_v56, %v1798_v7  ;;  %v1507_v41 = vpop.xlane.xlu0 %1506  ;;  %v5840_v7 = vld [vmem:[%s8387_s18] sm:$0xff]   ;;  %v510_v38 = vsel %vm494_vm2, 1.0, %v8388_v43  ;;  %v1510_v45 = vpop.xlane.xlu1 %1509  ;;  %v511_v4 = vsel %vm495_vm3, 1.0, %v8388_v43 }
 0x516   :  { %v512_v57 = vsel %vm496_vm4, 1.0, %v8388_v43  ;;  %v1546_v12 = vadd.f32 1e-05, %v1530_v22  ;;  %v509_v13 = vsel %vm493_vm5, 1.0, %v8388_v43  ;;  %v1532_v54 = vmul.f32 0.0625, %v1492_v44 }
 0x517   :  { %5356 = vmatprep.subr.bf16.mxu0 %v1738_v55  ;;  %v7162_v27 = vpack.c.bf16 %v510_v38, %v509_v13  ;;  %5874 = vrsqrt.f32 %v1545_v5  ;;  %v7164_v62 = vpack.c.bf16 %v512_v57, %v511_v4  ;;  %v1531_v1 = vmul.f32 0.0625, %v7120_v40 }
 0x518   :  { %5357 = vmatpush3.bf16.msra.mxu0 %v1738_v55  ;;  %5876 = vrsqrt.f32 %v1546_v12  ;;  %v1534_v55 = vmul.f32 0.0625, %v1498_v20  ;;  %v514_v40 = vsel %vm498_vm6, 1.0, %v8388_v43  ;;  %v515_v58 = vsel %vm499_vm7, 1.0, %v8388_v43 }
 0x519   :  { %5358 = vmatprep.subr.bf16.mxu0 %v1739_v0  ;;  %v1516_v56 = vpop.xlane.xlu0 %1515  ;;  %v7173_v44 = vpop.permute.xlu1 %548  ;;  %v1547_v50 = vadd.f32 1e-05, %v1531_v1  ;;  %v513_v22 = vsel %vm497_vm8, 1.0, %v8388_v43  ;;  %v1536_v5 = vmul.f32 0.0625, %v7135_v51  ;;  %v1537_v38 = vmul.f32 0.0625, %v1507_v41 }
 0x51a   :  { %v1550_v20 = vadd.f32 1e-05, %v1534_v55  ;;  %v7187_v19 = vpack.c.bf16 %v514_v40, %v513_v22  ;;  %v1535_v57 = vmul.f32 0.0625, %v7129_v63  ;;  %v1538_v51 = vmul.f32 0.0625, %v1510_v45 }
 0x51b   :  { %v1552_v41 = vadd.f32 1e-05, %v1536_v5  ;;  %v1553_v63 = vadd.f32 1e-05, %v1537_v38  ;;  %v518_v6 = vsel %vm502_vm10, 1.0, %v8388_v43  ;;  %v519_v46 = vsel %vm503_vm11, 1.0, %v8388_v43 }
 0x51c   :  { %5359 = vmatpush3.bf16.msra.mxu0 %v1739_v0  ;;  %v1548_v0 = vadd.f32 1e-05, %v1532_v54  ;;  %8389 = vst [vmem:[#allocation62_spill] sm:$0xff] %v7187_v19  ;;  %v1551_v45 = vadd.f32 1e-05, %v1535_v57  ;;  %v1540_v40 = vmul.f32 0.0625, %v1516_v56  ;;  %vm595_vm3 = vcmp.eq.s32.totalorder %v7044_v2, %v7173_v44 }
 0x51d   :  { %5376 = vmatprep.subr.bf16.mxu0 %v5840_v7  ;;  %v7189_v4 = vpop.xlane.xlu0 %1524  ;;  %v7194_v12 = vpop.permute.xlu1 %554  ;;  %v1554_v55 = vadd.f32 1e-05, %v1538_v51  ;;  %v1539_v5 = vmul.f32 0.0625, %v7143_v49  ;;  %v7233_v51 = vld [vmem:[%s8393_s23] ss:$0 sm:$0xff] }
 0x51e   :  { %5878 = vrsqrt.f32 %v1548_v0  ;;  %v1556_v57 = vadd.f32 1e-05, %v1540_v40  ;;  %vm597_vm6 = vcmp.eq.s32.totalorder %v7044_v2, %v7194_v12 }
 0x51f   :  { %5361 = vmatmul.mubr.msk.bf16.vlgmr.msra.gmra.mrb[32].mxu0 %vm1819_vm1, %v7162_v27  ;;  %5880 = vrsqrt.f32 %v1549_v36  ;;  %v517_v36 = vsel %vm501_vm12, 1.0, %v8388_v43 }
 0x520   :  { %5364 = vmatprep.mubr.msk.bf16.mxu0 %vm1819_vm1, %v7164_v62  ;;  %5377 = vmatpush3.bf16.msra.mxu0 %v5840_v7  ;;  %v516_v7 = vsel %vm500_vm9, 1.0, %v8388_v43  ;;  %5882 = vrsqrt.f32 %v1547_v50  ;;  %v520_v50 = vsel %vm504_vm13, 1.0, %v8388_v43 }
 0x521   :  { %5394 = vmatprep.subr.bf16.mxu0 %v7141_v47  ;;  %v7191_v60 = vpack.c.bf16 %v516_v7, %v515_v58  ;;  %v5875_v13 = vpop.eup %5874  ;;  %5884 = vrsqrt.f32 %v1550_v20  ;;  %v1522_v25 = vpop.xlane.xlu1 %1521  ;;  %v7214_v58 = vpack.c.bf16 %v518_v6, %v517_v36  ;;  %v1555_v6 = vadd.f32 1e-05, %v1539_v5 }
 0x522   :  { %v5877_v54 = vpop.eup %5876  ;;  %v1577_v1 = vmul.f32 %v5875_v13, %v6915_v30  ;;  %v1519_v0 = vpop.xlane.xlu0 %1518  ;;  %5886 = vrsqrt.f32 %v1552_v41  ;;  %v1542_v20 = vmul.f32 0.0625, %v1522_v25  ;;  %v7219_v30 = vpack.c.bf16 %v520_v50, %v519_v46 }
 0x523   :  { %8390 = vst [vmem:[#allocation63_spill] sm:$0xff] %v7191_v60  ;;  %v1578_v35 = vmul.f32 %v5877_v54, %v6927_v59  ;;  %8392 = vst [vmem:[#allocation64_spill] sm:$0xff] %v7214_v58  ;;  %5888 = vrsqrt.f32 %v1553_v63  ;;  %v1541_v59 = vmul.f32 0.0625, %v1519_v0  ;;  %v522_v63 = vsel %vm506_vm15, 1.0, %v8388_v43 }
 0x524   :  { %8394 = vst [vmem:[#allocation65_spill] sm:$0xff] %v7219_v30  ;;  %5890 = vrsqrt.f32 %v1551_v45  ;;  %v1600_v7 = vmul.f32 %v7217_v37, %v1577_v1  ;;  %v1558_v54 = vadd.f32 1e-05, %v1542_v20  ;;  %v521_v25 = vsel %vm505_vm0, 1.0, %v8388_v43 }
 0x525   :  { %5892 = vrsqrt.f32 %v1554_v55  ;;  %v1601_v49 = vmul.f32 %v7217_v37, %v1578_v35  ;;  %v1557_v46 = vadd.f32 1e-05, %v1541_v59  ;;  %v7247_v36 = vpack.c.bf16 %v522_v63, %v521_v25 }
 0x526   :  { %v1528_v41 = vpop.xlane.xlu0 %1527  ;;  %v7238_v45 = vadd.f32 %v7233_v51, %v1600_v7  ;;  %5894 = vrsqrt.f32 %v1556_v57 }
 0x527   :  { %5365 = vmatmul.mubr.msk.bf16.gmra.mrb[36].mxu0 %vm1819_vm1, %v7187_v19  ;;  %v1544_v55 = vmul.f32 0.0625, %v1528_v41  ;;  %v7244_v0 = vadd.f32 %v7233_v51, %v1601_v49  ;;  %8395 = vst [vmem:[#allocation66_spill] sm:$0xff] %v7247_v36  ;;  %5896 = vrsqrt.f32 %v1558_v54 }
 0x528   :  { %5368 = vmatprep.mubr.msk.bf16.mxu0 %vm1819_vm1, %v7191_v60  ;;  %v5879_v22 = vpop.eup %5878  ;;  %5898 = vrsqrt.f32 %v1555_v6 }
 0x529   :  { %v5881_v56 = vpop.eup %5880  ;;  %v1580_v11 = vmul.f32 %v5879_v22, %v6948_v10  ;;  %5900 = vrsqrt.f32 %v1557_v46  ;;  %v1560_v5 = vadd.f32 1e-05, %v1544_v55 }
 0x52a   :  { %v5883_v38 = vpop.eup %5882  ;;  %v1581_v52 = vmul.f32 %v5881_v56, %v6990_v28  ;;  %v1543_v28 = vmul.f32 0.0625, %v7189_v4 }
 0x52b   :  { %v5885_v13 = vpop.eup %5884  ;;  %v1579_v1 = vmul.f32 %v5883_v38, %v6924_v33  ;;  %v1603_v40 = vmul.f32 %v7217_v37, %v1580_v11  ;;  %v1643_v33 = vpack.c.bf16 %v7244_v0, %v7238_v45  ;;  %5902 = vrsqrt.f32 %v1560_v5 }
 0x52c   :  { %v1582_v10 = vmul.f32 %v5885_v13, %v6968_v24  ;;  %v5887_v35 = vpop.eup %5886  ;;  %v1604_v50 = vmul.f32 %v7217_v37, %v1581_v52  ;;  %v1559_v38 = vadd.f32 1e-05, %v1543_v28 }
 0x52d   :  { %v5889_v20 = vpop.eup %5888  ;;  %v1602_v22 = vmul.f32 %v7217_v37, %v1579_v1  ;;  %v7260_v4 = vadd.f32 %v7233_v51, %v1603_v40  ;;  %v1584_v59 = vmul.f32 %v5887_v35, %v7018_v34 }
 0x52e   :  { %v5891_v24 = vpop.eup %5890  ;;  %v1605_v7 = vmul.f32 %v7217_v37, %v1582_v10  ;;  %v7264_v57 = vadd.f32 %v7233_v51, %v1604_v50  ;;  %v1585_v49 = vmul.f32 %v5889_v20, %v7038_v39  ;;  %5904 = vrsqrt.f32 %v1559_v38 }
 0x52f   :  { %5369 = vmatmul.mubr.msk.bf16.gmra.mrb[40].mxu0 %vm1819_vm1, %v7214_v58  ;;  %v5893_v56 = vpop.eup %5892  ;;  %v7268_v13 = vadd.f32 %v7233_v51, %v1602_v22  ;;  %v1583_v11 = vmul.f32 %v5891_v24, %v6965_v16  ;;  %v1607_v63 = vmul.f32 %v7217_v37, %v1584_v59  ;;  %v558_v24 = vpop.permute.xlu1 %557 }
 0x530   :  { %5372 = vmatprep.mubr.msk.bf16.mxu0 %vm1819_vm1, %v7219_v30  ;;  %v7272_v41 = vadd.f32 %v7233_v51, %v1605_v7  ;;  %v1586_v54 = vmul.f32 %v5893_v56, %v7021_v21  ;;  %v5895_v6 = vpop.eup %5894  ;;  %v1608_v52 = vmul.f32 %v7217_v37, %v1585_v49  ;;  %v552_v7 = vpop.permute.xlu0 %551  ;;  %vm598_vm4 = vcmp.eq.s32.totalorder %v7044_v2, %v558_v24 }
 0x531   :  { %v1644_v34 = vpack.c.bf16 %v7260_v4, %v7268_v13  ;;  %v5897_v25 = vpop.eup %5896  ;;  %v1606_v16 = vmul.f32 %v7217_v37, %v1583_v11  ;;  %v7288_v55 = vadd.f32 %v7233_v51, %v1607_v63  ;;  %v1588_v10 = vmul.f32 %v5895_v6, %v7047_v3 }
 0x532   :  { %v1645_v39 = vpack.c.bf16 %v7272_v41, %v7264_v57  ;;  %v5899_v1 = vpop.eup %5898  ;;  %v1609_v21 = vmul.f32 %v7217_v37, %v1586_v54  ;;  %v7292_v40 = vadd.f32 %v7233_v51, %v1608_v52  ;;  %v1590_v35 = vmul.f32 %v5897_v25, %v7086_v8 }
 0x533   :  { %v5901_v46 = vpop.eup %5900  ;;  %v7296_v28 = vadd.f32 %v7233_v51, %v1606_v16  ;;  %v1611_v20 = vmul.f32 %v7217_v37, %v1588_v10  ;;  %v564_v54 = vpop.permute.xlu1 %563  ;;  %vm596_vm2 = vcmp.eq.s32.totalorder %v7044_v2, %v552_v7  ;;  %v611_v16 = vsel %vm595_vm3, 1.0, %v8388_v43 }
 0x534   :  { %v1589_v50 = vmul.f32 %v5901_v46, %v7061_v26  ;;  %v561_v6 = vpop.permute.xlu0 %560  ;;  %vm600_vm5 = vcmp.eq.s32.totalorder %v7044_v2, %v564_v54 }
 0x535   :  { %v1646_v3 = vpack.c.bf16 %v7288_v55, %v7296_v28  ;;  %v5903_v8 = vpop.eup %5902  ;;  %v7318_v56 = vadd.f32 %v7233_v51, %v1611_v20  ;;  %vm599_vm7 = vcmp.eq.s32.totalorder %v7044_v2, %v561_v6  ;;  %v616_v10 = vsel %vm600_vm5, 1.0, %v8388_v43 }
 0x536   :  { %v1612_v26 = vmul.f32 %v7217_v37, %v1589_v50  ;;  %v1592_v59 = vmul.f32 %v5903_v8, %v7075_v53 }
 0x537   :  { %5373 = vmatmul.mubr.msk.bf16.gmra.mrb[44].mxu0 %vm1819_vm1, %v7247_v36  ;;  %v570_v52 = vpop.permute.xlu1 %569 }
 0x538   :  { %5378 = vmatprep.mubr.msk.bf16.mxu0 %vm852_vm14, %v1643_v33  ;;  %v7301_v33 = vadd.f32 %v7233_v51, %v1609_v21  ;;  %v5905_v5 = vpop.eup %5904  ;;  %v7330_v11 = vadd.f32 %v7233_v51, %v1612_v26  ;;  %v1615_v63 = vmul.f32 %v7217_v37, %v1592_v59  ;;  %vm602_vm8 = vcmp.eq.s32.totalorder %v7044_v2, %v570_v52 }
 0x539   :  { %v618_v8 = vsel %vm602_vm8, 1.0, %v8388_v43 }
 0x53a   :  { %v1647_v22 = vpack.c.bf16 %v7301_v33, %v7292_v40 }
 0x53b   :  { %v576_v44 = vpop.permute.xlu1 %575 }
 0x53c   :  { %vm604_vm9 = vcmp.eq.s32.totalorder %v7044_v2, %v576_v44 }
 0x53f   :  { %5379 = vmatmul.mubr.msk.bf16.vlgmr.msra.gmra.mrb[32].mxu0 %vm852_vm14, %v1644_v34  ;;  %v582_v20 = vpop.permute.xlu1 %581 }
 0x540   :  { %5395 = vmatpush3.bf16.msra.mxu0 %v7141_v47  ;;  %5382 = vmatprep.mubr.msk.bf16.mxu0 %vm852_vm14, %v1645_v39  ;;  %v1587_v47 = vmul.f32 %v5899_v1, %v7032_v14  ;;  %v1613_v14 = vmul.f32 %v7217_v37, %v1590_v35  ;;  %v567_v1 = vpop.permute.xlu0 %566  ;;  %v613_v35 = vsel %vm597_vm6, 1.0, %v8388_v43  ;;  %vm606_vm12 = vcmp.eq.s32.totalorder %v7044_v2, %v582_v20 }
 0x541   :  { %5396 = vmatprep.subr.bf16.mxu0 %v7139_v9  ;;  %vm601_vm10 = vcmp.eq.s32.totalorder %v7044_v2, %v567_v1  ;;  %v622_v59 = vsel %vm606_vm12, 1.0, %v8388_v43  ;;  %v4953_v1 = vld [vmem:[%s8401_s26] ss:$0 sm:$0xff] }
 0x542   :  { %v7322_v38 = vadd.f32 %v7233_v51, %v1613_v14  ;;  %v617_v14 = vsel %vm601_vm10, 1.0, %v8388_v43 }
 0x544   :  { %5397 = vmatpush3.bf16.msra.mxu0 %v7139_v9  ;;  %v1610_v9 = vmul.f32 %v7217_v37, %v1587_v47  ;;  %v1649_v53 = vpack.c.bf16 %v7322_v38, %v7330_v11  ;;  %v573_v46 = vpop.permute.xlu0 %572  ;;  %v615_v47 = vsel %vm599_vm7, 1.0, %v8388_v43 }
 0x545   :  { %5398 = vmatprep.subr.bf16.mxu0 %v7147_v17  ;;  %vm603_vm11 = vcmp.eq.s32.totalorder %v7044_v2, %v573_v46 }
 0x546   :  { %v7325_v49 = vadd.f32 %v7233_v51, %v1610_v9  ;;  %v619_v24 = vsel %vm603_vm11, 1.0, %v8388_v43  ;;  %v7383_v9 = vpack.c.bf16 %v618_v8, %v617_v14 }
 0x547   :  { %5383 = vmatmul.mubr.msk.bf16.gmra.mrb[36].mxu0 %vm852_vm14, %v1646_v3  ;;  %v7369_v3 = vpack.c.bf16 %v616_v10, %v615_v47 }
 0x548   :  { %5399 = vmatpush3.bf16.msra.mxu0 %v7147_v17  ;;  %5386 = vmatprep.mubr.msk.bf16.mxu0 %vm852_vm14, %v1647_v22  ;;  %v1591_v17 = vmul.f32 %v5905_v5, %v7053_v23  ;;  %v1648_v34 = vpack.c.bf16 %v7318_v56, %v7325_v49  ;;  %v7342_v23 = vadd.f32 %v7233_v51, %v1615_v63  ;;  %v579_v12 = vpop.permute.xlu0 %578  ;;  %v620_v22 = vsel %vm604_vm9, 1.0, %v8388_v43  ;;  %v588_v5 = vpop.permute.xlu1 %587 }
 0x549   :  { %5400 = vmatprep.subr.bf16.mxu0 %v7145_v61  ;;  %8398 = vst [vmem:[#allocation69_spill] sm:$0xff] %v7369_v3  ;;  %8399 = vst [vmem:[#allocation70_spill] sm:$0xff] %v7383_v9  ;;  %v7385_v26 = vpack.c.bf16 %v620_v22, %v619_v24  ;;  %vm608_vm13 = vcmp.eq.s32.totalorder %v7044_v2, %v588_v5  ;;  %vm605_vm15 = vcmp.eq.s32.totalorder %v7044_v2, %v579_v12 }
 0x54a   :  { %v1614_v39 = vmul.f32 %v7217_v37, %v1591_v17  ;;  %v624_v17 = vsel %vm608_vm13, 1.0, %v8388_v43  ;;  %v621_v54 = vsel %vm605_vm15, 1.0, %v8388_v43 }
 0x54b   :  { %8400 = vst [vmem:[#allocation71_spill] sm:$0xff] %v7385_v26 }
 0x54c   :  { %5401 = vmatpush3.bf16.msra.mxu0 %v7145_v61  ;;  %v612_v61 = vsel %vm596_vm2, 1.0, %v8388_v43  ;;  %v7348_v25 = vadd.f32 %v7233_v51, %v1614_v39  ;;  %v614_v51 = vsel %vm598_vm4, 1.0, %v8388_v43  ;;  %v585_v7 = vpop.permute.xlu0 %584 }
 0x54d   :  { %v7353_v21 = vpack.c.bf16 %v612_v61, %v611_v16  ;;  %v7367_v50 = vpack.c.bf16 %v614_v51, %v613_v35  ;;  %vm607_vm0 = vcmp.eq.s32.totalorder %v7044_v2, %v585_v7 }
 0x54e   :  { %v1650_v37 = vpack.c.bf16 %v7342_v23, %v7348_v25  ;;  %v623_v63 = vsel %vm607_vm0, 1.0, %v8388_v43 }
 0x54f   :  { %5387 = vmatmul.mubr.msk.bf16.gmra.mrb[40].mxu0 %vm852_vm14, %v1648_v34  ;;  %8396 = vst [vmem:[#allocation67_spill] sm:$0xff] %v7353_v21  ;;  %8397 = vst [vmem:[#allocation68_spill] sm:$0xff] %v7367_v50  ;;  %v594_v34 = vpop.permute.xlu1 %593  ;;  %v7401_v39 = vpack.c.bf16 %v624_v17, %v623_v63 }
 0x550   :  { %5390 = vmatprep.mubr.msk.bf16.mxu0 %vm852_vm14, %v1649_v53  ;;  %v7399_v53 = vpack.c.bf16 %v622_v59, %v621_v54  ;;  %v591_v6 = vpop.permute.xlu0 %590  ;;  %vm610_vm2 = vcmp.eq.s32.totalorder %v7044_v2, %v594_v34 }
 0x551   :  { %8403 = vst [vmem:[#allocation73_spill] sm:$0xff] %v7401_v39  ;;  %vm609_vm3 = vcmp.eq.s32.totalorder %v7044_v2, %v591_v6  ;;  %v626_v61 = vsel %vm610_vm2, 1.0, %v8388_v43 }
 0x552   :  { %8402 = vst [vmem:[#allocation72_spill] sm:$0xff] %v7399_v53  ;;  %v625_v52 = vsel %vm609_vm3, 1.0, %v8388_v43 }
 0x553   :  { %v7411_v16 = vpack.c.bf16 %v626_v61, %v625_v52 }
 0x555   :  { %8404 = vst [vmem:[#allocation74_spill] sm:$0xff] %v7411_v16 }
 0x557   :  { %5391 = vmatmul.mubr.msk.bf16.gmra.mrb[44].mxu0 %vm852_vm14, %v1650_v37 }
 0x558   :  { %5402 = vmatprep.mubr.msk.bf16.mxu0 %vm1819_vm1, %v7353_v21 }
 0x55f   :  { %5403 = vmatmul.mubr.msk.bf16.vlgmr.msra.gmra.mrb[32].mxu0 %vm1819_vm1, %v7367_v50 }
 0x560   :  { %5406 = vmatprep.mubr.msk.bf16.mxu0 %vm1819_vm1, %v7369_v3 }
 0x567   :  { %5407 = vmatmul.mubr.msk.bf16.gmra.mrb[36].mxu0 %vm1819_vm1, %v7383_v9 }
 0x568   :  { %5410 = vmatprep.mubr.msk.bf16.mxu0 %vm1819_vm1, %v7385_v26 }
 0x56f   :  { %5411 = vmatmul.mubr.msk.bf16.gmra.mrb[40].mxu0 %vm1819_vm1, %v7399_v53 }
 0x570   :  { %5414 = vmatprep.mubr.msk.bf16.mxu0 %vm1819_vm1, %v7401_v39 }
 0x577   :  { %5415 = vmatmul.mubr.msk.bf16.gmra.mrb[44].mxu0 %vm1819_vm1, %v7411_v16 }
 0x632   :  { %v5404_v37 = vpop.f32.mrb[32].mxu0 }
 0x633   :  { %v2214_v44 = vadd.f32 %v5404_v37, %v4953_v1  ;;  %v2126_v51 = vpop.f32.mrb[33].mxu0 }
 0x634   :  { %v2212_v46 = vadd.f32 %v4953_v1, %v2126_v51  ;;  %v5405_v10 = vpop.f32.mrb[34].mxu0 }
 0x635   :  { %v2215_v35 = vadd.f32 %v5405_v10, %v4953_v1  ;;  %v2129_v47 = vpop.f32.mrb[35].mxu0  ;;  %v2230_v12 = vmax.f32 %v2214_v44, 0.0 }
 0x636   :  { %v2213_v20 = vadd.f32 %v4953_v1, %v2129_v47  ;;  %v2228_v8 = vmax.f32 %v2212_v46, 0.0 }
 0x637   :  { %v2231_v2 = vmax.f32 %v2215_v35, 0.0 }
 0x638   :  { %v2229_v22 = vmax.f32 %v2213_v20, 0.0 }
 0x639   :  { %v2245_v14 = vpack.c.bf16 %v2231_v2, %v2230_v12 }
 0x63a   :  { %v2244_v43 = vpack.c.bf16 %v2229_v22, %v2228_v8  ;;  %v5408_v24 = vpop.f32.mrb[36].mxu0 }
 0x63b   :  { %v2218_v5 = vadd.f32 %v5408_v24, %v4953_v1  ;;  %v2142_v7 = vpop.f32.mrb[37].mxu0 }
 0x63c   :  { %v2216_v59 = vadd.f32 %v4953_v1, %v2142_v7  ;;  %v5409_v17 = vpop.f32.mrb[38].mxu0  ;;  %5420 = vmatprep.mubr.msk.bf16.mxu1 %vm852_vm14, %v2244_v43 }
 0x63d   :  { %v2219_v54 = vadd.f32 %v5409_v17, %v4953_v1  ;;  %v2145_v34 = vpop.f32.mrb[39].mxu0  ;;  %5421 = vmatmul.mubr.msk.bf16.vlgmr.msra.gmra.mrb[32].mxu1 %vm852_vm14, %v2245_v14  ;;  %v2234_v6 = vmax.f32 %v2218_v5, 0.0 }
 0x63e   :  { %v2217_v63 = vadd.f32 %v4953_v1, %v2145_v34  ;;  %v2232_v52 = vmax.f32 %v2216_v59, 0.0 }
 0x63f   :  { %v2235_v61 = vmax.f32 %v2219_v54, 0.0 }
 0x640   :  { %v2233_v37 = vmax.f32 %v2217_v63, 0.0 }
 0x641   :  { %v2247_v44 = vpack.c.bf16 %v2235_v61, %v2234_v6 }
 0x642   :  { %v2246_v51 = vpack.c.bf16 %v2233_v37, %v2232_v52  ;;  %v5412_v46 = vpop.f32.mrb[40].mxu0 }
 0x643   :  { %v2222_v10 = vadd.f32 %v5412_v46, %v4953_v1  ;;  %v2158_v35 = vpop.f32.mrb[41].mxu0 }
 0x644   :  { %v2220_v47 = vadd.f32 %v4953_v1, %v2158_v35  ;;  %v5413_v20 = vpop.f32.mrb[42].mxu0  ;;  %5424 = vmatprep.mubr.msk.bf16.mxu1 %vm852_vm14, %v2246_v51 }
 0x645   :  { %v2223_v12 = vadd.f32 %v5413_v20, %v4953_v1  ;;  %v2161_v2 = vpop.f32.mrb[43].mxu0  ;;  %5425 = vmatmul.mubr.msk.bf16.gmra.mrb[36].mxu1 %vm852_vm14, %v2247_v44  ;;  %v2238_v22 = vmax.f32 %v2222_v10, 0.0 }
 0x646   :  { %v2221_v8 = vadd.f32 %v4953_v1, %v2161_v2  ;;  %v2236_v43 = vmax.f32 %v2220_v47, 0.0  ;;  %v4954_v47 = vld [vmem:[%s8405_s28] ss:$0 sm:$0xff] }
 0x647   :  { %v2239_v14 = vmax.f32 %v2223_v12, 0.0 }
 0x648   :  { %v2237_v24 = vmax.f32 %v2221_v8, 0.0 }
 0x649   :  { %v2249_v5 = vpack.c.bf16 %v2239_v14, %v2238_v22 }
 0x64a   :  { %v2248_v7 = vpack.c.bf16 %v2237_v24, %v2236_v43  ;;  %v5416_v59 = vpop.f32.mrb[44].mxu0 }
 0x64b   :  { %v2226_v17 = vadd.f32 %v5416_v59, %v4953_v1  ;;  %v2174_v54 = vpop.f32.mrb[45].mxu0 }
 0x64c   :  { %v2224_v34 = vadd.f32 %v4953_v1, %v2174_v54  ;;  %v5417_v63 = vpop.f32.mrb[46].mxu0  ;;  %5428 = vmatprep.mubr.msk.bf16.mxu1 %vm852_vm14, %v2248_v7 }
 0x64d   :  { %v2227_v6 = vadd.f32 %v5417_v63, %v4953_v1  ;;  %v2177_v61 = vpop.f32.mrb[47].mxu0  ;;  %5429 = vmatmul.mubr.msk.bf16.gmra.mrb[40].mxu1 %vm852_vm14, %v2249_v5  ;;  %v2242_v37 = vmax.f32 %v2226_v17, 0.0 }
 0x64e   :  { %v2225_v52 = vadd.f32 %v4953_v1, %v2177_v61  ;;  %v2240_v51 = vmax.f32 %v2224_v34, 0.0 }
 0x64f   :  { %v2243_v44 = vmax.f32 %v2227_v6, 0.0 }
 0x650   :  { %v2241_v46 = vmax.f32 %v2225_v52, 0.0 }
 0x651   :  { %v2251_v10 = vpack.c.bf16 %v2243_v44, %v2242_v37 }
 0x652   :  { %v2250_v35 = vpack.c.bf16 %v2241_v46, %v2240_v51 }
 0x654   :  { %5432 = vmatprep.mubr.msk.bf16.mxu1 %vm852_vm14, %v2250_v35 }
 0x655   :  { %5433 = vmatmul.mubr.msk.bf16.gmra.mrb[44].mxu1 %vm852_vm14, %v2251_v10 }
 0x710   :  { %v5422_v20 = vpop.f32.mrb[32].mxu1 }
 0x711   :  { %v2325_v12 = vpop.f32.mrb[33].mxu1  ;;  %v7427_v14 = vadd.f32 %v5422_v20, %v4954_v47 }
 0x712   :  { %v7425_v2 = vadd.f32 %v4954_v47, %v2325_v12  ;;  %v5423_v8 = vpop.f32.mrb[34].mxu1 }
 0x713   :  { %v2328_v22 = vpop.f32.mrb[35].mxu1  ;;  %v7435_v5 = vadd.f32 %v5423_v8, %v4954_v47  ;;  %v2394_v59 = vsel %vm852_vm14, %v7427_v14, 0.0 }
 0x714   :  { %v7429_v1 = vadd.f32 %v4954_v47, %v2328_v22  ;;  %v2388_v43 = vsel %vm852_vm14, %v7425_v2, 0.0 }
 0x715   :  { %2389 = vadd.xlane.f32.xlu0 %v2388_v43  ;;  %v2397_v52 = vsel %vm852_vm14, %v7435_v5, 0.0 }
 0x716   :  { %v2391_v24 = vsel %vm852_vm14, %v7429_v1, 0.0 }
 0x717   :  { %2392 = vadd.xlane.f32.xlu1 %v2391_v24 }
 0x718   :  { %v5426_v7 = vpop.f32.mrb[36].mxu1 }
 0x719   :  { %2395 = vadd.xlane.f32.xlu0 %v2394_v59  ;;  %v2341_v17 = vpop.f32.mrb[37].mxu1  ;;  %v7441_v6 = vadd.f32 %v5426_v7, %v4954_v47 }
 0x71a   :  { %v7439_v54 = vadd.f32 %v4954_v47, %v2341_v17  ;;  %v5427_v34 = vpop.f32.mrb[38].mxu1 }
 0x71b   :  { %v2344_v63 = vpop.f32.mrb[39].mxu1  ;;  %v7449_v44 = vadd.f32 %v5427_v34, %v4954_v47  ;;  %v2406_v10 = vsel %vm852_vm14, %v7441_v6, 0.0 }
 0x71c   :  { %v7443_v61 = vadd.f32 %v4954_v47, %v2344_v63  ;;  %v2400_v37 = vsel %vm852_vm14, %v7439_v54, 0.0 }
 0x71d   :  { %2398 = vadd.xlane.f32.xlu0 %v2397_v52  ;;  %2401 = vadd.xlane.f32.xlu1 %v2400_v37  ;;  %v2409_v24 = vsel %vm852_vm14, %v7449_v44, 0.0 }
 0x71e   :  { %v2403_v46 = vsel %vm852_vm14, %v7443_v61, 0.0 }
 0x720   :  { %v5430_v51 = vpop.f32.mrb[40].mxu1 }
 0x721   :  { %2404 = vadd.xlane.f32.xlu0 %v2403_v46  ;;  %2407 = vadd.xlane.f32.xlu1 %v2406_v10  ;;  %v2357_v35 = vpop.f32.mrb[41].mxu1  ;;  %v7457_v22 = vadd.f32 %v5430_v51, %v4954_v47 }
 0x722   :  { %v7455_v20 = vadd.f32 %v4954_v47, %v2357_v35  ;;  %v5431_v12 = vpop.f32.mrb[42].mxu1 }
 0x723   :  { %v2360_v8 = vpop.f32.mrb[43].mxu1  ;;  %v7465_v59 = vadd.f32 %v5431_v12, %v4954_v47  ;;  %v2418_v63 = vsel %vm852_vm14, %v7457_v22, 0.0 }
 0x724   :  { %v7459_v43 = vadd.f32 %v4954_v47, %v2360_v8  ;;  %v2412_v7 = vsel %vm852_vm14, %v7455_v20, 0.0 }
 0x725   :  { %2410 = vadd.xlane.f32.xlu0 %v2409_v24  ;;  %2413 = vadd.xlane.f32.xlu1 %v2412_v7  ;;  %v2421_v12 = vsel %vm852_vm14, %v7465_v59, 0.0 }
 0x726   :  { %v2415_v34 = vsel %vm852_vm14, %v7459_v43, 0.0 }
 0x728   :  { %v5434_v17 = vpop.f32.mrb[44].mxu1 }
 0x729   :  { %2416 = vadd.xlane.f32.xlu0 %v2415_v34  ;;  %2419 = vadd.xlane.f32.xlu1 %v2418_v63  ;;  %v2373_v52 = vpop.f32.mrb[45].mxu1  ;;  %v7473_v10 = vadd.f32 %v5434_v17, %v4954_v47 }
 0x72a   :  { %v7471_v37 = vadd.f32 %v4954_v47, %v2373_v52  ;;  %v5435_v51 = vpop.f32.mrb[46].mxu1 }
 0x72b   :  { %v2376_v46 = vpop.f32.mrb[47].mxu1  ;;  %v7481_v24 = vadd.f32 %v5435_v51, %v4954_v47  ;;  %v2430_v34 = vsel %vm852_vm14, %v7473_v10, 0.0 }
 0x72c   :  { %v7475_v35 = vadd.f32 %v4954_v47, %v2376_v46  ;;  %v2424_v8 = vsel %vm852_vm14, %v7471_v37, 0.0 }
 0x72d   :  { %2422 = vadd.xlane.f32.xlu0 %v2421_v12  ;;  %2425 = vadd.xlane.f32.xlu1 %v2424_v8  ;;  %v2433_v17 = vsel %vm852_vm14, %v7481_v24, 0.0 }
 0x72e   :  { %v2427_v7 = vsel %vm852_vm14, %v7475_v35, 0.0 }
 0x731   :  { %2428 = vadd.xlane.f32.xlu0 %v2427_v7  ;;  %2431 = vadd.xlane.f32.xlu1 %v2430_v34 }
 0x735   :  { %2434 = vadd.xlane.f32.xlu0 %v2433_v17 }
 0x7a2   :  { %v2390_v63 = vpop.xlane.xlu0 %2389 }
 0x7a3   :  { %v2436_v52 = vmul.f32 0.0625, %v2390_v63 }
 0x7a4   :  { %v2393_v46 = vpop.xlane.xlu1 %2392 }
 0x7a5   :  { %v7490_v12 = vsub.f32 %v7425_v2, %v2436_v52  ;;  %v2437_v47 = vmul.f32 0.0625, %v2393_v46 }
 0x7a6   :  { %v2396_v51 = vpop.xlane.xlu0 %2395 }
 0x7a7   :  { %v7493_v8 = vsub.f32 %v7429_v1, %v2437_v47  ;;  %v2438_v16 = vmul.f32 0.0625, %v2396_v51  ;;  %v2468_v7 = vmul.f32 %v7490_v12, %v7490_v12 }
 0x7a9   :  { %v7498_v34 = vsub.f32 %v7427_v14, %v2438_v16  ;;  %v2484_v17 = vsel %vm852_vm14, %v2468_v7, 0.0  ;;  %v2469_v63 = vmul.f32 %v7493_v8, %v7493_v8 }
 0x7aa   :  { %v2402_v39 = vpop.xlane.xlu1 %2401  ;;  %2485 = vadd.xlane.f32.xlu1 %v2484_v17  ;;  %v2399_v2 = vpop.xlane.xlu0 %2398 }
 0x7ab   :  { %v2440_v52 = vmul.f32 0.0625, %v2402_v39  ;;  %v2439_v46 = vmul.f32 0.0625, %v2399_v2  ;;  %v2487_v1 = vsel %vm852_vm14, %v2469_v63, 0.0  ;;  %v2470_v47 = vmul.f32 %v7498_v34, %v7498_v34 }
 0x7ac   :  { %2488 = vadd.xlane.f32.xlu0 %v2487_v1 }
 0x7ad   :  { %v7507_v51 = vsub.f32 %v7439_v54, %v2440_v52  ;;  %v7510_v16 = vsub.f32 %v7435_v5, %v2439_v46  ;;  %v2490_v14 = vsel %vm852_vm14, %v2470_v47, 0.0 }
 0x7ae   :  { %v2408_v7 = vpop.xlane.xlu1 %2407  ;;  %2491 = vadd.xlane.f32.xlu1 %v2490_v14  ;;  %v2405_v17 = vpop.xlane.xlu0 %2404 }
 0x7af   :  { %v2442_v53 = vmul.f32 0.0625, %v2408_v7  ;;  %v2441_v39 = vmul.f32 0.0625, %v2405_v17  ;;  %v2472_v63 = vmul.f32 %v7507_v51, %v7507_v51  ;;  %v2471_v2 = vmul.f32 %v7510_v16, %v7510_v16 }
 0x7b1   :  { %v7518_v1 = vsub.f32 %v7441_v6, %v2442_v53  ;;  %v7521_v54 = vsub.f32 %v7443_v61, %v2441_v39  ;;  %v2496_v5 = vsel %vm852_vm14, %v2472_v63, 0.0  ;;  %v2493_v52 = vsel %vm852_vm14, %v2471_v2, 0.0 }
 0x7b2   :  { %v2414_v46 = vpop.xlane.xlu1 %2413  ;;  %2497 = vadd.xlane.f32.xlu1 %v2496_v5  ;;  %2494 = vadd.xlane.f32.xlu0 %v2493_v52  ;;  %v2411_v47 = vpop.xlane.xlu0 %2410 }
 0x7b3   :  { %v2444_v14 = vmul.f32 0.0625, %v2414_v46  ;;  %v2443_v7 = vmul.f32 0.0625, %v2411_v47  ;;  %v2474_v17 = vmul.f32 %v7518_v1, %v7518_v1  ;;  %v2473_v53 = vmul.f32 %v7521_v54, %v7521_v54 }
 0x7b5   :  { %v7530_v6 = vsub.f32 %v7455_v20, %v2444_v14  ;;  %v7533_v61 = vsub.f32 %v7449_v44, %v2443_v7  ;;  %v2502_v39 = vsel %vm852_vm14, %v2474_v17, 0.0  ;;  %v2499_v63 = vsel %vm852_vm14, %v2473_v53, 0.0 }
 0x7b6   :  { %v2420_v2 = vpop.xlane.xlu1 %2419  ;;  %2503 = vadd.xlane.f32.xlu1 %v2502_v39  ;;  %2500 = vadd.xlane.f32.xlu0 %v2499_v63  ;;  %v2417_v5 = vpop.xlane.xlu0 %2416 }
 0x7b7   :  { %v2446_v52 = vmul.f32 0.0625, %v2420_v2  ;;  %v2445_v46 = vmul.f32 0.0625, %v2417_v5  ;;  %v2476_v47 = vmul.f32 %v7530_v6, %v7530_v6  ;;  %v2475_v20 = vmul.f32 %v7533_v61, %v7533_v61 }
 0x7b9   :  { %v7542_v14 = vsub.f32 %v7457_v22, %v2446_v52  ;;  %v7545_v44 = vsub.f32 %v7459_v43, %v2445_v46  ;;  %v2508_v7 = vsel %vm852_vm14, %v2476_v47, 0.0  ;;  %v2505_v17 = vsel %vm852_vm14, %v2475_v20, 0.0 }
 0x7ba   :  { %v2426_v53 = vpop.xlane.xlu1 %2425  ;;  %2509 = vadd.xlane.f32.xlu1 %v2508_v7  ;;  %2506 = vadd.xlane.f32.xlu0 %v2505_v17  ;;  %v2423_v39 = vpop.xlane.xlu0 %2422 }
 0x7bb   :  { %v2448_v63 = vmul.f32 0.0625, %v2426_v53  ;;  %v2447_v2 = vmul.f32 0.0625, %v2423_v39  ;;  %v2478_v5 = vmul.f32 %v7542_v14, %v7542_v14  ;;  %v2477_v22 = vmul.f32 %v7545_v44, %v7545_v44 }
 0x7bd   :  { %v7554_v52 = vsub.f32 %v7471_v37, %v2448_v63  ;;  %v7557_v43 = vsub.f32 %v7465_v59, %v2447_v2  ;;  %v2514_v46 = vsel %vm852_vm14, %v2478_v5, 0.0  ;;  %v2511_v47 = vsel %vm852_vm14, %v2477_v22, 0.0 }
 0x7be   :  { %v2432_v20 = vpop.xlane.xlu1 %2431  ;;  %2515 = vadd.xlane.f32.xlu1 %v2514_v46  ;;  %2512 = vadd.xlane.f32.xlu0 %v2511_v47  ;;  %v2429_v7 = vpop.xlane.xlu0 %2428 }
 0x7bf   :  { %v2450_v17 = vmul.f32 0.0625, %v2432_v20  ;;  %v2449_v53 = vmul.f32 0.0625, %v2429_v7  ;;  %v2480_v39 = vmul.f32 %v7554_v52, %v7554_v52  ;;  %v2479_v37 = vmul.f32 %v7557_v43, %v7557_v43 }
 0x7c1   :  { %v7566_v63 = vsub.f32 %v7473_v10, %v2450_v17  ;;  %v7569_v59 = vsub.f32 %v7475_v35, %v2449_v53  ;;  %v2520_v2 = vsel %vm852_vm14, %v2480_v39, 0.0  ;;  %v2517_v5 = vsel %vm852_vm14, %v2479_v37, 0.0 }
 0x7c2   :  { %2521 = vadd.xlane.f32.xlu1 %v2520_v2  ;;  %2518 = vadd.xlane.f32.xlu0 %v2517_v5  ;;  %v2435_v22 = vpop.xlane.xlu0 %2434  ;;  %v8407_v39 = vlaneseq  ;;  %v4882_v5 = vld [vmem:[%s8406_s24] ss:$0 sm:$0xff] }
 0x7c3   :  { %v2451_v46 = vmul.f32 0.0625, %v2435_v22  ;;  %v2482_v47 = vmul.f32 %v7566_v63, %v7566_v63  ;;  %v2481_v20 = vmul.f32 %v7569_v59, %v7569_v59 }
 0x7c4   :  { %v636_v37 = vshrl.u32 %v8407_v39, 7 }
 0x7c5   :  { %v7578_v10 = vsub.f32 %v7481_v24, %v2451_v46  ;;  %v2526_v35 = vsel %vm852_vm14, %v2482_v47, 0.0  ;;  %v2523_v7 = vsel %vm852_vm14, %v2481_v20, 0.0  ;;  %v8408_v24 = vmov 0 }
 0x7c6   :  { %2527 = vadd.xlane.f32.xlu1 %v2526_v35  ;;  %2524 = vadd.xlane.f32.xlu0 %v2523_v7  ;;  %v637_v2 = vadd.s32 8, %v636_v37  ;;  %v638_v22 = vadd.s32 16, %v636_v37  ;;  %v639_v26 = vadd.s32 24, %v636_v37  ;;  %vm649_vm4 = vcmp.eq.s32.totalorder %v636_v37, %v4882_v5 }
 0x7c7   :  { %v2483_v17 = vmul.f32 %v7578_v10, %v7578_v10  ;;  %v8319_v46 = vmov 1.0|1.0   ;;  %v640_v20 = vadd.s32 32, %v636_v37  ;;  %v641_v35 = vadd.s32 40, %v636_v37 }
 0x7c8   :  { %vm650_vm5 = vcmp.eq.s32.totalorder %v637_v2, %v4882_v5  ;;  %vm651_vm7 = vcmp.eq.s32.totalorder %v638_v22, %v4882_v5  ;;  %vm652_vm8 = vcmp.eq.s32.totalorder %v639_v26, %v4882_v5  ;;  %v642_v7 = vadd.s32 48, %v636_v37 }
 0x7c9   :  { %v2529_v53 = vsel %vm852_vm14, %v2483_v17, 0.0  ;;  %vm7587_vm6 = vmpackc.low %vm650_vm5, %vm649_vm4  ;;  %v643_v17 = vadd.s32 56, %v636_v37  ;;  %vm653_vm10 = vcmp.eq.s32.totalorder %v640_v20, %v4882_v5  ;;  %vm654_vm11 = vcmp.eq.s32.totalorder %v641_v35, %v4882_v5 }
 0x7ca   :  { %2530 = vadd.xlane.f32.xlu0 %v2529_v53  ;;  %v8409_v24 = vsel %vm7587_vm6, 4294967295, %v8408_v24  ;;  %5452 = vmatprep.mubr.msk.bf16.mxu1 %vm7587_vm6, %v8319_v46  ;;  %vm7594_vm9 = vmpackc.low %vm652_vm8, %vm651_vm7  ;;  %vm655_vm13 = vcmp.eq.s32.totalorder %v642_v7, %v4882_v5 }
 0x7cb   :  { %8410 = vst [vmem:[#allocation75_spill] sm:$0xff] %v8409_v24  ;;  %vm7598_vm12 = vmpackc.low %vm654_vm11, %vm653_vm10  ;;  %vm656_vm15 = vcmp.eq.s32.totalorder %v643_v17, %v4882_v5 }
 0x7cc   :  { %vm7602_vm0 = vmpackc.low %vm656_vm15, %vm655_vm13 }
 0x837   :  { %v2486_v39 = vpop.xlane.xlu1 %2485 }
 0x838   :  { %v2532_v2 = vmul.f32 0.0625, %v2486_v39 }
 0x839   :  { %v2489_v22 = vpop.xlane.xlu0 %2488 }
 0x83a   :  { %v2548_v46 = vadd.f32 1e-05, %v2532_v2  ;;  %v2533_v24 = vmul.f32 0.0625, %v2489_v22  ;;  %v7607_v22 = vld [vmem:[%s8417_s17] ss:$0 sm:$0xff] }
 0x83b   :  { %v2492_v9 = vpop.xlane.xlu1 %2491 }
 0x83c   :  { %5906 = vrsqrt.f32 %v2548_v46  ;;  %v2549_v37 = vadd.f32 1e-05, %v2533_v24  ;;  %v2534_v20 = vmul.f32 0.0625, %v2492_v9 }
 0x83e   :  { %5908 = vrsqrt.f32 %v2549_v37  ;;  %v2550_v35 = vadd.f32 1e-05, %v2534_v20 }
 0x83f   :  { %v2498_v3 = vpop.xlane.xlu1 %2497  ;;  %v2495_v50 = vpop.xlane.xlu0 %2494 }
 0x840   :  { %5910 = vrsqrt.f32 %v2550_v35  ;;  %v2536_v5 = vmul.f32 0.0625, %v2498_v3  ;;  %v2535_v7 = vmul.f32 0.0625, %v2495_v50 }
 0x842   :  { %v2552_v17 = vadd.f32 1e-05, %v2536_v5  ;;  %v2551_v21 = vadd.f32 1e-05, %v2535_v7  ;;  %v7611_v7 = vld [vmem:[%s8418_s1] ss:$0 sm:$0xff] }
 0x843   :  { %v2504_v36 = vpop.xlane.xlu1 %2503  ;;  %v2501_v30 = vpop.xlane.xlu0 %2500 }
 0x844   :  { %5912 = vrsqrt.f32 %v2552_v17  ;;  %v2538_v39 = vmul.f32 0.0625, %v2504_v36  ;;  %v2537_v2 = vmul.f32 0.0625, %v2501_v30 }
 0x845   :  { %5914 = vrsqrt.f32 %v2551_v21 }
 0x846   :  { %v5907_v46 = vpop.eup %5906  ;;  %v2554_v24 = vadd.f32 1e-05, %v2538_v39  ;;  %v2553_v9 = vadd.f32 1e-05, %v2537_v2 }
 0x847   :  { %v2510_v37 = vpop.xlane.xlu1 %2509  ;;  %v2507_v20 = vpop.xlane.xlu0 %2506  ;;  %v2580_v35 = vmul.f32 %v5907_v46, %v7490_v12 }
 0x848   :  { %v5909_v3 = vpop.eup %5908  ;;  %5916 = vrsqrt.f32 %v2554_v24  ;;  %v2540_v50 = vmul.f32 0.0625, %v2510_v37  ;;  %v2539_v5 = vmul.f32 0.0625, %v2507_v20 }
 0x849   :  { %5918 = vrsqrt.f32 %v2553_v9  ;;  %v2581_v36 = vmul.f32 %v5909_v3, %v7493_v8  ;;  %v2603_v30 = vmul.f32 %v7607_v22, %v2580_v35 }
 0x84a   :  { %v5911_v21 = vpop.eup %5910  ;;  %v2556_v17 = vadd.f32 1e-05, %v2540_v50  ;;  %v2555_v39 = vadd.f32 1e-05, %v2539_v5 }
 0x84b   :  { %v2516_v2 = vpop.xlane.xlu1 %2515  ;;  %v2513_v58 = vpop.xlane.xlu0 %2512  ;;  %v2604_v60 = vmul.f32 %v7607_v22, %v2581_v36  ;;  %v2626_v12 = vadd.f32 %v7611_v7, %v2603_v30  ;;  %v2582_v46 = vmul.f32 %v5911_v21, %v7498_v34 }
 0x84c   :  { %5920 = vrsqrt.f32 %v2556_v17  ;;  %v2542_v24 = vmul.f32 0.0625, %v2516_v2  ;;  %v2541_v37 = vmul.f32 0.0625, %v2513_v58 }
 0x84d   :  { %5922 = vrsqrt.f32 %v2555_v39  ;;  %v2627_v9 = vadd.f32 %v7611_v7, %v2604_v60  ;;  %v2605_v8 = vmul.f32 %v7607_v22, %v2582_v46  ;;  %v7621_v36 = vadd.f32 %v2626_v12, %v7238_v45 }
 0x84e   :  { %v5913_v20 = vpop.eup %5912  ;;  %v2558_v35 = vadd.f32 1e-05, %v2542_v24  ;;  %v2557_v3 = vadd.f32 1e-05, %v2541_v37 }
 0x84f   :  { %v5915_v50 = vpop.eup %5914  ;;  %v2522_v5 = vpop.xlane.xlu1 %2521  ;;  %v7624_v30 = vadd.f32 %v2627_v9, %v7244_v0  ;;  %v2584_v34 = vmul.f32 %v5913_v20, %v7507_v51  ;;  %v2628_v39 = vadd.f32 %v7611_v7, %v2605_v8 }
 0x850   :  { %v2519_v19 = vpop.xlane.xlu0 %2518  ;;  %5924 = vrsqrt.f32 %v2558_v35  ;;  %v2544_v58 = vmul.f32 0.0625, %v2522_v5  ;;  %v2583_v60 = vmul.f32 %v5915_v50, %v7510_v16 }
 0x851   :  { %v2543_v21 = vmul.f32 0.0625, %v2519_v19  ;;  %5926 = vrsqrt.f32 %v2557_v3  ;;  %v7630_v17 = vpack.c.bf16 %v7624_v30, %v7621_v36  ;;  %v2607_v19 = vmul.f32 %v7607_v22, %v2584_v34 }
 0x852   :  { %v5917_v2 = vpop.eup %5916  ;;  %v2560_v45 = vadd.f32 1e-05, %v2544_v58  ;;  %v2606_v0 = vmul.f32 %v7607_v22, %v2583_v60  ;;  %v7640_v20 = vadd.f32 %v2628_v39, %v7268_v13 }
 0x853   :  { %v2559_v12 = vadd.f32 1e-05, %v2543_v21  ;;  %v5919_v46 = vpop.eup %5918  ;;  %v2528_v24 = vpop.xlane.xlu1 %2527  ;;  %5436 = vmatprep.subr.bf16.mxu1 %v7630_v17  ;;  %v2586_v16 = vmul.f32 %v5917_v2, %v7518_v1  ;;  %v2630_v2 = vadd.f32 %v7611_v7, %v2607_v19 }
 0x854   :  { %v2525_v51 = vpop.xlane.xlu0 %2524  ;;  %5928 = vrsqrt.f32 %v2560_v45  ;;  %v2546_v37 = vmul.f32 0.0625, %v2528_v24  ;;  %5437 = vmatpush3.bf16.msra.mxu1 %v7630_v17  ;;  %v2629_v8 = vadd.f32 %v7611_v7, %v2606_v0  ;;  %v2585_v35 = vmul.f32 %v5919_v46, %v7521_v54 }
 0x855   :  { %v2545_v9 = vmul.f32 0.0625, %v2525_v51  ;;  %5930 = vrsqrt.f32 %v2559_v12  ;;  %v2609_v1 = vmul.f32 %v7607_v22, %v2586_v16  ;;  %v7662_v19 = vadd.f32 %v2630_v2, %v7264_v57 }
 0x856   :  { %v5921_v3 = vpop.eup %5920  ;;  %v2562_v50 = vadd.f32 1e-05, %v2546_v37  ;;  %v7644_v34 = vadd.f32 %v2629_v8, %v7260_v4  ;;  %v2608_v60 = vmul.f32 %v7607_v22, %v2585_v35 }
 0x857   :  { %v2561_v5 = vadd.f32 1e-05, %v2545_v9  ;;  %v5923_v58 = vpop.eup %5922  ;;  %v2588_v45 = vmul.f32 %v5921_v3, %v7530_v6  ;;  %v2632_v6 = vadd.f32 %v7611_v7, %v2609_v1 }
 0x858   :  { %v2531_v21 = vpop.xlane.xlu0 %2530  ;;  %5932 = vrsqrt.f32 %v2562_v50  ;;  %v7652_v54 = vpack.c.bf16 %v7644_v34, %v7640_v20  ;;  %v2587_v39 = vmul.f32 %v5923_v58, %v7533_v61  ;;  %v2631_v4 = vadd.f32 %v7611_v7, %v2608_v60 }
 0x859   :  { %v2547_v13 = vmul.f32 0.0625, %v2531_v21  ;;  %5934 = vrsqrt.f32 %v2561_v5  ;;  %v2611_v12 = vmul.f32 %v7607_v22, %v2588_v45  ;;  %v7676_v57 = vadd.f32 %v2632_v6, %v7296_v28 }
 0x85a   :  { %v5925_v0 = vpop.eup %5924  ;;  %5438 = vmatprep.subr.bf16.mxu1 %v7652_v54  ;;  %v2610_v24 = vmul.f32 %v7607_v22, %v2587_v39  ;;  %v7665_v61 = vadd.f32 %v2631_v4, %v7272_v41 }
 0x85b   :  { %v2563_v46 = vadd.f32 1e-05, %v2547_v13  ;;  %v5927_v51 = vpop.eup %5926  ;;  %5439 = vmatpush3.bf16.msra.mxu1 %v7652_v54  ;;  %v2590_v16 = vmul.f32 %v5925_v0, %v7542_v14  ;;  %v2634_v35 = vadd.f32 %v7611_v7, %v2611_v12 }
 0x85c   :  { %v2633_v37 = vadd.f32 %v7611_v7, %v2610_v24  ;;  %v2589_v9 = vmul.f32 %v5927_v51, %v7545_v44  ;;  %v7672_v8 = vpack.c.bf16 %v7665_v61, %v7662_v19 }
 0x85d   :  { %5936 = vrsqrt.f32 %v2563_v46  ;;  %v2613_v50 = vmul.f32 %v7607_v22, %v2590_v16  ;;  %v7693_v58 = vadd.f32 %v2634_v35, %v7292_v40 }
 0x85e   :  { %v5929_v3 = vpop.eup %5928  ;;  %v7679_v41 = vadd.f32 %v2633_v37, %v7288_v55  ;;  %v2612_v14 = vmul.f32 %v7607_v22, %v2589_v9  ;;  %5440 = vmatprep.subr.bf16.mxu1 %v7672_v8 }
 0x85f   :  { %v5931_v5 = vpop.eup %5930  ;;  %v2592_v44 = vmul.f32 %v5929_v3, %v7554_v52  ;;  %5441 = vmatpush3.bf16.msra.mxu1 %v7672_v8  ;;  %v2636_v2 = vadd.f32 %v7611_v7, %v2613_v50 }
 0x860   :  { %v7688_v1 = vpack.c.bf16 %v7679_v41, %v7676_v57  ;;  %v2635_v28 = vadd.f32 %v7611_v7, %v2612_v14  ;;  %v2591_v55 = vmul.f32 %v5931_v5, %v7557_v43 }
 0x861   :  { %v2615_v45 = vmul.f32 %v7607_v22, %v2592_v44  ;;  %v7713_v0 = vadd.f32 %v2636_v2, %v7325_v49 }
 0x862   :  { %v5933_v21 = vpop.eup %5932  ;;  %5442 = vmatprep.subr.bf16.mxu1 %v7688_v1  ;;  %v7697_v60 = vadd.f32 %v2635_v28, %v7301_v33  ;;  %v2614_v52 = vmul.f32 %v7607_v22, %v2591_v55  ;;  %v5844_v28 = vld [vmem:[%s8421_s7] sm:$0xff]  }
 0x863   :  { %v5935_v13 = vpop.eup %5934  ;;  %v2594_v39 = vmul.f32 %v5933_v21, %v7566_v63  ;;  %5443 = vmatpush3.bf16.msra.mxu1 %v7688_v1  ;;  %v2638_v24 = vadd.f32 %v7611_v7, %v2615_v45 }
 0x864   :  { %v7706_v40 = vpack.c.bf16 %v7697_v60, %v7693_v58  ;;  %v2637_v43 = vadd.f32 %v7611_v7, %v2614_v52  ;;  %v2593_v33 = vmul.f32 %v5935_v13, %v7569_v59 }
 0x865   :  { %v2617_v4 = vmul.f32 %v7607_v22, %v2594_v39  ;;  %v7731_v16 = vadd.f32 %v2638_v24, %v7330_v11  ;;  %v5842_v11 = vld [vmem:[%s8419_s2] sm:$0xff]  }
 0x866   :  { %5444 = vmatprep.subr.bf16.mxu1 %v7706_v40  ;;  %v7716_v63 = vadd.f32 %v2637_v43, %v7318_v56  ;;  %v2616_v46 = vmul.f32 %v7607_v22, %v2593_v33  ;;  %v4984_v39 = vld [vmem:[%s8423_s10] ss:$0 sm:$0xff] }
 0x867   :  { %v5937_v12 = vpop.eup %5936  ;;  %5445 = vmatpush3.bf16.msra.mxu1 %v7706_v40  ;;  %v2640_v56 = vadd.f32 %v7611_v7, %v2617_v4 }
 0x868   :  { %v2595_v6 = vmul.f32 %v5937_v12, %v7578_v10  ;;  %v7724_v59 = vpack.c.bf16 %v7716_v63, %v7713_v0  ;;  %v2639_v51 = vadd.f32 %v7611_v7, %v2616_v46 }
 0x86a   :  { %v2618_v49 = vmul.f32 %v7607_v22, %v2595_v6  ;;  %5446 = vmatprep.subr.bf16.mxu1 %v7724_v59  ;;  %v7734_v10 = vadd.f32 %v2639_v51, %v7322_v38  ;;  %v7743_v22 = vadd.f32 %v2640_v56, %v7348_v25  ;;  %v8422_v25 = vmov 1.0|1.0  }
 0x86b   :  { %5447 = vmatpush3.bf16.msra.mxu1 %v7724_v59 }
 0x86c   :  { %v2641_v37 = vadd.f32 %v7611_v7, %v2618_v49  ;;  %v7740_v9 = vpack.c.bf16 %v7734_v10, %v7731_v16 }
 0x86e   :  { %v7746_v35 = vadd.f32 %v2641_v37, %v7342_v23  ;;  %5448 = vmatprep.subr.bf16.mxu1 %v7740_v9  ;;  %v5843_v23 = vld [vmem:[%s8420_s4] sm:$0xff]  }
 0x86f   :  { %5449 = vmatpush3.bf16.msra.mxu1 %v7740_v9 }
 0x870   :  { %v7751_v38 = vpack.c.bf16 %v7746_v35, %v7743_v22 }
 0x872   :  { %5450 = vmatprep.subr.bf16.mxu1 %v7751_v38 }
 0x873   :  { %5451 = vmatpush3.bf16.msra.mxu1 %v7751_v38 }
 0x874   :  { %5460 = vmatprep.subr.bf16.mxu1 %v5842_v11 }
 0x876   :  { %5453 = vmatmul.mubr.msk.bf16.vlgmr.msra.gmra.mrb[48].mxu1 %vm7594_vm9, %v8422_v25 }
 0x877   :  { %5456 = vmatprep.mubr.msk.bf16.mxu1 %vm7598_vm12, %v8422_v25  ;;  %5461 = vmatpush3.bf16.msra.mxu1 %v5842_v11 }
 0x878   :  { %5470 = vmatprep.subr.bf16.mxu1 %v5843_v23 }
 0x87e   :  { %5457 = vmatmul.mubr.msk.bf16.gmra.mrb[52].mxu1 %vm7602_vm0, %v8422_v25 }
 0x949   :  { %v5454_v7 = vpop.f32.mrb[48].mxu1 }
 0x94a   :  { %v2700_v3 = vpop.f32.mrb[49].mxu1 }
 0x94b   :  { %v5455_v14 = vpop.f32.mrb[50].mxu1 }
 0x94c   :  { %v2734_v50 = vpack.c.bf16 %v5455_v14, %v5454_v7  ;;  %v2703_v5 = vpop.f32.mrb[51].mxu1 }
 0x94d   :  { %v2733_v44 = vpack.c.bf16 %v2703_v5, %v2700_v3 }
 0x94f   :  { %5462 = vmatprep.mubr.msk.bf16.mxu1 %vm852_vm14, %v2733_v44 }
 0x950   :  { %5463 = vmatmul.mubr.msk.bf16.vlgmr.msra.gmra.mrb[56].mxu1 %vm852_vm14, %v2734_v50 }
 0x951   :  { %v5458_v55 = vpop.f32.mrb[52].mxu1  ;;  %5471 = vmatpush3.bf16.msra.mxu1 %v5843_v23 }
 0x952   :  { %v2716_v21 = vpop.f32.mrb[53].mxu1  ;;  %5480 = vmatprep.subr.bf16.mxu1 %v5844_v28 }
 0x953   :  { %v5459_v52 = vpop.f32.mrb[54].mxu1 }
 0x954   :  { %v2736_v2 = vpack.c.bf16 %v5459_v52, %v5458_v55  ;;  %v2719_v45 = vpop.f32.mrb[55].mxu1 }
 0x955   :  { %v2735_v13 = vpack.c.bf16 %v2719_v45, %v2716_v21  ;;  %v4985_v45 = vld [vmem:[%s8424_s11] ss:$0 sm:$0xff] }
 0x957   :  { %5466 = vmatprep.mubr.msk.bf16.mxu1 %vm852_vm14, %v2735_v13 }
 0x958   :  { %5467 = vmatmul.mubr.msk.bf16.gmra.mrb[60].mxu1 %vm852_vm14, %v2736_v2 }
 0x959   :  { %5472 = vmatprep.mubr.msk.bf16.mxu1 %vm852_vm14, %v6932_v29 }
 0x960   :  { %5473 = vmatmul.mubr.msk.bf16.vlgmr.msra.gmra.mrb[56].mxu1 %vm852_vm14, %v6972_v18 }
 0x961   :  { %5476 = vmatprep.mubr.msk.bf16.mxu1 %vm852_vm14, %v6996_v32  ;;  %5481 = vmatpush3.bf16.msra.mxu1 %v5844_v28 }
 0x968   :  { %5477 = vmatmul.mubr.msk.bf16.gmra.mrb[60].mxu1 %vm852_vm14, %v7013_v42 }
 0xa33   :  { %v5474_v43 = vpop.f32.mrb[56].mxu1 }
 0xa34   :  { %v2902_v33 = vadd.f32 %v5474_v43, %v4984_v39  ;;  %v2862_v4 = vpop.f32.mrb[57].mxu1 }
 0xa35   :  { %v2900_v12 = vadd.f32 %v4984_v39, %v2862_v4  ;;  %v5475_v46 = vpop.f32.mrb[58].mxu1 }
 0xa36   :  { %v2903_v24 = vadd.f32 %v5475_v46, %v4984_v39  ;;  %v2865_v6 = vpop.f32.mrb[59].mxu1  ;;  %v2910_v29 = vmax.f32 %v2902_v33, 0.0 }
 0xa37   :  { %v2901_v51 = vadd.f32 %v4984_v39, %v2865_v6  ;;  %v2908_v56 = vmax.f32 %v2900_v12, 0.0 }
 0xa38   :  { %v2911_v49 = vmax.f32 %v2903_v24, 0.0 }
 0xa39   :  { %v2909_v18 = vmax.f32 %v2901_v51, 0.0 }
 0xa3a   :  { %v2917_v37 = vpack.c.bf16 %v2911_v49, %v2910_v29 }
 0xa3b   :  { %v2916_v11 = vpack.c.bf16 %v2909_v18, %v2908_v56  ;;  %v5478_v32 = vpop.f32.mrb[60].mxu1 }
 0xa3c   :  { %v2906_v23 = vadd.f32 %v5478_v32, %v4984_v39  ;;  %v2878_v7 = vpop.f32.mrb[61].mxu1 }
 0xa3d   :  { %v2904_v42 = vadd.f32 %v4984_v39, %v2878_v7  ;;  %v5479_v3 = vpop.f32.mrb[62].mxu1  ;;  %5482 = vmatprep.mubr.msk.bf16.mxu1 %vm852_vm14, %v2916_v11 }
 0xa3e   :  { %v2907_v14 = vadd.f32 %v5479_v3, %v4984_v39  ;;  %v2881_v50 = vpop.f32.mrb[63].mxu1  ;;  %5483 = vmatmul.mubr.msk.bf16.vlgmr.msra.gmra.mrb[64].mxu1 %vm852_vm14, %v2917_v37  ;;  %v2914_v44 = vmax.f32 %v2906_v23, 0.0 }
 0xa3f   :  { %v2905_v5 = vadd.f32 %v4984_v39, %v2881_v50  ;;  %v2912_v55 = vmax.f32 %v2904_v42, 0.0 }
 0xa40   :  { %v2915_v28 = vmax.f32 %v2907_v14, 0.0 }
 0xa41   :  { %v2913_v21 = vmax.f32 %v2905_v5, 0.0 }
 0xa42   :  { %v2919_v52 = vpack.c.bf16 %v2915_v28, %v2914_v44  ;;  %v5845_v44 = vld [vmem:[%s8425_s25] sm:$0xff]  }
 0xa43   :  { %v2918_v2 = vpack.c.bf16 %v2913_v21, %v2912_v55  ;;  %5490 = vmatprep.subr.bf16.mxu0 %v5845_v44 }
 0xa44   :  { %5491 = vmatpush3.bf16.msra.mxu0 %v5845_v44 }
 0xa45   :  { %5486 = vmatprep.mubr.msk.bf16.mxu1 %vm852_vm14, %v2918_v2 }
 0xa46   :  { %5487 = vmatmul.mubr.msk.bf16.gmra.mrb[68].mxu1 %vm852_vm14, %v2919_v52 }
 0xb11   :  { %v5484_v13 = vpop.f32.mrb[64].mxu1 }
 0xb12   :  { %v2981_v43 = vpop.f32.mrb[65].mxu1  ;;  %v2990_v46 = vadd.f32 %v5484_v13, %v4985_v45 }
 0xb13   :  { %v2982_v33 = vadd.f32 %v4985_v45, %v2981_v43  ;;  %v5485_v4 = vpop.f32.mrb[66].mxu1 }
 0xb14   :  { %v2984_v12 = vpop.f32.mrb[67].mxu1  ;;  %v2993_v6 = vadd.f32 %v5485_v4, %v4985_v45  ;;  %v3018_v49 = vsel %vm852_vm14, %v2990_v46, 0.0 }
 0xb15   :  { %v2985_v24 = vadd.f32 %v4985_v45, %v2984_v12  ;;  %v3012_v39 = vsel %vm852_vm14, %v2982_v33, 0.0 }
 0xb16   :  { %3013 = vadd.xlane.f32.xlu1 %v3012_v39  ;;  %v3021_v11 = vsel %vm852_vm14, %v2993_v6, 0.0 }
 0xb17   :  { %v3015_v51 = vsel %vm852_vm14, %v2985_v24, 0.0 }
 0xb18   :  { %3016 = vadd.xlane.f32.xlu0 %v3015_v51 }
 0xb19   :  { %v5488_v29 = vpop.f32.mrb[68].mxu1 }
 0xb1a   :  { %3019 = vadd.xlane.f32.xlu1 %v3018_v49  ;;  %v2997_v56 = vpop.f32.mrb[69].mxu1  ;;  %v3006_v23 = vadd.f32 %v5488_v29, %v4985_v45 }
 0xb1b   :  { %v2998_v18 = vadd.f32 %v4985_v45, %v2997_v56  ;;  %v5489_v37 = vpop.f32.mrb[70].mxu1 }
 0xb1c   :  { %3022 = vadd.xlane.f32.xlu0 %v3021_v11  ;;  %v3000_v32 = vpop.f32.mrb[71].mxu1  ;;  %v3009_v3 = vadd.f32 %v5489_v37, %v4985_v45  ;;  %v3030_v50 = vsel %vm852_vm14, %v3006_v23, 0.0 }
 0xb1d   :  { %v3001_v7 = vadd.f32 %v4985_v45, %v3000_v32  ;;  %v3024_v42 = vsel %vm852_vm14, %v2998_v18, 0.0 }
 0xb1e   :  { %3025 = vadd.xlane.f32.xlu1 %v3024_v42  ;;  %v3033_v5 = vsel %vm852_vm14, %v3009_v3, 0.0 }
 0xb1f   :  { %v3027_v14 = vsel %vm852_vm14, %v3001_v7, 0.0 }
 0xb20   :  { %3028 = vadd.xlane.f32.xlu0 %v3027_v14 }
 0xb22   :  { %3031 = vadd.xlane.f32.xlu1 %v3030_v50 }
 0xb24   :  { %3034 = vadd.xlane.f32.xlu0 %v3033_v5 }
 0xba3   :  { %v3014_v28 = vpop.xlane.xlu1 %3013 }
 0xba4   :  { %v3036_v55 = vmul.f32 0.0625, %v3014_v28 }
 0xba5   :  { %v3017_v21 = vpop.xlane.xlu0 %3016 }
 0xba6   :  { %v7795_v52 = vsub.f32 %v2982_v33, %v3036_v55  ;;  %v3037_v2 = vmul.f32 0.0625, %v3017_v21 }
 0xba7   :  { %v3020_v13 = vpop.xlane.xlu1 %3019 }
 0xba8   :  { %v7797_v45 = vsub.f32 %v2985_v24, %v3037_v2  ;;  %v3038_v43 = vmul.f32 0.0625, %v3020_v13  ;;  %v3052_v4 = vmul.f32 %v7795_v52, %v7795_v52 }
 0xba9   :  { %v3023_v12 = vpop.xlane.xlu0 %3022 }
 0xbaa   :  { %v7801_v39 = vsub.f32 %v2990_v46, %v3038_v43  ;;  %v3039_v51 = vmul.f32 0.0625, %v3023_v12  ;;  %v3060_v29 = vsel %vm852_vm14, %v3052_v4, 0.0  ;;  %v3053_v49 = vmul.f32 %v7797_v45, %v7797_v45 }
 0xbab   :  { %3061 = vadd.xlane.f32.xlu1 %v3060_v29  ;;  %v3026_v33 = vpop.xlane.xlu1 %3025 }
 0xbac   :  { %v7806_v56 = vsub.f32 %v2993_v6, %v3039_v51  ;;  %v3040_v37 = vmul.f32 0.0625, %v3026_v33  ;;  %v3063_v24 = vsel %vm852_vm14, %v3053_v49, 0.0  ;;  %v3054_v11 = vmul.f32 %v7801_v39, %v7801_v39  ;;  %v5846_v49 = vld [vmem:[%s8426_s15] sm:$0xff]  }
 0xbad   :  { %3064 = vadd.xlane.f32.xlu0 %v3063_v24  ;;  %v3029_v32 = vpop.xlane.xlu0 %3028  ;;  %5500 = vmatprep.subr.bf16.mxu1 %v5846_v49 }
 0xbae   :  { %v7811_v46 = vsub.f32 %v2998_v18, %v3040_v37  ;;  %v3041_v42 = vmul.f32 0.0625, %v3029_v32  ;;  %v3066_v14 = vsel %vm852_vm14, %v3054_v11, 0.0  ;;  %v3055_v50 = vmul.f32 %v7806_v56, %v7806_v56  ;;  %5501 = vmatpush3.bf16.msra.mxu1 %v5846_v49  ;;  %v4991_v49 = vld [vmem:[%s8427_s21] ss:$0 sm:$0xff] }
 0xbaf   :  { %3067 = vadd.xlane.f32.xlu1 %v3066_v14  ;;  %v3032_v5 = vpop.xlane.xlu1 %3031 }
 0xbb0   :  { %v7816_v6 = vsub.f32 %v3001_v7, %v3041_v42  ;;  %v3042_v44 = vmul.f32 0.0625, %v3032_v5  ;;  %v3069_v28 = vsel %vm852_vm14, %v3055_v50, 0.0  ;;  %v3056_v55 = vmul.f32 %v7811_v46, %v7811_v46 }
 0xbb1   :  { %3070 = vadd.xlane.f32.xlu0 %v3069_v28  ;;  %v3035_v18 = vpop.xlane.xlu0 %3034 }
 0xbb2   :  { %v7821_v21 = vsub.f32 %v3006_v23, %v3042_v44  ;;  %v3043_v2 = vmul.f32 0.0625, %v3035_v18  ;;  %v3072_v13 = vsel %vm852_vm14, %v3056_v55, 0.0  ;;  %v3057_v43 = vmul.f32 %v7816_v6, %v7816_v6 }
 0xbb3   :  { %3073 = vadd.xlane.f32.xlu1 %v3072_v13 }
 0xbb4   :  { %v7826_v7 = vsub.f32 %v3009_v3, %v3043_v2  ;;  %v3075_v4 = vsel %vm852_vm14, %v3057_v43, 0.0  ;;  %v3058_v12 = vmul.f32 %v7821_v21, %v7821_v21 }
 0xbb5   :  { %3076 = vadd.xlane.f32.xlu0 %v3075_v4 }
 0xbb6   :  { %v3078_v51 = vsel %vm852_vm14, %v3058_v12, 0.0  ;;  %v3059_v23 = vmul.f32 %v7826_v7, %v7826_v7 }
 0xbb7   :  { %3079 = vadd.xlane.f32.xlu1 %v3078_v51 }
 0xbb8   :  { %v3081_v29 = vsel %vm852_vm14, %v3059_v23, 0.0 }
 0xbb9   :  { %3082 = vadd.xlane.f32.xlu0 %v3081_v29 }
 0xc38   :  { %v3062_v3 = vpop.xlane.xlu1 %3061 }
 0xc39   :  { %v3084_v33 = vmul.f32 0.0625, %v3062_v3 }
 0xc3a   :  { %v3065_v37 = vpop.xlane.xlu0 %3064 }
 0xc3b   :  { %v3092_v24 = vadd.f32 1e-05, %v3084_v33  ;;  %v3085_v11 = vmul.f32 0.0625, %v3065_v37 }
 0xc3c   :  { %v3068_v32 = vpop.xlane.xlu1 %3067 }
 0xc3d   :  { %5938 = vrsqrt.f32 %v3092_v24  ;;  %v3093_v42 = vadd.f32 1e-05, %v3085_v11  ;;  %v3086_v14 = vmul.f32 0.0625, %v3068_v32  ;;  %v4992_v11 = vld [vmem:[%s8428_s16] ss:$0 sm:$0xff] }
 0xc3e   :  { %v3071_v50 = vpop.xlane.xlu0 %3070 }
 0xc3f   :  { %5940 = vrsqrt.f32 %v3093_v42  ;;  %v3094_v5 = vadd.f32 1e-05, %v3086_v14  ;;  %v3087_v44 = vmul.f32 0.0625, %v3071_v50 }
 0xc40   :  { %v3074_v28 = vpop.xlane.xlu1 %3073 }
 0xc41   :  { %5942 = vrsqrt.f32 %v3094_v5  ;;  %v3095_v55 = vadd.f32 1e-05, %v3087_v44  ;;  %v3088_v18 = vmul.f32 0.0625, %v3074_v28 }
 0xc42   :  { %v3077_v2 = vpop.xlane.xlu0 %3076 }
 0xc43   :  { %5944 = vrsqrt.f32 %v3095_v55  ;;  %v3096_v13 = vadd.f32 1e-05, %v3088_v18  ;;  %v3089_v43 = vmul.f32 0.0625, %v3077_v2 }
 0xc44   :  { %v3080_v4 = vpop.xlane.xlu1 %3079 }
 0xc45   :  { %5946 = vrsqrt.f32 %v3096_v13  ;;  %v3097_v12 = vadd.f32 1e-05, %v3089_v43  ;;  %v3090_v51 = vmul.f32 0.0625, %v3080_v4 }
 0xc46   :  { %v3083_v23 = vpop.xlane.xlu0 %3082 }
 0xc47   :  { %v5939_v29 = vpop.eup %5938  ;;  %5948 = vrsqrt.f32 %v3097_v12  ;;  %v3098_v3 = vadd.f32 1e-05, %v3090_v51  ;;  %v3091_v33 = vmul.f32 0.0625, %v3083_v23 }
 0xc48   :  { %v3108_v37 = vmul.f32 %v5939_v29, %v7795_v52 }
 0xc49   :  { %v5941_v24 = vpop.eup %5940  ;;  %5950 = vrsqrt.f32 %v3098_v3  ;;  %v3099_v32 = vadd.f32 1e-05, %v3091_v33 }
 0xc4a   :  { %v3109_v42 = vmul.f32 %v5941_v24, %v7797_v45  ;;  %v3123_v14 = vmul.f32 %v4991_v49, %v3108_v37  ;;  %v8429_v37 = vld [vmem:[#allocation56_spill] sm:$0xff] }
 0xc4b   :  { %v5943_v50 = vpop.eup %5942  ;;  %5952 = vrsqrt.f32 %v3099_v32 }
 0xc4c   :  { %v3110_v5 = vmul.f32 %v5943_v50, %v7801_v39  ;;  %v3124_v44 = vmul.f32 %v4991_v49, %v3109_v42  ;;  %v3138_v28 = vadd.f32 %v4992_v11, %v3123_v14 }
 0xc4d   :  { %v5945_v55 = vpop.eup %5944 }
 0xc4e   :  { %v3125_v18 = vmul.f32 %v4991_v49, %v3110_v5  ;;  %v3111_v2 = vmul.f32 %v5945_v55, %v7806_v56  ;;  %v3139_v13 = vadd.f32 %v4992_v11, %v3124_v44  ;;  %v7843_v52 = vadd.f32 %v3138_v28, %v6918_v15  ;;  %v8430_v5 = vld [vmem:[#allocation57_spill] sm:$0xff] }
 0xc4f   :  { %v5947_v43 = vpop.eup %5946 }
 0xc50   :  { %v3140_v4 = vadd.f32 %v4992_v11, %v3125_v18  ;;  %v3126_v12 = vmul.f32 %v4991_v49, %v3111_v2  ;;  %v3112_v45 = vmul.f32 %v5947_v43, %v7811_v46  ;;  %v7847_v51 = vadd.f32 %v3139_v13, %v6921_v31  ;;  %v8434_v13 = vld [vmem:[#allocation59_spill] sm:$0xff] }
 0xc51   :  { %v5949_v23 = vpop.eup %5948 }
 0xc52   :  { %v3141_v39 = vadd.f32 %v4992_v11, %v3126_v12  ;;  %v3113_v29 = vmul.f32 %v5949_v23, %v7816_v6  ;;  %v7852_v3 = vpack.c.bf16 %v7847_v51, %v7843_v52  ;;  %v7855_v33 = vadd.f32 %v3140_v4, %v6952_v48  ;;  %v8436_v4 = vld [vmem:[#allocation60_spill] sm:$0xff] }
 0xc53   :  { %v5951_v56 = vpop.eup %5950  ;;  %v3127_v15 = vmul.f32 %v4991_v49, %v3112_v45  ;;  %v5848_v45 = vld [vmem:[%s8431_s0] sm:$0xff]  }
 0xc54   :  { %v7858_v24 = vadd.f32 %v3141_v39, %v8429_v37  ;;  %v3114_v46 = vmul.f32 %v5951_v56, %v7821_v21  ;;  %5492 = vmatprep.mubr.msk.bf16.mxu0 %vm852_vm14, %v7852_v3  ;;  %5502 = vmatprep.mubr.msk.bf16.mxu1 %vm852_vm14, %v7852_v3  ;;  %v3128_v31 = vmul.f32 %v4991_v49, %v3113_v29  ;;  %v8432_v21 = vld [vmem:[#allocation58_spill] sm:$0xff] }
 0xc55   :  { %v5953_v6 = vpop.eup %5952  ;;  %v3142_v32 = vadd.f32 %v4992_v11, %v3127_v15  ;;  %5576 = vmatprep.subr.bf16.mxu1 %v5848_v45 }
 0xc56   :  { %v3115_v42 = vmul.f32 %v5953_v6, %v7826_v7  ;;  %v7868_v48 = vpack.c.bf16 %v7858_v24, %v7855_v33  ;;  %v3143_v14 = vadd.f32 %v4992_v11, %v3128_v31  ;;  %v3129_v50 = vmul.f32 %v4991_v49, %v3114_v46 }
 0xc57   :  { %v7871_v44 = vadd.f32 %v3142_v32, %v8430_v5 }
 0xc58   :  { %5493 = vmatmul.mubr.msk.bf16.vlgmr.msra.gmra.mrb[48].mxu0 %vm852_vm14, %v7868_v48  ;;  %5503 = vmatmul.mubr.msk.bf16.vlgmr.msra.gmra.mrb[72].mxu1 %vm852_vm14, %v7868_v48  ;;  %v7878_v28 = vadd.f32 %v3143_v14, %v8432_v21  ;;  %v3130_v7 = vmul.f32 %v4991_v49, %v3115_v42  ;;  %v3144_v55 = vadd.f32 %v4992_v11, %v3129_v50 }
 0xc59   :  { %5577 = vmatpush3.bf16.msra.mxu1 %v5848_v45 }
 0xc5a   :  { %8433 = vst [vmem:[#allocation56_spill] sm:$0xff] %v7878_v28  ;;  %v7882_v18 = vpack.c.bf16 %v7878_v28, %v7871_v44  ;;  %v3145_v2 = vadd.f32 %v4992_v11, %v3130_v7  ;;  %v7889_v43 = vadd.f32 %v3144_v55, %v8434_v13  ;;  %v8438_v11 = vld [vmem:[#allocation61_spill] sm:$0xff] }
 0xc5c   :  { %5496 = vmatprep.mubr.msk.bf16.mxu0 %vm852_vm14, %v7882_v18  ;;  %5506 = vmatprep.mubr.msk.bf16.mxu1 %vm852_vm14, %v7882_v18  ;;  %8435 = vst [vmem:[#allocation57_spill] sm:$0xff] %v7889_v43  ;;  %v7892_v12 = vadd.f32 %v3145_v2, %v8436_v4 }
 0xc5e   :  { %8437 = vst [vmem:[#allocation58_spill] sm:$0xff] %v7892_v12  ;;  %v7896_v49 = vpack.c.bf16 %v7892_v12, %v7889_v43 }
 0xc60   :  { %5497 = vmatmul.mubr.msk.bf16.gmra.mrb[52].mxu0 %vm852_vm14, %v7896_v49  ;;  %5507 = vmatmul.mubr.msk.bf16.gmra.mrb[76].mxu1 %vm852_vm14, %v7896_v49 }
 0xc61   :  { %5518 = vmatprep.mubr.msk.bf16.mxu0 %vm1819_vm1, %v8438_v11 }
 0xd2b   :  { %v5494_v23 = vpop.f32.mrb[48].mxu0  ;;  %v5504_v39 = vpop.f32.mrb[72].mxu1 }
 0xd2c   :  { %v3212_v29 = vpop.f32.mrb[49].mxu0  ;;  %v3289_v56 = vpop.f32.mrb[73].mxu1 }
 0xd2d   :  { %v5495_v15 = vpop.f32.mrb[50].mxu0  ;;  %v5505_v37 = vpop.f32.mrb[74].mxu1 }
 0xd2e   :  { %v3244_v46 = vpack.c.bf16 %v5495_v15, %v5494_v23  ;;  %v3321_v31 = vpack.c.bf16 %v5505_v37, %v5504_v39  ;;  %v3215_v6 = vpop.f32.mrb[51].mxu0  ;;  %v3292_v32 = vpop.f32.mrb[75].mxu1  ;;  %v8441_v15 = vld [vmem:[#allocation63_spill] sm:$0xff]  ;;  %v8442_v37 = vld [vmem:[#allocation64_spill] sm:$0xff] }
 0xd2f   :  { %v3243_v42 = vpack.c.bf16 %v3215_v6, %v3212_v29  ;;  %v3320_v14 = vpack.c.bf16 %v3292_v32, %v3289_v56  ;;  %v5847_v29 = vld [vmem:[%s8439_s5] sm:$0xff]  }
 0xd30   :  { %v8440_v56 = vld [vmem:[#allocation62_spill] sm:$0xff] }
 0xd31   :  { %5510 = vmatprep.subr.bf16.mxu0 %v3243_v42  ;;  %v8444_v6 = vld [vmem:[#allocation66_spill] sm:$0xff] }
 0xd32   :  { %5511 = vmatpush3.bf16.msra.mxu0 %v3243_v42 }
 0xd33   :  { %v5498_v50 = vpop.f32.mrb[52].mxu0  ;;  %v5508_v5 = vpop.f32.mrb[76].mxu1  ;;  %5512 = vmatprep.subr.bf16.mxu0 %v3244_v46 }
 0xd34   :  { %v3228_v21 = vpop.f32.mrb[53].mxu0  ;;  %v3305_v7 = vpop.f32.mrb[77].mxu1 }
 0xd35   :  { %v5499_v55 = vpop.f32.mrb[54].mxu0  ;;  %v5509_v2 = vpop.f32.mrb[78].mxu1 }
 0xd36   :  { %v3246_v13 = vpack.c.bf16 %v5499_v55, %v5498_v50  ;;  %v3323_v4 = vpack.c.bf16 %v5509_v2, %v5508_v5  ;;  %v3231_v11 = vpop.f32.mrb[55].mxu0  ;;  %v3308_v45 = vpop.f32.mrb[79].mxu1  ;;  %5513 = vmatpush3.bf16.msra.mxu0 %v3244_v46  ;;  %v8443_v46 = vld [vmem:[#allocation65_spill] sm:$0xff] }
 0xd37   :  { %v3245_v23 = vpack.c.bf16 %v3231_v11, %v3228_v21  ;;  %v3322_v39 = vpack.c.bf16 %v3308_v45, %v3305_v7 }
 0xd39   :  { %5514 = vmatprep.subr.bf16.mxu0 %v3245_v23 }
 0xd3a   :  { %5515 = vmatpush3.bf16.msra.mxu0 %v3245_v23 }
 0xd3b   :  { %5516 = vmatprep.subr.bf16.mxu0 %v3246_v13 }
 0xd3e   :  { %5517 = vmatpush3.bf16.msra.mxu0 %v3246_v13 }
 0xd3f   :  { %5534 = vmatprep.subr.bf16.mxu0 %v5847_v29 }
 0xd41   :  { %5519 = vmatmul.mubr.msk.bf16.vlgmr.msra.gmra.mrb[56].mxu0 %vm1819_vm1, %v7162_v27  ;;  %v8446_v27 = vld [vmem:[#allocation67_spill] sm:$0xff] }
 0xd42   :  { %5522 = vmatprep.mubr.msk.bf16.mxu0 %vm1819_vm1, %v7164_v62  ;;  %5535 = vmatpush3.bf16.msra.mxu0 %v5847_v29  ;;  %v8447_v62 = vld [vmem:[#allocation68_spill] sm:$0xff] }
 0xd43   :  { %5552 = vmatprep.subr.bf16.mxu0 %v3320_v14 }
 0xd49   :  { %5523 = vmatmul.mubr.msk.bf16.gmra.mrb[60].mxu0 %vm1819_vm1, %v8440_v56 }
 0xd4a   :  { %5526 = vmatprep.mubr.msk.bf16.mxu0 %vm1819_vm1, %v8441_v15 }
 0xd51   :  { %5527 = vmatmul.mubr.msk.bf16.gmra.mrb[64].mxu0 %vm1819_vm1, %v8442_v37 }
 0xd52   :  { %5530 = vmatprep.mubr.msk.bf16.mxu0 %vm1819_vm1, %v8443_v46 }
 0xd59   :  { %5531 = vmatmul.mubr.msk.bf16.gmra.mrb[68].mxu0 %vm1819_vm1, %v8444_v6 }
 0xd5a   :  { %5536 = vmatprep.mubr.msk.bf16.mxu0 %vm852_vm14, %v7630_v17  ;;  %v8448_v17 = vld [vmem:[#allocation69_spill] sm:$0xff] }
 0xd61   :  { %5537 = vmatmul.mubr.msk.bf16.vlgmr.msra.gmra.mrb[56].mxu0 %vm852_vm14, %v7652_v54  ;;  %v8449_v54 = vld [vmem:[#allocation70_spill] sm:$0xff] }
 0xd62   :  { %5553 = vmatpush3.bf16.msra.mxu0 %v3320_v14  ;;  %5540 = vmatprep.mubr.msk.bf16.mxu0 %vm852_vm14, %v7672_v8  ;;  %v8450_v8 = vld [vmem:[#allocation71_spill] sm:$0xff] }
 0xd63   :  { %5554 = vmatprep.subr.bf16.mxu0 %v3321_v31 }
 0xd66   :  { %5555 = vmatpush3.bf16.msra.mxu0 %v3321_v31 }
 0xd67   :  { %5556 = vmatprep.subr.bf16.mxu0 %v3322_v39 }
 0xd69   :  { %5541 = vmatmul.mubr.msk.bf16.gmra.mrb[60].mxu0 %vm852_vm14, %v7688_v1  ;;  %v8451_v1 = vld [vmem:[#allocation72_spill] sm:$0xff] }
 0xd6a   :  { %5557 = vmatpush3.bf16.msra.mxu0 %v3322_v39  ;;  %5544 = vmatprep.mubr.msk.bf16.mxu0 %vm852_vm14, %v7706_v40  ;;  %v8452_v40 = vld [vmem:[#allocation73_spill] sm:$0xff] }
 0xd6b   :  { %5558 = vmatprep.subr.bf16.mxu0 %v3323_v4 }
 0xd6e   :  { %5559 = vmatpush3.bf16.msra.mxu0 %v3323_v4 }
 0xd71   :  { %5545 = vmatmul.mubr.msk.bf16.gmra.mrb[64].mxu0 %vm852_vm14, %v7724_v59  ;;  %v8453_v59 = vld [vmem:[#allocation74_spill] sm:$0xff] }
 0xd72   :  { %5548 = vmatprep.mubr.msk.bf16.mxu0 %vm852_vm14, %v7740_v9  ;;  %v5028_v9 = vld [vmem:[%s8445_s9] ss:$0 sm:$0xff] }
 0xd79   :  { %5549 = vmatmul.mubr.msk.bf16.gmra.mrb[68].mxu0 %vm852_vm14, %v7751_v38 }
 0xd7a   :  { %5560 = vmatprep.mubr.msk.bf16.mxu0 %vm1819_vm1, %v8446_v27 }
 0xd81   :  { %5561 = vmatmul.mubr.msk.bf16.vlgmr.msra.gmra.mrb[56].mxu0 %vm1819_vm1, %v8447_v62 }
 0xd82   :  { %5564 = vmatprep.mubr.msk.bf16.mxu0 %vm1819_vm1, %v8448_v17 }
 0xd89   :  { %5565 = vmatmul.mubr.msk.bf16.gmra.mrb[60].mxu0 %vm1819_vm1, %v8449_v54 }
 0xd8a   :  { %5568 = vmatprep.mubr.msk.bf16.mxu0 %vm1819_vm1, %v8450_v8 }
 0xd91   :  { %5569 = vmatmul.mubr.msk.bf16.gmra.mrb[64].mxu0 %vm1819_vm1, %v8451_v1 }
 0xd92   :  { %5572 = vmatprep.mubr.msk.bf16.mxu0 %vm1819_vm1, %v8452_v40 }
 0xd99   :  { %5573 = vmatmul.mubr.msk.bf16.gmra.mrb[68].mxu0 %vm1819_vm1, %v8453_v59 }
 0xe54   :  { %v5562_v38 = vpop.f32.mrb[56].mxu0 }
 0xe55   :  { %v3672_v31 = vadd.f32 %v5562_v38, %v5028_v9  ;;  %v3584_v32 = vpop.f32.mrb[57].mxu0 }
 0xe56   :  { %v3670_v42 = vadd.f32 %v5028_v9, %v3584_v32  ;;  %v5563_v14 = vpop.f32.mrb[58].mxu0 }
 0xe57   :  { %v3673_v50 = vadd.f32 %v5563_v14, %v5028_v9  ;;  %v3587_v5 = vpop.f32.mrb[59].mxu0  ;;  %v3688_v7 = vmax.f32 %v3672_v31, 0.0 }
 0xe58   :  { %v3671_v21 = vadd.f32 %v5028_v9, %v3587_v5  ;;  %v3686_v2 = vmax.f32 %v3670_v42, 0.0 }
 0xe59   :  { %v3689_v55 = vmax.f32 %v3673_v50, 0.0 }
 0xe5a   :  { %v3687_v13 = vmax.f32 %v3671_v21, 0.0 }
 0xe5b   :  { %v3703_v4 = vpack.c.bf16 %v3689_v55, %v3688_v7 }
 0xe5c   :  { %v3702_v11 = vpack.c.bf16 %v3687_v13, %v3686_v2  ;;  %v5566_v45 = vpop.f32.mrb[60].mxu0 }
 0xe5d   :  { %v3676_v23 = vadd.f32 %v5566_v45, %v5028_v9  ;;  %v3600_v39 = vpop.f32.mrb[61].mxu0 }
 0xe5e   :  { %v3674_v29 = vadd.f32 %v5028_v9, %v3600_v39  ;;  %v5567_v56 = vpop.f32.mrb[62].mxu0  ;;  %5578 = vmatprep.mubr.msk.bf16.mxu1 %vm852_vm14, %v3702_v11 }
 0xe5f   :  { %v3677_v15 = vadd.f32 %v5567_v56, %v5028_v9  ;;  %v3603_v37 = vpop.f32.mrb[63].mxu0  ;;  %5579 = vmatmul.mubr.msk.bf16.vlgmr.msra.gmra.mrb[80].mxu1 %vm852_vm14, %v3703_v4  ;;  %v3692_v6 = vmax.f32 %v3676_v23, 0.0 }
 0xe60   :  { %v3675_v46 = vadd.f32 %v5028_v9, %v3603_v37  ;;  %v3690_v62 = vmax.f32 %v3674_v29, 0.0 }
 0xe61   :  { %v3693_v27 = vmax.f32 %v3677_v15, 0.0 }
 0xe62   :  { %v3691_v17 = vmax.f32 %v3675_v46, 0.0 }
 0xe63   :  { %v3705_v54 = vpack.c.bf16 %v3693_v27, %v3692_v6 }
 0xe64   :  { %v3704_v8 = vpack.c.bf16 %v3691_v17, %v3690_v62  ;;  %v5570_v1 = vpop.f32.mrb[64].mxu0 }
 0xe65   :  { %v3680_v40 = vadd.f32 %v5570_v1, %v5028_v9  ;;  %v3616_v59 = vpop.f32.mrb[65].mxu0 }
 0xe66   :  { %v3678_v38 = vadd.f32 %v5028_v9, %v3616_v59  ;;  %v5571_v31 = vpop.f32.mrb[66].mxu0  ;;  %5582 = vmatprep.mubr.msk.bf16.mxu1 %vm852_vm14, %v3704_v8 }
 0xe67   :  { %v3681_v32 = vadd.f32 %v5571_v31, %v5028_v9  ;;  %v3619_v42 = vpop.f32.mrb[67].mxu0  ;;  %5583 = vmatmul.mubr.msk.bf16.gmra.mrb[84].mxu1 %vm852_vm14, %v3705_v54  ;;  %v3696_v50 = vmax.f32 %v3680_v40, 0.0  ;;  %v5029_v54 = vld [vmem:[%s8454_s13] ss:$0 sm:$0xff] }
 0xe68   :  { %v3679_v14 = vadd.f32 %v5028_v9, %v3619_v42  ;;  %v3694_v21 = vmax.f32 %v3678_v38, 0.0 }
 0xe69   :  { %v3697_v5 = vmax.f32 %v3681_v32, 0.0 }
 0xe6a   :  { %v3695_v7 = vmax.f32 %v3679_v14, 0.0 }
 0xe6b   :  { %v3707_v55 = vpack.c.bf16 %v3697_v5, %v3696_v50 }
 0xe6c   :  { %v3706_v2 = vpack.c.bf16 %v3695_v7, %v3694_v21  ;;  %v5574_v13 = vpop.f32.mrb[68].mxu0 }
 0xe6d   :  { %v3684_v4 = vadd.f32 %v5574_v13, %v5028_v9  ;;  %v3632_v11 = vpop.f32.mrb[69].mxu0 }
 0xe6e   :  { %v3682_v45 = vadd.f32 %v5028_v9, %v3632_v11  ;;  %v5575_v23 = vpop.f32.mrb[70].mxu0  ;;  %5586 = vmatprep.mubr.msk.bf16.mxu1 %vm852_vm14, %v3706_v2 }
 0xe6f   :  { %v3685_v39 = vadd.f32 %v5575_v23, %v5028_v9  ;;  %v3635_v29 = vpop.f32.mrb[71].mxu0  ;;  %5587 = vmatmul.mubr.msk.bf16.gmra.mrb[88].mxu1 %vm852_vm14, %v3707_v55  ;;  %v3700_v15 = vmax.f32 %v3684_v4, 0.0 }
 0xe70   :  { %v3683_v56 = vadd.f32 %v5028_v9, %v3635_v29  ;;  %v3698_v46 = vmax.f32 %v3682_v45, 0.0 }
 0xe71   :  { %v3701_v37 = vmax.f32 %v3685_v39, 0.0 }
 0xe72   :  { %v3699_v6 = vmax.f32 %v3683_v56, 0.0 }
 0xe73   :  { %v3709_v27 = vpack.c.bf16 %v3701_v37, %v3700_v15 }
 0xe74   :  { %v3708_v62 = vpack.c.bf16 %v3699_v6, %v3698_v46 }
 0xe76   :  { %5590 = vmatprep.mubr.msk.bf16.mxu1 %vm852_vm14, %v3708_v62 }
 0xe77   :  { %5591 = vmatmul.mubr.msk.bf16.gmra.mrb[92].mxu1 %vm852_vm14, %v3709_v27 }
 0xe78   :  { %5610 = vmatprep.mubr.msk.bf16.mxu1 %vm7587_vm6, %v8422_v25 }
 0xf32   :  { %v5580_v8 = vpop.f32.mrb[80].mxu1 }
 0xf33   :  { %v3783_v1 = vpop.f32.mrb[81].mxu1  ;;  %v7967_v38 = vadd.f32 %v5580_v8, %v5029_v54 }
 0xf34   :  { %v7965_v40 = vadd.f32 %v5029_v54, %v3783_v1  ;;  %v5581_v9 = vpop.f32.mrb[82].mxu1 }
 0xf35   :  { %v3786_v59 = vpop.f32.mrb[83].mxu1  ;;  %v7973_v42 = vadd.f32 %v5581_v9, %v5029_v54  ;;  %v3852_v5 = vsel %vm852_vm14, %v7967_v38, 0.0 }
 0xf36   :  { %v7969_v31 = vadd.f32 %v5029_v54, %v3786_v59  ;;  %v3846_v32 = vsel %vm852_vm14, %v7965_v40, 0.0 }
 0xf37   :  { %3847 = vadd.xlane.f32.xlu1 %v3846_v32  ;;  %v3855_v2 = vsel %vm852_vm14, %v7973_v42, 0.0 }
 0xf38   :  { %v3849_v14 = vsel %vm852_vm14, %v7969_v31, 0.0 }
 0xf39   :  { %3850 = vadd.xlane.f32.xlu0 %v3849_v14 }
 0xf3a   :  { %v5584_v50 = vpop.f32.mrb[84].mxu1 }
 0xf3b   :  { %3853 = vadd.xlane.f32.xlu1 %v3852_v5  ;;  %v3799_v21 = vpop.f32.mrb[85].mxu1  ;;  %v7983_v4 = vadd.f32 %v5584_v50, %v5029_v54 }
 0xf3c   :  { %v7979_v7 = vadd.f32 %v5029_v54, %v3799_v21  ;;  %v5585_v55 = vpop.f32.mrb[86].mxu1 }
 0xf3d   :  { %3856 = vadd.xlane.f32.xlu0 %v3855_v2  ;;  %v3802_v13 = vpop.f32.mrb[87].mxu1  ;;  %v7989_v23 = vadd.f32 %v5585_v55, %v5029_v54  ;;  %v3864_v56 = vsel %vm852_vm14, %v7983_v4, 0.0 }
 0xf3e   :  { %v7985_v11 = vadd.f32 %v5029_v54, %v3802_v13  ;;  %v3858_v45 = vsel %vm852_vm14, %v7979_v7, 0.0 }
 0xf3f   :  { %3859 = vadd.xlane.f32.xlu1 %v3858_v45  ;;  %v3867_v6 = vsel %vm852_vm14, %v7989_v23, 0.0 }
 0xf40   :  { %v3861_v39 = vsel %vm852_vm14, %v7985_v11, 0.0 }
 0xf41   :  { %3862 = vadd.xlane.f32.xlu0 %v3861_v39 }
 0xf42   :  { %v5588_v29 = vpop.f32.mrb[88].mxu1 }
 0xf43   :  { %3865 = vadd.xlane.f32.xlu1 %v3864_v56  ;;  %v3815_v15 = vpop.f32.mrb[89].mxu1  ;;  %v7999_v62 = vadd.f32 %v5588_v29, %v5029_v54 }
 0xf44   :  { %v7995_v37 = vadd.f32 %v5029_v54, %v3815_v15  ;;  %v5589_v46 = vpop.f32.mrb[90].mxu1 }
 0xf45   :  { %3868 = vadd.xlane.f32.xlu0 %v3867_v6  ;;  %v3818_v27 = vpop.f32.mrb[91].mxu1  ;;  %v8005_v1 = vadd.f32 %v5589_v46, %v5029_v54  ;;  %v3876_v32 = vsel %vm852_vm14, %v7999_v62, 0.0 }
 0xf46   :  { %v8001_v17 = vadd.f32 %v5029_v54, %v3818_v27  ;;  %v3870_v8 = vsel %vm852_vm14, %v7995_v37, 0.0 }
 0xf47   :  { %3871 = vadd.xlane.f32.xlu1 %v3870_v8  ;;  %v3879_v21 = vsel %vm852_vm14, %v8005_v1, 0.0 }
 0xf48   :  { %v3873_v9 = vsel %vm852_vm14, %v8001_v17, 0.0 }
 0xf49   :  { %3874 = vadd.xlane.f32.xlu0 %v3873_v9 }
 0xf4a   :  { %v5592_v59 = vpop.f32.mrb[92].mxu1 }
 0xf4b   :  { %3877 = vadd.xlane.f32.xlu1 %v3876_v32  ;;  %v3831_v14 = vpop.f32.mrb[93].mxu1  ;;  %v8015_v2 = vadd.f32 %v5592_v59, %v5029_v54 }
 0xf4c   :  { %v8011_v50 = vadd.f32 %v5029_v54, %v3831_v14  ;;  %v5593_v5 = vpop.f32.mrb[94].mxu1 }
 0xf4d   :  { %3880 = vadd.xlane.f32.xlu0 %v3879_v21  ;;  %v3834_v55 = vpop.f32.mrb[95].mxu1  ;;  %v8021_v39 = vadd.f32 %v5593_v5, %v5029_v54  ;;  %v3888_v56 = vsel %vm852_vm14, %v8015_v2, 0.0 }
 0xf4e   :  { %v8017_v13 = vadd.f32 %v5029_v54, %v3834_v55  ;;  %v3882_v45 = vsel %vm852_vm14, %v8011_v50, 0.0 }
 0xf4f   :  { %3883 = vadd.xlane.f32.xlu1 %v3882_v45  ;;  %v3891_v15 = vsel %vm852_vm14, %v8021_v39, 0.0 }
 0xf50   :  { %v3885_v29 = vsel %vm852_vm14, %v8017_v13, 0.0 }
 0xf51   :  { %3886 = vadd.xlane.f32.xlu0 %v3885_v29 }
 0xf53   :  { %3889 = vadd.xlane.f32.xlu1 %v3888_v56 }
 0xf55   :  { %3892 = vadd.xlane.f32.xlu0 %v3891_v15 }
 0xfc4   :  { %v3848_v46 = vpop.xlane.xlu1 %3847 }
 0xfc5   :  { %v3894_v6 = vmul.f32 0.0625, %v3848_v46 }
 0xfc6   :  { %v3851_v27 = vpop.xlane.xlu0 %3850 }
 0xfc7   :  { %v8030_v8 = vsub.f32 %v7965_v40, %v3894_v6  ;;  %v3895_v54 = vmul.f32 0.0625, %v3851_v27 }
 0xfc8   :  { %v3854_v9 = vpop.xlane.xlu1 %3853 }
 0xfc9   :  { %v8033_v59 = vsub.f32 %v7969_v31, %v3895_v54  ;;  %v3896_v32 = vmul.f32 0.0625, %v3854_v9  ;;  %v3926_v14 = vmul.f32 %v8030_v8, %v8030_v8 }
 0xfca   :  { %v3857_v5 = vpop.xlane.xlu0 %3856 }
 0xfcb   :  { %v8038_v21 = vsub.f32 %v7967_v38, %v3896_v32  ;;  %v3897_v55 = vmul.f32 0.0625, %v3857_v5  ;;  %v3942_v45 = vsel %vm852_vm14, %v3926_v14, 0.0  ;;  %v3927_v40 = vmul.f32 %v8033_v59, %v8033_v59 }
 0xfcc   :  { %v3860_v29 = vpop.xlane.xlu1 %3859  ;;  %3943 = vadd.xlane.f32.xlu1 %v3942_v45 }
 0xfcd   :  { %v8044_v56 = vsub.f32 %v7973_v42, %v3897_v55  ;;  %v3898_v31 = vmul.f32 0.0625, %v3860_v29  ;;  %v3945_v15 = vsel %vm852_vm14, %v3927_v40, 0.0  ;;  %v3928_v46 = vmul.f32 %v8038_v21, %v8038_v21 }
 0xfce   :  { %v3863_v6 = vpop.xlane.xlu0 %3862  ;;  %3946 = vadd.xlane.f32.xlu0 %v3945_v15 }
 0xfcf   :  { %v8050_v38 = vsub.f32 %v7979_v7, %v3898_v31  ;;  %v3899_v27 = vmul.f32 0.0625, %v3863_v6  ;;  %v3948_v54 = vsel %vm852_vm14, %v3928_v46, 0.0  ;;  %v3929_v9 = vmul.f32 %v8044_v56, %v8044_v56 }
 0xfd0   :  { %v3866_v32 = vpop.xlane.xlu1 %3865  ;;  %3949 = vadd.xlane.f32.xlu1 %v3948_v54 }
 0xfd1   :  { %v8056_v42 = vsub.f32 %v7985_v11, %v3899_v27  ;;  %v3900_v14 = vmul.f32 0.0625, %v3866_v32  ;;  %v3951_v5 = vsel %vm852_vm14, %v3929_v9, 0.0  ;;  %v3930_v55 = vmul.f32 %v8050_v38, %v8050_v38 }
 0xfd2   :  { %v3869_v45 = vpop.xlane.xlu0 %3868  ;;  %3952 = vadd.xlane.f32.xlu0 %v3951_v5 }
 0xfd3   :  { %v8062_v7 = vsub.f32 %v7983_v4, %v3900_v14  ;;  %v3901_v40 = vmul.f32 0.0625, %v3869_v45  ;;  %v3954_v29 = vsel %vm852_vm14, %v3930_v55, 0.0  ;;  %v3931_v31 = vmul.f32 %v8056_v42, %v8056_v42 }
 0xfd4   :  { %v3872_v15 = vpop.xlane.xlu1 %3871  ;;  %3955 = vadd.xlane.f32.xlu1 %v3954_v29 }
 0xfd5   :  { %v8068_v11 = vsub.f32 %v7989_v23, %v3901_v40  ;;  %v3902_v46 = vmul.f32 0.0625, %v3872_v15  ;;  %v3957_v6 = vsel %vm852_vm14, %v3931_v31, 0.0  ;;  %v3932_v27 = vmul.f32 %v8062_v7, %v8062_v7 }
 0xfd6   :  { %v3875_v54 = vpop.xlane.xlu0 %3874  ;;  %3958 = vadd.xlane.f32.xlu0 %v3957_v6 }
 0xfd7   :  { %v8074_v4 = vsub.f32 %v7995_v37, %v3902_v46  ;;  %v3903_v9 = vmul.f32 0.0625, %v3875_v54  ;;  %v3960_v32 = vsel %vm852_vm14, %v3932_v27, 0.0  ;;  %v3933_v14 = vmul.f32 %v8068_v11, %v8068_v11 }
 0xfd8   :  { %v3878_v5 = vpop.xlane.xlu1 %3877  ;;  %3961 = vadd.xlane.f32.xlu1 %v3960_v32 }
 0xfd9   :  { %v8080_v23 = vsub.f32 %v8001_v17, %v3903_v9  ;;  %v3904_v55 = vmul.f32 0.0625, %v3878_v5  ;;  %v3963_v45 = vsel %vm852_vm14, %v3933_v14, 0.0  ;;  %v3934_v40 = vmul.f32 %v8074_v4, %v8074_v4 }
 0xfda   :  { %v3881_v29 = vpop.xlane.xlu0 %3880  ;;  %3964 = vadd.xlane.f32.xlu0 %v3963_v45 }
 0xfdb   :  { %v8086_v37 = vsub.f32 %v7999_v62, %v3904_v55  ;;  %v3905_v31 = vmul.f32 0.0625, %v3881_v29  ;;  %v3966_v15 = vsel %vm852_vm14, %v3934_v40, 0.0  ;;  %v3935_v46 = vmul.f32 %v8080_v23, %v8080_v23 }
 0xfdc   :  { %3967 = vadd.xlane.f32.xlu1 %v3966_v15  ;;  %v3884_v17 = vpop.xlane.xlu1 %3883 }
 0xfdd   :  { %v8092_v6 = vsub.f32 %v8005_v1, %v3905_v31  ;;  %v3906_v27 = vmul.f32 0.0625, %v3884_v17  ;;  %v3969_v54 = vsel %vm852_vm14, %v3935_v46, 0.0  ;;  %v3936_v9 = vmul.f32 %v8086_v37, %v8086_v37 }
 0xfde   :  { %3970 = vadd.xlane.f32.xlu0 %v3969_v54  ;;  %v3887_v62 = vpop.xlane.xlu0 %3886 }
 0xfdf   :  { %v8098_v32 = vsub.f32 %v8011_v50, %v3906_v27  ;;  %v3907_v14 = vmul.f32 0.0625, %v3887_v62  ;;  %v3972_v5 = vsel %vm852_vm14, %v3936_v9, 0.0  ;;  %v3937_v55 = vmul.f32 %v8092_v6, %v8092_v6 }
 0xfe0   :  { %3973 = vadd.xlane.f32.xlu1 %v3972_v5  ;;  %v3890_v1 = vpop.xlane.xlu1 %3889 }
 0xfe1   :  { %v8104_v45 = vsub.f32 %v8017_v13, %v3907_v14  ;;  %v3908_v40 = vmul.f32 0.0625, %v3890_v1  ;;  %v3975_v29 = vsel %vm852_vm14, %v3937_v55, 0.0  ;;  %v3938_v31 = vmul.f32 %v8098_v32, %v8098_v32 }
 0xfe2   :  { %3976 = vadd.xlane.f32.xlu0 %v3975_v29  ;;  %v3893_v50 = vpop.xlane.xlu0 %3892 }
 0xfe3   :  { %v8110_v15 = vsub.f32 %v8015_v2, %v3908_v40  ;;  %v3909_v46 = vmul.f32 0.0625, %v3893_v50  ;;  %v3978_v17 = vsel %vm852_vm14, %v3938_v31, 0.0  ;;  %v3939_v27 = vmul.f32 %v8104_v45, %v8104_v45 }
 0xfe4   :  { %3979 = vadd.xlane.f32.xlu1 %v3978_v17 }
 0xfe5   :  { %v8116_v13 = vsub.f32 %v8021_v39, %v3909_v46  ;;  %v3981_v54 = vsel %vm852_vm14, %v3939_v27, 0.0  ;;  %v3940_v9 = vmul.f32 %v8110_v15, %v8110_v15 }
 0xfe6   :  { %3982 = vadd.xlane.f32.xlu0 %v3981_v54 }
 0xfe7   :  { %v3984_v62 = vsel %vm852_vm14, %v3940_v9, 0.0  ;;  %v3941_v2 = vmul.f32 %v8116_v13, %v8116_v13 }
 0xfe8   :  { %3985 = vadd.xlane.f32.xlu1 %v3984_v62 }
 0xfe9   :  { %v3987_v14 = vsel %vm852_vm14, %v3941_v2, 0.0 }
 0xfea   :  { %3988 = vadd.xlane.f32.xlu0 %v3987_v14 }
0x1059   :  { %v3944_v5 = vpop.xlane.xlu1 %3943 }
0x105a   :  { %v3990_v55 = vmul.f32 0.0625, %v3944_v5 }
0x105b   :  { %v3947_v1 = vpop.xlane.xlu0 %3946 }
0x105c   :  { %v4006_v39 = vadd.f32 1e-05, %v3990_v55  ;;  %v3991_v40 = vmul.f32 0.0625, %v3947_v1 }
0x105d   :  { %v3950_v29 = vpop.xlane.xlu1 %3949 }
0x105e   :  { %5954 = vrsqrt.f32 %v4006_v39  ;;  %v4007_v31 = vadd.f32 1e-05, %v3991_v40  ;;  %v3992_v50 = vmul.f32 0.0625, %v3950_v29 }
0x105f   :  { %v3953_v46 = vpop.xlane.xlu0 %3952 }
0x1060   :  { %5956 = vrsqrt.f32 %v4007_v31  ;;  %v4008_v17 = vadd.f32 1e-05, %v3992_v50  ;;  %v3993_v27 = vmul.f32 0.0625, %v3953_v46  ;;  %v8125_v31 = vld [vmem:[#allocation2] ss:$0 sm:$0xff] }
0x1061   :  { %v3956_v54 = vpop.xlane.xlu1 %3955 }
0x1062   :  { %5958 = vrsqrt.f32 %v4008_v17  ;;  %v4009_v9 = vadd.f32 1e-05, %v3993_v27  ;;  %v3994_v62 = vmul.f32 0.0625, %v3956_v54 }
0x1063   :  { %v3959_v12 = vpop.xlane.xlu0 %3958 }
0x1064   :  { %5960 = vrsqrt.f32 %v4009_v9  ;;  %v4010_v2 = vadd.f32 1e-05, %v3994_v62  ;;  %v3995_v14 = vmul.f32 0.0625, %v3959_v12  ;;  %v8128_v9 = vld [vmem:[#allocation4] ss:$0 sm:$0xff] }
0x1065   :  { %v3962_v5 = vpop.xlane.xlu1 %3961 }
0x1066   :  { %5962 = vrsqrt.f32 %v4010_v2  ;;  %v4011_v55 = vadd.f32 1e-05, %v3995_v14  ;;  %v3996_v1 = vmul.f32 0.0625, %v3962_v5 }
0x1067   :  { %v3965_v43 = vpop.xlane.xlu0 %3964 }
0x1068   :  { %v5955_v39 = vpop.eup %5954  ;;  %5964 = vrsqrt.f32 %v4011_v55  ;;  %v4012_v40 = vadd.f32 1e-05, %v3996_v1  ;;  %v3997_v29 = vmul.f32 0.0625, %v3965_v43 }
0x1069   :  { %v3968_v50 = vpop.xlane.xlu1 %3967  ;;  %v4038_v46 = vmul.f32 %v5955_v39, %v8030_v8 }
0x106a   :  { %v5957_v17 = vpop.eup %5956  ;;  %5966 = vrsqrt.f32 %v4012_v40  ;;  %v4013_v27 = vadd.f32 1e-05, %v3997_v29  ;;  %v3998_v54 = vmul.f32 0.0625, %v3968_v50 }
0x106b   :  { %v3971_v12 = vpop.xlane.xlu0 %3970  ;;  %v4039_v62 = vmul.f32 %v5957_v17, %v8033_v59  ;;  %v4061_v2 = vmul.f32 %v8125_v31, %v4038_v46 }
0x106c   :  { %v5959_v14 = vpop.eup %5958  ;;  %5968 = vrsqrt.f32 %v4013_v27  ;;  %v4014_v5 = vadd.f32 1e-05, %v3998_v54  ;;  %v3999_v43 = vmul.f32 0.0625, %v3971_v12 }
0x106d   :  { %v3974_v55 = vpop.xlane.xlu1 %3973  ;;  %v4062_v1 = vmul.f32 %v8125_v31, %v4039_v62  ;;  %v4084_v8 = vadd.f32 %v8128_v9, %v4061_v2  ;;  %v4040_v39 = vmul.f32 %v5959_v14, %v8038_v21 }
0x106e   :  { %v5961_v40 = vpop.eup %5960  ;;  %5970 = vrsqrt.f32 %v4014_v5  ;;  %v4015_v29 = vadd.f32 1e-05, %v3999_v43  ;;  %v4000_v50 = vmul.f32 0.0625, %v3974_v55 }
0x106f   :  { %v3977_v28 = vpop.xlane.xlu0 %3976  ;;  %v4085_v59 = vadd.f32 %v8128_v9, %v4062_v1  ;;  %v4041_v46 = vmul.f32 %v5961_v40, %v8044_v56  ;;  %v4063_v17 = vmul.f32 %v8125_v31, %v4040_v39  ;;  %v4100_v62 = vadd.f32 %v4084_v8, %v7621_v36 }
0x1070   :  { %v5963_v27 = vpop.eup %5962  ;;  %5972 = vrsqrt.f32 %v4015_v29  ;;  %v4016_v54 = vadd.f32 1e-05, %v4000_v50  ;;  %v4001_v12 = vmul.f32 0.0625, %v3977_v28 }
0x1071   :  { %v3980_v2 = vpop.xlane.xlu1 %3979  ;;  %v4101_v21 = vadd.f32 %v4085_v59, %v7624_v30  ;;  %v4064_v14 = vmul.f32 %v8125_v31, %v4041_v46  ;;  %v4086_v5 = vadd.f32 %v8128_v9, %v4063_v17  ;;  %v4042_v43 = vmul.f32 %v5963_v27, %v8050_v38 }
0x1072   :  { %v5965_v55 = vpop.eup %5964  ;;  %5974 = vrsqrt.f32 %v4016_v54  ;;  %v4017_v56 = vadd.f32 1e-05, %v4001_v12  ;;  %v4002_v1 = vmul.f32 0.0625, %v3980_v2 }
0x1073   :  { %v3983_v39 = vpop.xlane.xlu0 %3982  ;;  %v4116_v40 = vpack.c.bf16 %v4101_v21, %v4100_v62  ;;  %v4087_v29 = vadd.f32 %v8128_v9, %v4064_v14  ;;  %v4043_v28 = vmul.f32 %v5965_v55, %v8056_v42  ;;  %v4065_v50 = vmul.f32 %v8125_v31, %v4042_v43 }
0x1074   :  { %v5967_v36 = vpop.eup %5966  ;;  %5976 = vrsqrt.f32 %v4017_v56  ;;  %v4018_v8 = vadd.f32 1e-05, %v4002_v1  ;;  %v4003_v30 = vmul.f32 0.0625, %v3983_v39  ;;  %v4102_v38 = vadd.f32 %v4086_v5, %v7640_v20 }
0x1075   :  { %5594 = vmatprep.subr.bf16.mxu1 %v4116_v40  ;;  %v3986_v59 = vpop.xlane.xlu1 %3985  ;;  %v4103_v46 = vadd.f32 %v4087_v29, %v7644_v34  ;;  %v4066_v17 = vmul.f32 %v8125_v31, %v4043_v28  ;;  %v4044_v27 = vmul.f32 %v5967_v36, %v8062_v7  ;;  %v4088_v62 = vadd.f32 %v8128_v9, %v4065_v50 }
0x1076   :  { %v5969_v54 = vpop.eup %5968  ;;  %5978 = vrsqrt.f32 %v4018_v8  ;;  %v4019_v12 = vadd.f32 1e-05, %v4003_v30  ;;  %v4004_v42 = vmul.f32 0.0625, %v3986_v59  ;;  %5595 = vmatpush3.bf16.msra.mxu1 %v4116_v40 }
0x1077   :  { %v3989_v2 = vpop.xlane.xlu0 %3988  ;;  %v4117_v21 = vpack.c.bf16 %v4103_v46, %v4102_v38  ;;  %v4089_v14 = vadd.f32 %v8128_v9, %v4066_v17  ;;  %v4045_v43 = vmul.f32 %v5969_v54, %v8068_v11  ;;  %v4067_v20 = vmul.f32 %v8125_v31, %v4044_v27 }
0x1078   :  { %v5971_v34 = vpop.eup %5970  ;;  %5980 = vrsqrt.f32 %v4019_v12  ;;  %v4020_v5 = vadd.f32 1e-05, %v4004_v42  ;;  %v4005_v55 = vmul.f32 0.0625, %v3989_v2  ;;  %v4104_v7 = vadd.f32 %v4088_v62, %v7662_v19 }
0x1079   :  { %5596 = vmatprep.subr.bf16.mxu1 %v4117_v21  ;;  %v4105_v56 = vadd.f32 %v4089_v14, %v7665_v61  ;;  %v4068_v1 = vmul.f32 %v8125_v31, %v4045_v43  ;;  %v4090_v39 = vadd.f32 %v8128_v9, %v4067_v20  ;;  %v4046_v40 = vmul.f32 %v5971_v34, %v8074_v4 }
0x107a   :  { %v5973_v29 = vpop.eup %5972  ;;  %5982 = vrsqrt.f32 %v4020_v5  ;;  %v4021_v11 = vadd.f32 1e-05, %v4005_v55  ;;  %5597 = vmatpush3.bf16.msra.mxu1 %v4117_v21 }
0x107b   :  { %v4118_v28 = vpack.c.bf16 %v4105_v56, %v4104_v7  ;;  %v4091_v36 = vadd.f32 %v8128_v9, %v4068_v1  ;;  %v4047_v8 = vmul.f32 %v5973_v29, %v8080_v23  ;;  %v4069_v19 = vmul.f32 %v8125_v31, %v4046_v40 }
0x107c   :  { %v5975_v30 = vpop.eup %5974  ;;  %5984 = vrsqrt.f32 %v4021_v11  ;;  %v4106_v61 = vadd.f32 %v4090_v39, %v7676_v57 }
0x107d   :  { %5598 = vmatprep.subr.bf16.mxu1 %v4118_v28  ;;  %v4107_v50 = vadd.f32 %v4091_v36, %v7679_v41  ;;  %v4070_v4 = vmul.f32 %v8125_v31, %v4047_v8  ;;  %v4048_v59 = vmul.f32 %v5975_v30, %v8086_v37  ;;  %v4092_v46 = vadd.f32 %v8128_v9, %v4069_v19  ;;  %v5849_v36 = vld [vmem:[%s8456_s29] sm:$0xff]  }
0x107e   :  { %v5977_v38 = vpop.eup %5976  ;;  %5599 = vmatpush3.bf16.msra.mxu1 %v4118_v28  ;;  %v5851_v30 = vld [vmem:[%s8458_s8] sm:$0xff]  }
0x107f   :  { %v4119_v17 = vpack.c.bf16 %v4107_v50, %v4106_v61  ;;  %v4093_v23 = vadd.f32 %v8128_v9, %v4070_v4  ;;  %v4049_v27 = vmul.f32 %v5977_v38, %v8092_v6  ;;  %v4071_v54 = vmul.f32 %v8125_v31, %v4048_v59  ;;  %v5059_v50 = vld [vmem:[#allocation6] ss:$0 sm:$0xff] }
0x1080   :  { %v5979_v12 = vpop.eup %5978  ;;  %v4108_v57 = vadd.f32 %v4092_v46, %v7693_v58 }
0x1081   :  { %5600 = vmatprep.subr.bf16.mxu1 %v4119_v17  ;;  %v4109_v41 = vadd.f32 %v4093_v23, %v7697_v60  ;;  %v4072_v42 = vmul.f32 %v8125_v31, %v4049_v27  ;;  %v4094_v37 = vadd.f32 %v8128_v9, %v4071_v54  ;;  %v4050_v62 = vmul.f32 %v5979_v12, %v8098_v32 }
0x1082   :  { %v5981_v2 = vpop.eup %5980  ;;  %5601 = vmatpush3.bf16.msra.mxu1 %v4119_v17 }
0x1083   :  { %v4120_v21 = vpack.c.bf16 %v4109_v41, %v4108_v57  ;;  %v4095_v14 = vadd.f32 %v8128_v9, %v4072_v42  ;;  %v4051_v6 = vmul.f32 %v5981_v2, %v8104_v45  ;;  %v4073_v20 = vmul.f32 %v8125_v31, %v4050_v62 }
0x1084   :  { %v5983_v43 = vpop.eup %5982  ;;  %v4110_v58 = vadd.f32 %v4094_v37, %v7713_v0 }
0x1085   :  { %5602 = vmatprep.subr.bf16.mxu1 %v4120_v21  ;;  %v4111_v60 = vadd.f32 %v4095_v14, %v7716_v63  ;;  %v4074_v34 = vmul.f32 %v8125_v31, %v4051_v6  ;;  %v4052_v5 = vmul.f32 %v5983_v43, %v8110_v15  ;;  %v4096_v55 = vadd.f32 %v8128_v9, %v4073_v20 }
0x1086   :  { %v5985_v32 = vpop.eup %5984  ;;  %5603 = vmatpush3.bf16.msra.mxu1 %v4120_v21 }
0x1087   :  { %v4121_v7 = vpack.c.bf16 %v4111_v60, %v4110_v58  ;;  %v4097_v56 = vadd.f32 %v8128_v9, %v4074_v34  ;;  %v4053_v45 = vmul.f32 %v5985_v32, %v8116_v13  ;;  %v4075_v1 = vmul.f32 %v8125_v31, %v4052_v5  ;;  %v5060_v32 = vld [vmem:[#allocation7] ss:$0 sm:$0xff] }
0x1088   :  { %v4112_v0 = vadd.f32 %v4096_v55, %v7731_v16  ;;  %v5850_v16 = vld [vmem:[%s8457_s3] sm:$0xff]  }
0x1089   :  { %5604 = vmatprep.subr.bf16.mxu1 %v4121_v7  ;;  %v4113_v63 = vadd.f32 %v4097_v56, %v7734_v10  ;;  %v4076_v39 = vmul.f32 %v8125_v31, %v4053_v45  ;;  %v4098_v15 = vadd.f32 %v8128_v9, %v4075_v1 }
0x108a   :  { %5605 = vmatpush3.bf16.msra.mxu1 %v4121_v7 }
0x108b   :  { %v4122_v40 = vpack.c.bf16 %v4113_v63, %v4112_v0  ;;  %v4099_v29 = vadd.f32 %v8128_v9, %v4076_v39  ;;  %v4114_v11 = vadd.f32 %v4098_v15, %v7743_v22 }
0x108d   :  { %5606 = vmatprep.subr.bf16.mxu1 %v4122_v40  ;;  %v4115_v13 = vadd.f32 %v4099_v29, %v7746_v35 }
0x108e   :  { %5607 = vmatpush3.bf16.msra.mxu1 %v4122_v40 }
0x108f   :  { %v4123_v28 = vpack.c.bf16 %v4115_v13, %v4114_v11 }
0x1091   :  { %5608 = vmatprep.subr.bf16.mxu1 %v4123_v28 }
0x1092   :  { %5609 = vmatpush3.bf16.msra.mxu1 %v4123_v28 }
0x1093   :  { %5618 = vmatprep.subr.bf16.mxu1 %v5849_v36 }
0x1095   :  { %5611 = vmatmul.mubr.msk.bf16.vlgmr.msra.gmra.mrb[96].mxu1 %vm7594_vm9, %v8422_v25 }
0x1096   :  { %5614 = vmatprep.mubr.msk.bf16.mxu1 %vm7598_vm12, %v8422_v25  ;;  %5619 = vmatpush3.bf16.msra.mxu1 %v5849_v36 }
0x1097   :  { %5628 = vmatprep.subr.bf16.mxu1 %v5850_v16 }
0x109d   :  { %5615 = vmatmul.mubr.msk.bf16.gmra.mrb[100].mxu1 %vm7602_vm0, %v8422_v25 }
0x1168   :  { %v5612_v10 = vpop.f32.mrb[96].mxu1 }
0x1169   :  { %v4158_v22 = vpop.f32.mrb[97].mxu1 }
0x116a   :  { %v5613_v35 = vpop.f32.mrb[98].mxu1 }
0x116b   :  { %v4192_v31 = vpack.c.bf16 %v5613_v35, %v5612_v10  ;;  %v4161_v9 = vpop.f32.mrb[99].mxu1 }
0x116c   :  { %v4191_v8 = vpack.c.bf16 %v4161_v9, %v4158_v22 }
0x116e   :  { %5620 = vmatprep.mubr.msk.bf16.mxu1 %vm852_vm14, %v4191_v8 }
0x116f   :  { %5621 = vmatmul.mubr.msk.bf16.vlgmr.msra.gmra.mrb[104].mxu1 %vm852_vm14, %v4192_v31 }
0x1170   :  { %v5616_v47 = vpop.f32.mrb[100].mxu1  ;;  %5629 = vmatpush3.bf16.msra.mxu1 %v5850_v16 }
0x1171   :  { %v4174_v53 = vpop.f32.mrb[101].mxu1  ;;  %5638 = vmatprep.subr.bf16.mxu1 %v5851_v30 }
0x1172   :  { %v5617_v19 = vpop.f32.mrb[102].mxu1 }
0x1173   :  { %v4194_v26 = vpack.c.bf16 %v5617_v19, %v5616_v47  ;;  %v4177_v25 = vpop.f32.mrb[103].mxu1 }
0x1174   :  { %v4193_v61 = vpack.c.bf16 %v4177_v25, %v4174_v53  ;;  %v5852_v53 = vld [vmem:[%s8459_s14] sm:$0xff]  }
0x1175   :  { %5648 = vmatprep.subr.bf16.mxu0 %v5852_v53 }
0x1176   :  { %5624 = vmatprep.mubr.msk.bf16.mxu1 %vm852_vm14, %v4193_v61  ;;  %5649 = vmatpush3.bf16.msra.mxu0 %v5852_v53 }
0x1177   :  { %5625 = vmatmul.mubr.msk.bf16.gmra.mrb[108].mxu1 %vm852_vm14, %v4194_v26 }
0x1178   :  { %5630 = vmatprep.mubr.msk.bf16.mxu1 %vm852_vm14, %v7852_v3 }
0x117f   :  { %5631 = vmatmul.mubr.msk.bf16.vlgmr.msra.gmra.mrb[104].mxu1 %vm852_vm14, %v7868_v48 }
0x1180   :  { %5634 = vmatprep.mubr.msk.bf16.mxu1 %vm852_vm14, %v7882_v18  ;;  %5639 = vmatpush3.bf16.msra.mxu1 %v5851_v30 }
0x1187   :  { %5635 = vmatmul.mubr.msk.bf16.gmra.mrb[108].mxu1 %vm852_vm14, %v7896_v49 }
0x1252   :  { %v5632_v4 = vpop.f32.mrb[104].mxu1 }
0x1253   :  { %v4360_v59 = vadd.f32 %v5632_v4, %v5059_v50  ;;  %v4320_v38 = vpop.f32.mrb[105].mxu1 }
0x1254   :  { %v4358_v46 = vadd.f32 %v5059_v50, %v4320_v38  ;;  %v5633_v17 = vpop.f32.mrb[106].mxu1 }
0x1255   :  { %v4361_v23 = vadd.f32 %v5633_v17, %v5059_v50  ;;  %v4323_v27 = vpop.f32.mrb[107].mxu1  ;;  %v4368_v3 = vmax.f32 %v4360_v59, 0.0 }
0x1256   :  { %v4359_v54 = vadd.f32 %v5059_v50, %v4323_v27  ;;  %v4366_v57 = vmax.f32 %v4358_v46, 0.0 }
0x1257   :  { %v4369_v12 = vmax.f32 %v4361_v23, 0.0 }
0x1258   :  { %v4367_v48 = vmax.f32 %v4359_v54, 0.0 }
0x1259   :  { %v4375_v41 = vpack.c.bf16 %v4369_v12, %v4368_v3 }
0x125a   :  { %v4374_v42 = vpack.c.bf16 %v4367_v48, %v4366_v57  ;;  %v5636_v18 = vpop.f32.mrb[108].mxu1 }
0x125b   :  { %v4364_v37 = vadd.f32 %v5636_v18, %v5059_v50  ;;  %v4336_v62 = vpop.f32.mrb[109].mxu1 }
0x125c   :  { %v4362_v2 = vadd.f32 %v5059_v50, %v4336_v62  ;;  %v5637_v49 = vpop.f32.mrb[110].mxu1  ;;  %5640 = vmatprep.mubr.msk.bf16.mxu1 %vm852_vm14, %v4374_v42 }
0x125d   :  { %v4365_v21 = vadd.f32 %v5637_v49, %v5059_v50  ;;  %v4339_v14 = vpop.f32.mrb[111].mxu1  ;;  %5641 = vmatmul.mubr.msk.bf16.vlgmr.msra.gmra.mrb[112].mxu1 %vm852_vm14, %v4375_v41  ;;  %v4372_v43 = vmax.f32 %v4364_v37, 0.0 }
0x125e   :  { %v4363_v6 = vadd.f32 %v5059_v50, %v4339_v14  ;;  %v4370_v58 = vmax.f32 %v4362_v2, 0.0 }
0x125f   :  { %v4373_v20 = vmax.f32 %v4365_v21, 0.0 }
0x1260   :  { %v4371_v60 = vmax.f32 %v4363_v6, 0.0 }
0x1261   :  { %v4377_v34 = vpack.c.bf16 %v4373_v20, %v4372_v43 }
0x1262   :  { %v4376_v5 = vpack.c.bf16 %v4371_v60, %v4370_v58 }
0x1264   :  { %5644 = vmatprep.mubr.msk.bf16.mxu1 %vm852_vm14, %v4376_v5 }
0x1265   :  { %5645 = vmatmul.mubr.msk.bf16.gmra.mrb[116].mxu1 %vm852_vm14, %v4377_v34 }
0x1330   :  { %v5642_v55 = vpop.f32.mrb[112].mxu1 }
0x1331   :  { %v4439_v7 = vpop.f32.mrb[113].mxu1  ;;  %v4448_v0 = vadd.f32 %v5642_v55, %v5060_v32 }
0x1332   :  { %v4440_v56 = vadd.f32 %v5060_v32, %v4439_v7  ;;  %v5643_v45 = vpop.f32.mrb[114].mxu1 }
0x1333   :  { %v4442_v1 = vpop.f32.mrb[115].mxu1  ;;  %v4451_v15 = vadd.f32 %v5643_v45, %v5060_v32  ;;  %v4476_v11 = vsel %vm852_vm14, %v4448_v0, 0.0 }
0x1334   :  { %v4443_v63 = vadd.f32 %v5060_v32, %v4442_v1  ;;  %v4470_v39 = vsel %vm852_vm14, %v4440_v56, 0.0 }
0x1335   :  { %4471 = vadd.xlane.f32.xlu1 %v4470_v39  ;;  %v4479_v16 = vsel %vm852_vm14, %v4451_v15, 0.0 }
0x1336   :  { %v4473_v40 = vsel %vm852_vm14, %v4443_v63, 0.0 }
0x1337   :  { %4474 = vadd.xlane.f32.xlu0 %v4473_v40 }
0x1338   :  { %v5646_v29 = vpop.f32.mrb[116].mxu1 }
0x1339   :  { %4477 = vadd.xlane.f32.xlu1 %v4476_v11  ;;  %v4455_v13 = vpop.f32.mrb[117].mxu1  ;;  %v4464_v22 = vadd.f32 %v5646_v29, %v5060_v32 }
0x133a   :  { %v4456_v28 = vadd.f32 %v5060_v32, %v4455_v13  ;;  %v5647_v36 = vpop.f32.mrb[118].mxu1 }
0x133b   :  { %4480 = vadd.xlane.f32.xlu0 %v4479_v16  ;;  %v4458_v10 = vpop.f32.mrb[119].mxu1  ;;  %v4467_v9 = vadd.f32 %v5647_v36, %v5060_v32  ;;  %v4488_v30 = vsel %vm852_vm14, %v4464_v22, 0.0 }
0x133c   :  { %v4459_v35 = vadd.f32 %v5060_v32, %v4458_v10  ;;  %v4482_v31 = vsel %vm852_vm14, %v4456_v28, 0.0 }
0x133d   :  { %4483 = vadd.xlane.f32.xlu1 %v4482_v31  ;;  %v4491_v47 = vsel %vm852_vm14, %v4467_v9, 0.0 }
0x133e   :  { %v4485_v8 = vsel %vm852_vm14, %v4459_v35, 0.0 }
0x133f   :  { %4486 = vadd.xlane.f32.xlu0 %v4485_v8 }
0x1341   :  { %4489 = vadd.xlane.f32.xlu1 %v4488_v30 }
0x1343   :  { %4492 = vadd.xlane.f32.xlu0 %v4491_v47 }
0x13c2   :  { %v4472_v19 = vpop.xlane.xlu1 %4471 }
0x13c3   :  { %v4494_v26 = vmul.f32 0.0625, %v4472_v19 }
0x13c4   :  { %v4475_v25 = vpop.xlane.xlu0 %4474 }
0x13c5   :  { %v8230_v61 = vsub.f32 %v4440_v56, %v4494_v26  ;;  %v4495_v50 = vmul.f32 0.0625, %v4475_v25 }
0x13c6   :  { %v4478_v4 = vpop.xlane.xlu1 %4477 }
0x13c7   :  { %v8232_v59 = vsub.f32 %v4443_v63, %v4495_v50  ;;  %v4496_v38 = vmul.f32 0.0625, %v4478_v4  ;;  %v4510_v46 = vmul.f32 %v8230_v61, %v8230_v61  ;;  %v5853_v63 = vld [vmem:[%s6516_s12] sm:$0xff]   ;;  %v5066_v4 = vld [vmem:[#allocation9] ss:$0 sm:$0xff] }
0x13c8   :  { %v4481_v17 = vpop.xlane.xlu0 %4480  ;;  %5658 = vmatprep.subr.bf16.mxu1 %v5853_v63 }
0x13c9   :  { %v8236_v23 = vsub.f32 %v4448_v0, %v4496_v38  ;;  %v4497_v27 = vmul.f32 0.0625, %v4481_v17  ;;  %v4518_v54 = vsel %vm852_vm14, %v4510_v46, 0.0  ;;  %v4511_v3 = vmul.f32 %v8232_v59, %v8232_v59  ;;  %5659 = vmatpush3.bf16.msra.mxu1 %v5853_v63 }
0x13ca   :  { %4519 = vadd.xlane.f32.xlu1 %v4518_v54  ;;  %v4484_v12 = vpop.xlane.xlu1 %4483  ;;  %v5067_v54 = vld [vmem:[#allocation10] ss:$0 sm:$0xff] }
0x13cb   :  { %v8241_v57 = vsub.f32 %v4451_v15, %v4497_v27  ;;  %v4498_v48 = vmul.f32 0.0625, %v4484_v12  ;;  %v4521_v41 = vsel %vm852_vm14, %v4511_v3, 0.0  ;;  %v4512_v42 = vmul.f32 %v8236_v23, %v8236_v23 }
0x13cc   :  { %4522 = vadd.xlane.f32.xlu0 %v4521_v41  ;;  %v4487_v18 = vpop.xlane.xlu0 %4486 }
0x13cd   :  { %v8246_v37 = vsub.f32 %v4456_v28, %v4498_v48  ;;  %v4499_v62 = vmul.f32 0.0625, %v4487_v18  ;;  %v4524_v2 = vsel %vm852_vm14, %v4512_v42, 0.0  ;;  %v4513_v49 = vmul.f32 %v8241_v57, %v8241_v57 }
0x13ce   :  { %4525 = vadd.xlane.f32.xlu1 %v4524_v2  ;;  %v4490_v21 = vpop.xlane.xlu1 %4489 }
0x13cf   :  { %v8251_v14 = vsub.f32 %v4459_v35, %v4499_v62  ;;  %v4500_v6 = vmul.f32 0.0625, %v4490_v21  ;;  %v4527_v43 = vsel %vm852_vm14, %v4513_v49, 0.0  ;;  %v4514_v20 = vmul.f32 %v8246_v37, %v8246_v37 }
0x13d0   :  { %4528 = vadd.xlane.f32.xlu0 %v4527_v43  ;;  %v4493_v58 = vpop.xlane.xlu0 %4492 }
0x13d1   :  { %v8256_v60 = vsub.f32 %v4464_v22, %v4500_v6  ;;  %v4501_v34 = vmul.f32 0.0625, %v4493_v58  ;;  %v4530_v5 = vsel %vm852_vm14, %v4514_v20, 0.0  ;;  %v4515_v32 = vmul.f32 %v8251_v14, %v8251_v14 }
0x13d2   :  { %4531 = vadd.xlane.f32.xlu1 %v4530_v5 }
0x13d3   :  { %v8261_v55 = vsub.f32 %v4467_v9, %v4501_v34  ;;  %v4533_v7 = vsel %vm852_vm14, %v4515_v32, 0.0  ;;  %v4516_v56 = vmul.f32 %v8256_v60, %v8256_v60 }
0x13d4   :  { %4534 = vadd.xlane.f32.xlu0 %v4533_v7 }
0x13d5   :  { %v4536_v45 = vsel %vm852_vm14, %v4516_v56, 0.0  ;;  %v4517_v1 = vmul.f32 %v8261_v55, %v8261_v55 }
0x13d6   :  { %4537 = vadd.xlane.f32.xlu1 %v4536_v45 }
0x13d7   :  { %v4539_v0 = vsel %vm852_vm14, %v4517_v1, 0.0 }
0x13d8   :  { %4540 = vadd.xlane.f32.xlu0 %v4539_v0 }
0x1457   :  { %v4520_v39 = vpop.xlane.xlu1 %4519 }
0x1458   :  { %v4542_v15 = vmul.f32 0.0625, %v4520_v39 }
0x1459   :  { %v4523_v40 = vpop.xlane.xlu0 %4522 }
0x145a   :  { %v4550_v29 = vadd.f32 1e-05, %v4542_v15  ;;  %v4543_v11 = vmul.f32 0.0625, %v4523_v40 }
0x145b   :  { %v4526_v13 = vpop.xlane.xlu1 %4525 }
0x145c   :  { %5986 = vrsqrt.f32 %v4550_v29  ;;  %v4551_v28 = vadd.f32 1e-05, %v4543_v11  ;;  %v4544_v36 = vmul.f32 0.0625, %v4526_v13  ;;  %v8460_v29 = vld [vmem:[#allocation56_spill] sm:$0xff] }
0x145d   :  { %v4529_v16 = vpop.xlane.xlu0 %4528 }
0x145e   :  { %5988 = vrsqrt.f32 %v4551_v28  ;;  %v4552_v10 = vadd.f32 1e-05, %v4544_v36  ;;  %v4545_v22 = vmul.f32 0.0625, %v4529_v16  ;;  %v8461_v28 = vld [vmem:[#allocation57_spill] sm:$0xff]  ;;  %v8462_v16 = vld [vmem:[#allocation58_spill] sm:$0xff] }
0x145f   :  { %v4532_v35 = vpop.xlane.xlu1 %4531 }
0x1460   :  { %5990 = vrsqrt.f32 %v4552_v10  ;;  %v4553_v31 = vadd.f32 1e-05, %v4545_v22  ;;  %v4546_v9 = vmul.f32 0.0625, %v4532_v35  ;;  %v5068_v22 = vld [vmem:[#allocation12] ss:$0 sm:$0xff] }
0x1461   :  { %v4535_v8 = vpop.xlane.xlu0 %4534 }
0x1462   :  { %5992 = vrsqrt.f32 %v4553_v31  ;;  %v4554_v30 = vadd.f32 1e-05, %v4546_v9  ;;  %v4547_v47 = vmul.f32 0.0625, %v4535_v8 }
0x1463   :  { %v4538_v53 = vpop.xlane.xlu1 %4537 }
0x1464   :  { %5994 = vrsqrt.f32 %v4554_v30  ;;  %v4555_v19 = vadd.f32 1e-05, %v4547_v47  ;;  %v4548_v26 = vmul.f32 0.0625, %v4538_v53 }
0x1465   :  { %v4541_v25 = vpop.xlane.xlu0 %4540 }
0x1466   :  { %v5987_v50 = vpop.eup %5986  ;;  %5996 = vrsqrt.f32 %v4555_v19  ;;  %v4556_v38 = vadd.f32 1e-05, %v4548_v26  ;;  %v4549_v46 = vmul.f32 0.0625, %v4541_v25 }
0x1467   :  { %v4566_v17 = vmul.f32 %v5987_v50, %v8230_v61 }
0x1468   :  { %v5989_v27 = vpop.eup %5988  ;;  %5998 = vrsqrt.f32 %v4556_v38  ;;  %v4557_v3 = vadd.f32 1e-05, %v4549_v46 }
0x1469   :  { %v4567_v12 = vmul.f32 %v5989_v27, %v8232_v59  ;;  %v4581_v48 = vmul.f32 %v5066_v4, %v4566_v17 }
0x146a   :  { %v5991_v41 = vpop.eup %5990  ;;  %6000 = vrsqrt.f32 %v4557_v3 }
0x146b   :  { %v4568_v42 = vmul.f32 %v5991_v41, %v8236_v23  ;;  %v4582_v18 = vmul.f32 %v5066_v4, %v4567_v12  ;;  %v4596_v62 = vadd.f32 %v5067_v54, %v4581_v48 }
0x146c   :  { %v5993_v2 = vpop.eup %5992 }
0x146d   :  { %v4583_v49 = vmul.f32 %v5066_v4, %v4568_v42  ;;  %v4569_v21 = vmul.f32 %v5993_v2, %v8241_v57  ;;  %v4597_v6 = vadd.f32 %v5067_v54, %v4582_v18  ;;  %v4604_v61 = vadd.f32 %v4596_v62, %v7843_v52 }
0x146e   :  { %v5995_v43 = vpop.eup %5994 }
0x146f   :  { %v4598_v20 = vadd.f32 %v5067_v54, %v4583_v49  ;;  %v4584_v58 = vmul.f32 %v5066_v4, %v4569_v21  ;;  %v4570_v34 = vmul.f32 %v5995_v43, %v8246_v37  ;;  %v4605_v59 = vadd.f32 %v4597_v6, %v7847_v51  ;;  %v5074_v6 = vld [vmem:[#allocation13] ss:$0 sm:$0xff] }
0x1470   :  { %v5997_v5 = vpop.eup %5996 }
0x1471   :  { %v4599_v32 = vadd.f32 %v5067_v54, %v4584_v58  ;;  %v4571_v23 = vmul.f32 %v5997_v5, %v8251_v14  ;;  %v4612_v7 = vpack.c.bf16 %v4605_v59, %v4604_v61  ;;  %v4585_v45 = vmul.f32 %v5066_v4, %v4570_v34 }
0x1472   :  { %v5999_v56 = vpop.eup %5998  ;;  %v4606_v1 = vadd.f32 %v4598_v20, %v7855_v33 }
0x1473   :  { %v4607_v57 = vadd.f32 %v4599_v32, %v7858_v24  ;;  %v4572_v0 = vmul.f32 %v5999_v56, %v8256_v60  ;;  %5650 = vmatprep.mubr.msk.bf16.mxu0 %vm852_vm14, %v4612_v7  ;;  %v4586_v52 = vmul.f32 %v5066_v4, %v4571_v23  ;;  %v4600_v37 = vadd.f32 %v5067_v54, %v4585_v45 }
0x1474   :  { %v6001_v63 = vpop.eup %6000 }
0x1475   :  { %v4573_v51 = vmul.f32 %v6001_v63, %v8261_v55  ;;  %v4613_v39 = vpack.c.bf16 %v4607_v57, %v4606_v1  ;;  %v4601_v15 = vadd.f32 %v5067_v54, %v4586_v52  ;;  %v4587_v40 = vmul.f32 %v5066_v4, %v4572_v0 }
0x1476   :  { %v4608_v14 = vadd.f32 %v4600_v37, %v7871_v44 }
0x1477   :  { %5651 = vmatmul.mubr.msk.bf16.vlgmr.msra.gmra.mrb[72].mxu0 %vm852_vm14, %v4613_v39  ;;  %v4609_v33 = vadd.f32 %v4601_v15, %v8460_v29  ;;  %v4588_v11 = vmul.f32 %v5066_v4, %v4573_v51  ;;  %v4602_v24 = vadd.f32 %v5067_v54, %v4587_v40 }
0x1479   :  { %v4614_v13 = vpack.c.bf16 %v4609_v33, %v4608_v14  ;;  %v4603_v60 = vadd.f32 %v5067_v54, %v4588_v11  ;;  %v4610_v36 = vadd.f32 %v4602_v24, %v8461_v28 }
0x147b   :  { %5654 = vmatprep.mubr.msk.bf16.mxu0 %vm852_vm14, %v4614_v13  ;;  %v4611_v10 = vadd.f32 %v4603_v60, %v8462_v16 }
0x147d   :  { %v4615_v55 = vpack.c.bf16 %v4611_v10, %v4610_v36 }
0x147f   :  { %5655 = vmatmul.mubr.msk.bf16.gmra.mrb[76].mxu0 %vm852_vm14, %v4615_v55 }
0x154a   :  { %v5652_v35 = vpop.f32.mrb[72].mxu0 }
0x154b   :  { %v4686_v31 = vadd.f32 %v5652_v35, %v5068_v22  ;;  %v4677_v9 = vpop.f32.mrb[73].mxu0 }
0x154c   :  { %v4678_v44 = vadd.f32 %v5068_v22, %v4677_v9  ;;  %v5653_v8 = vpop.f32.mrb[74].mxu0 }
0x154d   :  { %v4689_v30 = vadd.f32 %v5653_v8, %v5068_v22  ;;  %v4680_v47 = vpop.f32.mrb[75].mxu0  ;;  %v4710_v19 = vmax.f32 %v4686_v31, 0.0 }
0x154e   :  { %v4681_v53 = vadd.f32 %v5068_v22, %v4680_v47  ;;  %v4708_v25 = vmax.f32 %v4678_v44, 0.0 }
0x154f   :  { %v4711_v26 = vmax.f32 %v4689_v30, 0.0 }
0x1550   :  { %v4709_v50 = vmax.f32 %v4681_v53, 0.0 }
0x1551   :  { %v4717_v4 = vpack.c.bf16 %v4711_v26, %v4710_v19 }
0x1552   :  { %v4716_v38 = vpack.c.bf16 %v4709_v50, %v4708_v25  ;;  %v5656_v46 = vpop.f32.mrb[76].mxu0 }
0x1553   :  { %v4702_v17 = vadd.f32 %v5656_v46, %v5068_v22  ;;  %v4693_v27 = vpop.f32.mrb[77].mxu0 }
0x1554   :  { %v4694_v54 = vadd.f32 %v5068_v22, %v4693_v27  ;;  %v5657_v3 = vpop.f32.mrb[78].mxu0  ;;  %5660 = vmatprep.mubr.msk.bf16.mxu1 %vm852_vm14, %v4716_v38 }
0x1555   :  { %v4705_v12 = vadd.f32 %v5657_v3, %v5068_v22  ;;  %v4696_v48 = vpop.f32.mrb[79].mxu0  ;;  %5661 = vmatmul.mubr.msk.bf16.vlgmr.msra.gmra.mrb[120].mxu1 %vm852_vm14, %v4717_v4  ;;  %v4714_v42 = vmax.f32 %v4702_v17, 0.0 }
0x1556   :  { %v4697_v41 = vadd.f32 %v5068_v22, %v4696_v48  ;;  %v4712_v62 = vmax.f32 %v4694_v54, 0.0 }
0x1557   :  { %v4715_v18 = vmax.f32 %v4705_v12, 0.0 }
0x1558   :  { %v4713_v2 = vmax.f32 %v4697_v41, 0.0 }
0x1559   :  { %v4719_v49 = vpack.c.bf16 %v4715_v18, %v4714_v42 }
0x155a   :  { %v4718_v21 = vpack.c.bf16 %v4713_v2, %v4712_v62 }
0x155c   :  { %5664 = vmatprep.mubr.msk.bf16.mxu1 %vm852_vm14, %v4718_v21 }
0x155d   :  { %5665 = vmatmul.mubr.msk.bf16.gmra.mrb[124].mxu1 %vm852_vm14, %v4719_v49 }
0x1628   :  { %v5662_v43 = vpop.f32.mrb[120].mxu1 }
0x1629   :  { %v4790_v61 = vadd.f32 %v5662_v43, %v5074_v6  ;;  %v4781_v20 = vpop.f32.mrb[121].mxu1 }
0x162a   :  { %v4782_v58 = vadd.f32 %v5074_v6, %v4781_v20  ;;  %v5663_v34 = vpop.f32.mrb[122].mxu1 }
0x162b   :  { %4814 = vst [vmem:[%s6526_s27 + $0x10] sm:$0xff] %v4790_v61  ;;  %v4793_v59 = vadd.f32 %v5663_v34, %v5074_v6  ;;  %v4784_v5 = vpop.f32.mrb[123].mxu1 }
0x162c   :  { %4812 = vst [vmem:[%s6526_s27] sm:$0xff] %v4782_v58  ;;  %v4785_v32 = vadd.f32 %v5074_v6, %v4784_v5 }
0x162d   :  { %4815 = vst [vmem:[%s6526_s27 + $0x18] sm:$0xff] %v4793_v59 }
0x162e   :  { %4813 = vst [vmem:[%s6526_s27 + $0x8] sm:$0xff] %v4785_v32 }
0x1630   :  { %v5666_v23 = vpop.f32.mrb[124].mxu1 }
0x1631   :  { %v4806_v7 = vadd.f32 %v5666_v23, %v5074_v6  ;;  %v4797_v56 = vpop.f32.mrb[125].mxu1 }
0x1632   :  { %v4798_v45 = vadd.f32 %v5074_v6, %v4797_v56  ;;  %v5667_v1 = vpop.f32.mrb[126].mxu1 }
0x1633   :  { %4818 = vst [vmem:[%s6526_s27 + $0x30] sm:$0xff] %v4806_v7  ;;  %v4809_v57 = vadd.f32 %v5667_v1, %v5074_v6  ;;  %v4800_v0 = vpop.f32.mrb[127].mxu1 }
0x1634   :  { %4816 = vst [vmem:[%s6526_s27 + $0x20] sm:$0xff] %v4798_v45  ;;  %v4801_v52 = vadd.f32 %v5074_v6, %v4800_v0 }
0x1635   :  { %4819 = vst [vmem:[%s6526_s27 + $0x38] sm:$0xff] %v4809_v57 }
0x1636   :  { %4817 = vst [vmem:[%s6526_s27 + $0x28] sm:$0xff] %v4801_v52 }
0x1637   :  { %4824 = vsyncpa [#allocation3], 1 }
0x1638   :  { %4825 = vsyncpa [#allocation5], 1 }
0x1639   :  { %4826 = vsyncpa [#allocation8], 1 }
0x163a   :  { %4827 = vsyncpa [#allocation11], 1 }
0x163b   :  { %4828 = vsyncpa [#allocation14], 1 }

</bundles_post_ra>
